<compile_context>
chip_gen: v6e
topology: v6e:2x2x1
jax: 0.10.0
libtpu: 0.0.40
codegen_flags: <defaults>
</compile_context>

<pallas_src>
import functools

import jax
import jax.numpy as jnp
from jax.experimental import pallas as pl
from jax.experimental.pallas import tpu as pltpu

IMG_SHAPE = (3, 32, 32)                                     # (C, H, W)
IN_FEATURES = IMG_SHAPE[0] * IMG_SHAPE[1] * IMG_SHAPE[2]    # 3072
H1, H2 = 512, 256
OUT_PAD = 128          # lane-dense padding of the size-1 output dim
LEAK = 0.2
TILE_B = 256           # batch tile: MXU-sized for v6e/v7x (v5e still fine)


def _round_up(n, m):
    return ((n + m - 1) // m) * m


def _leaky_relu(x, slope):
    return jnp.where(x > 0, x, slope * x)


def _disc_kernel(x_ref, w1_ref, b1_ref, w2_ref, b2_ref, w3_ref, b3_ref, o_ref):
    # x: (TILE_B, 3072) bf16; weights bf16 (in, out); biases f32 (1, out).
    x = x_ref[...]

    h = jnp.dot(x, w1_ref[...], preferred_element_type=jnp.float32)   # (TB, 512) f32
    h = _leaky_relu(h + b1_ref[...], LEAK)

    h = jnp.dot(h.astype(jnp.bfloat16), w2_ref[...],
                preferred_element_type=jnp.float32)                   # (TB, 256) f32
    h = _leaky_relu(h + b2_ref[...], LEAK)

    o = jnp.dot(h.astype(jnp.bfloat16), w3_ref[...],
                preferred_element_type=jnp.float32)                   # (TB, 128) padded
    o_ref[...] = (o + b3_ref[...]).astype(o_ref.dtype)


def prepare_params(params):
    """One-time weight prep (run OUTSIDE the training/inference step).

    PyTorch Linear stores W as (out, in); we store (in, out) bf16 so the kernel
    computes y = x @ W + b directly, and pad the final (256, 1) column to 128
    lanes so the output store is lane-dense.
    """
    w1, b1, w2, b2, w3, b3 = params
    w1t = w1.T.astype(jnp.bfloat16)                                  # (3072, 512)
    w2t = w2.T.astype(jnp.bfloat16)                                  # (512, 256)
    w3t = jnp.pad(w3.T, ((0, 0), (0, OUT_PAD - 1))).astype(jnp.bfloat16)  # (256, 128)
    b1r = b1.reshape(1, H1).astype(jnp.float32)
    b2r = b2.reshape(1, H2).astype(jnp.float32)
    b3p = jnp.pad(b3.reshape(1, 1), ((0, 0), (0, OUT_PAD - 1))).astype(jnp.float32)
    return (w1t, b1r, w2t, b2r, w3t, b3p)


@jax.jit
def discriminator_forward(img, prepped_params):
    """img: (B, C, H, W) float32, NCHW like PyTorch. Returns validity (B, 1) f32."""
    w1t, b1r, w2t, b2r, w3t, b3p = prepped_params

    b = img.shape[0]
    x = img.reshape(b, -1).astype(jnp.bfloat16)        # == img.view(B, -1), bf16 feed

    # Batch tile: full TILE_B for real workloads, a small 8-aligned tile for
    # tiny batches so we do not pad 8 rows up to 256.
    tile_b = TILE_B if b >= TILE_B else _round_up(b, 8)
    bp = _round_up(b, tile_b)
    if bp != b:
        x = jnp.pad(x, ((0, bp - b), (0, 0)))

    const = lambda i: (0, 0)   # weights/biases: resident, never re-fetched
    out_padded = pl.pallas_call(
        _disc_kernel,
        out_shape=jax.ShapeDtypeStruct((bp, OUT_PAD), jnp.float32),
        grid=(bp // tile_b,),
        in_specs=[
            pl.BlockSpec((tile_b, IN_FEATURES), lambda i: (i, 0)),   # x tile
            pl.BlockSpec((IN_FEATURES, H1), const),                  # w1
            pl.BlockSpec((1, H1), const),                            # b1
            pl.BlockSpec((H1, H2), const),                           # w2
            pl.BlockSpec((1, H2), const),                            # b2
            pl.BlockSpec((H2, OUT_PAD), const),                      # w3 (padded)
            pl.BlockSpec((1, OUT_PAD), const),                       # b3 (padded)
        ],
        out_specs=pl.BlockSpec((tile_b, OUT_PAD), lambda i: (i, 0)),
        compiler_params=pltpu.CompilerParams(
            dimension_semantics=("parallel",),    # shards batch tiles across TCs
            vmem_limit_bytes=24 << 20,            # ~10 MiB actual footprint
        ),
    )(x, w1t, b1r, w2t, b2r, w3t, b3p)

    return out_padded[:b, :1]                      # (B, 1) validity


def init_params(key):
    """Deterministic parameter init matching the PyTorch module's shapes."""
    ks = jax.random.split(key, 6)

    def linear(kw, kb, fan_in, fan_out):
        bound = 1.0 / jnp.sqrt(fan_in)
        w = jax.random.uniform(kw, (fan_out, fan_in), jnp.float32, -bound, bound)
        b_ = jax.random.uniform(kb, (fan_out,), jnp.float32, -bound, bound)
        return w, b_

    w1, b1 = linear(ks[0], ks[1], IN_FEATURES, H1)   # (512, 3072), (512,)
    w2, b2 = linear(ks[2], ks[3], H1, H2)            # (256, 512),  (256,)
    w3, b3 = linear(ks[4], ks[5], H2, 1)             # (1, 256),    (1,)
    return (w1, b1, w2, b2, w3, b3)


def _reference_forward(img, params):
    """Plain-JAX f32 reference mirroring the PyTorch forward."""
    w1, b1, w2, b2, w3, b3 = params
    x = img.reshape(img.shape[0], -1)
    h = _leaky_relu(x @ w1.T + b1, LEAK)
    h = _leaky_relu(h @ w2.T + b2, LEAK)
    return h @ w3.T + b3


if __name__ == "__main__":
    key = jax.random.PRNGKey(0)
    k_img, k_par = jax.random.split(key)

    batch = 8
    img = jax.random.normal(k_img, (batch,) + IMG_SHAPE, jnp.float32)  # (8, 3, 32, 32)
    params = init_params(k_par)
    prepped = prepare_params(params)   # one-time weight prep (outside the step)

    validity = discriminator_forward(img, prepped)
    validity = jax.block_until_ready(validity)

    ref = _reference_forward(img, params)
    assert validity.shape == (batch, 1), validity.shape
    # bf16 matmuls with f32 accumulation: allow ~1e-2-level divergence from f32.
    assert jnp.allclose(validity, ref, atol=5e-2, rtol=5e-2), (
        float(jnp.max(jnp.abs(validity - ref)))
    )

    print("KERNEL_OK")
</pallas_src>

<mosaic_0001>
module attributes {stable_mosaic.version = 11 : i64} {
  func.func @_disc_kernel(%arg0: i32, %arg1: memref<8x3072xbf16, #tpu.memory_space<vmem>>, %arg2: memref<3072x512xbf16, #tpu.memory_space<vmem>>, %arg3: memref<1x512xf32, #tpu.memory_space<vmem>>, %arg4: memref<512x256xbf16, #tpu.memory_space<vmem>>, %arg5: memref<1x256xf32, #tpu.memory_space<vmem>>, %arg6: memref<256x128xbf16, #tpu.memory_space<vmem>>, %arg7: memref<1x128xf32, #tpu.memory_space<vmem>>, %arg8: memref<8x128xf32, #tpu.memory_space<vmem>>) attributes {dimension_semantics = [#tpu.dimension_semantics<parallel>], iteration_bounds = array<i64: 1>, scalar_prefetch = 0 : i64, scratch_operands = 0 : i64, tpu.core_type = #tpu.core_type<tc>, window_params = [{transform_indices = @transform_0, window_bounds = array<i64: 8, 3072>}, {pipeline_mode = #tpu.pipeline_mode<synchronous>, transform_indices = @transform_1, window_bounds = array<i64: 3072, 512>}, {pipeline_mode = #tpu.pipeline_mode<synchronous>, transform_indices = @transform_2, window_bounds = array<i64: 1, 512>}, {pipeline_mode = #tpu.pipeline_mode<synchronous>, transform_indices = @transform_3, window_bounds = array<i64: 512, 256>}, {pipeline_mode = #tpu.pipeline_mode<synchronous>, transform_indices = @transform_4, window_bounds = array<i64: 1, 256>}, {pipeline_mode = #tpu.pipeline_mode<synchronous>, transform_indices = @transform_5, window_bounds = array<i64: 256, 128>}, {pipeline_mode = #tpu.pipeline_mode<synchronous>, transform_indices = @transform_6, window_bounds = array<i64: 1, 128>}, {transform_indices = @transform_7, window_bounds = array<i64: 8, 128>}]} {
    %c0 = arith.constant 0 : index
    %c0_0 = arith.constant 0 : index
    %0 = vector.load %arg1[%c0, %c0_0] : memref<8x3072xbf16, #tpu.memory_space<vmem>>, vector<8x3072xbf16>
    %c0_1 = arith.constant 0 : index
    %c0_2 = arith.constant 0 : index
    %1 = vector.load %arg2[%c0_1, %c0_2] : memref<3072x512xbf16, #tpu.memory_space<vmem>>, vector<3072x512xbf16>
    %cst = arith.constant dense<0.000000e+00> : vector<8x512xf32>
    %2 = tpu.matmul %0, %1, %cst {dimension_numbers = #tpu.dot_dimension_numbers<[1], [0], [0], [1], [0, 0, 1, 1], [], []>} : vector<8x3072xbf16>, vector<3072x512xbf16>, vector<8x512xf32> -> vector<8x512xf32>
    %c0_3 = arith.constant 0 : index
    %c0_4 = arith.constant 0 : index
    %3 = vector.load %arg3[%c0_3, %c0_4] : memref<1x512xf32, #tpu.memory_space<vmem>>, vector<1x512xf32>
    %4 = vector.broadcast %3 : vector<1x512xf32> to vector<8x512xf32>
    %5 = arith.addf %2, %4 : vector<8x512xf32>
    %cst_5 = arith.constant 0.000000e+00 : f32
    %6 = vector.broadcast %cst_5 : f32 to vector<8x512xf32>
    %7 = arith.cmpf ogt, %5, %6 : vector<8x512xf32>
    %cst_6 = arith.constant 2.000000e-01 : f32
    %8 = vector.broadcast %cst_6 : f32 to vector<8x512xf32>
    %9 = arith.mulf %8, %5 : vector<8x512xf32>
    %10 = arith.select %7, %5, %9 : vector<8x512xi1>, vector<8x512xf32>
    %11 = arith.truncf %10 : vector<8x512xf32> to vector<8x512xbf16>
    %c0_7 = arith.constant 0 : index
    %c0_8 = arith.constant 0 : index
    %12 = vector.load %arg4[%c0_7, %c0_8] : memref<512x256xbf16, #tpu.memory_space<vmem>>, vector<512x256xbf16>
    %cst_9 = arith.constant dense<0.000000e+00> : vector<8x256xf32>
    %13 = tpu.matmul %11, %12, %cst_9 {dimension_numbers = #tpu.dot_dimension_numbers<[1], [0], [0], [1], [0, 0, 1, 1], [], []>} : vector<8x512xbf16>, vector<512x256xbf16>, vector<8x256xf32> -> vector<8x256xf32>
    %c0_10 = arith.constant 0 : index
    %c0_11 = arith.constant 0 : index
    %14 = vector.load %arg5[%c0_10, %c0_11] : memref<1x256xf32, #tpu.memory_space<vmem>>, vector<1x256xf32>
    %15 = vector.broadcast %14 : vector<1x256xf32> to vector<8x256xf32>
    %16 = arith.addf %13, %15 : vector<8x256xf32>
    %cst_12 = arith.constant 0.000000e+00 : f32
    %17 = vector.broadcast %cst_12 : f32 to vector<8x256xf32>
    %18 = arith.cmpf ogt, %16, %17 : vector<8x256xf32>
    %cst_13 = arith.constant 2.000000e-01 : f32
    %19 = vector.broadcast %cst_13 : f32 to vector<8x256xf32>
    %20 = arith.mulf %19, %16 : vector<8x256xf32>
    %21 = arith.select %18, %16, %20 : vector<8x256xi1>, vector<8x256xf32>
    %22 = arith.truncf %21 : vector<8x256xf32> to vector<8x256xbf16>
    %c0_14 = arith.constant 0 : index
    %c0_15 = arith.constant 0 : index
    %23 = vector.load %arg6[%c0_14, %c0_15] : memref<256x128xbf16, #tpu.memory_space<vmem>>, vector<256x128xbf16>
    %cst_16 = arith.constant dense<0.000000e+00> : vector<8x128xf32>
    %24 = tpu.matmul %22, %23, %cst_16 {dimension_numbers = #tpu.dot_dimension_numbers<[1], [0], [0], [1], [0, 0, 1, 1], [], []>} : vector<8x256xbf16>, vector<256x128xbf16>, vector<8x128xf32> -> vector<8x128xf32>
    %c0_17 = arith.constant 0 : index
    %c0_18 = arith.constant 0 : index
    %25 = vector.load %arg7[%c0_17, %c0_18] : memref<1x128xf32, #tpu.memory_space<vmem>>, vector<1x128xf32>
    %26 = vector.broadcast %25 : vector<1x128xf32> to vector<8x128xf32>
    %27 = arith.addf %24, %26 : vector<8x128xf32>
    %c0_19 = arith.constant 0 : index
    %c0_20 = arith.constant 0 : index
    %28 = vector.load %arg8[%c0_19, %c0_20] : memref<8x128xf32, #tpu.memory_space<vmem>>, vector<8x128xf32>
    tpu.vector_store %arg8[%c0_19, %c0_20], %27 {strides = array<i32>} : memref<8x128xf32, #tpu.memory_space<vmem>>, vector<8x128xf32>,
    return
  }
  func.func @transform_0(%arg0: i32) -> (i32, i32) {
    %c0_i32 = arith.constant 0 : i32
    %c0_i32_0 = arith.constant 0 : i32
    return %arg0, %c0_i32 : i32, i32
  }
  func.func @transform_1(%arg0: i32) -> (i32, i32) {
    %c0_i32 = arith.constant 0 : i32
    %c0_i32_0 = arith.constant 0 : i32
    %c0_i32_1 = arith.constant 0 : i32
    return %c0_i32, %c0_i32_0 : i32, i32
  }
  func.func @transform_2(%arg0: i32) -> (i32, i32) {
    %c0_i32 = arith.constant 0 : i32
    %c0_i32_0 = arith.constant 0 : i32
    %c0_i32_1 = arith.constant 0 : i32
    return %c0_i32, %c0_i32_0 : i32, i32
  }
  func.func @transform_3(%arg0: i32) -> (i32, i32) {
    %c0_i32 = arith.constant 0 : i32
    %c0_i32_0 = arith.constant 0 : i32
    %c0_i32_1 = arith.constant 0 : i32
    return %c0_i32, %c0_i32_0 : i32, i32
  }
  func.func @transform_4(%arg0: i32) -> (i32, i32) {
    %c0_i32 = arith.constant 0 : i32
    %c0_i32_0 = arith.constant 0 : i32
    %c0_i32_1 = arith.constant 0 : i32
    return %c0_i32, %c0_i32_0 : i32, i32
  }
  func.func @transform_5(%arg0: i32) -> (i32, i32) {
    %c0_i32 = arith.constant 0 : i32
    %c0_i32_0 = arith.constant 0 : i32
    %c0_i32_1 = arith.constant 0 : i32
    return %c0_i32, %c0_i32_0 : i32, i32
  }
  func.func @transform_6(%arg0: i32) -> (i32, i32) {
    %c0_i32 = arith.constant 0 : i32
    %c0_i32_0 = arith.constant 0 : i32
    %c0_i32_1 = arith.constant 0 : i32
    return %c0_i32, %c0_i32_0 : i32, i32
  }
  func.func @transform_7(%arg0: i32) -> (i32, i32) {
    %c0_i32 = arith.constant 0 : i32
    %c0_i32_0 = arith.constant 0 : i32
    return %arg0, %c0_i32 : i32, i32
  }
}

</mosaic_0001>

<bundles_post_ra>
// kernel: discriminator_forward.1
= control target key start
LH: loop header
LB: loop body
LE: loop exit
PB: predicated region body
PF: predicated region fallthrough
CT: control target
= control target key end

     0   :  { %12 = vsyncpa [#allocation3], 0  ;;  %s9160_s0 = inlined_call_operand.vmem [shape: bf16[8,3072], index: 0, kind: input, shape index: {}]   ;;  %s9161_s1 = inlined_call_operand.hbm [shape: bf16[3072,512], index: 1, kind: input, shape index: {}]   ;;  %s9162_s2 = inlined_call_operand.hbm [shape: f32[1,512], index: 2, kind: input, shape index: {}]   ;;  %s9163_s3 = inlined_call_operand.hbm [shape: bf16[512,256], index: 3, kind: input, shape index: {}]   ;;  %s9164_s4 = inlined_call_operand.hbm [shape: f32[1,256], index: 4, kind: input, shape index: {}]   ;;  %s9165_s5 = inlined_call_operand.hbm [shape: bf16[256,128], index: 5, kind: input, shape index: {}]   ;;  %s9166_s6 = inlined_call_operand.hbm [shape: f32[1,128], index: 6, kind: input, shape index: {}]   ;;  %s9167_s7 = inlined_call_operand.vmem [shape: f32[8,128], index: 7, kind: output, shape index: {}]  }
   0x1   :  { %13 = vsyncpa [#allocation5], 0 }
   0x2   :  { %14 = vsyncpa [#allocation8], 0 }
   0x3   :  { %15 = vsyncpa [#allocation11], 0  ;;  %s8823_s24 = smov [#allocation4]   ;;  %s8824_s26 = smov [#allocation7]  }
   0x4   :  { %s36_s25 = sshll.u32 %s8823_s24, 4  ;;  %s58_s27 = sshll.u32 %s8824_s26, 4  ;;  %s37_s25 = int_to_ptr.vmem [resolvable:$true] %s36_s25  ;;  %s59_s27 = int_to_ptr.vmem [resolvable:$true] %s58_s27 }
   0x5   :  { %s8703_s28 = scalar_lea.vmem %s37_s25, 64  ;;  %p8708_p1 = scmp.lt.s32.totalorder %s37_s25, %s37_s25 }
   0x6   :  { %p8704_p0 = scmp.ne.s32.totalorder %s37_s25, %s8703_s28  ;;  %p8709_p2 = scmp.lt.s32.totalorder %s8703_s28, %s8703_s28 }
   0x8   :  { %p8710_p3 = por %p8709_p2, %p8708_p1 }
   0xa   :  { %p8711_p4 = pnand %p8710_p3, %p8704_p0 }
   0xc   :  { %8714 = shalt.err (!%p8711_p4)
}
   0xd   :  { %39 = dma.hbm_to_vmem [thread:$0]  %s9162_s2, 64, %s37_s25, [#allocation5]  }
   0xe   :  { %s8723_s8 = scalar_lea.vmem %s59_s27, 32  ;;  %p8728_p6 = scmp.lt.s32.totalorder %s59_s27, %s59_s27 }
   0xf   :  { %p8724_p5 = scmp.ne.s32.totalorder %s59_s27, %s8723_s8  ;;  %p8729_p7 = scmp.lt.s32.totalorder %s8723_s8, %s8723_s8 }
  0x11   :  { %p8730_p8 = por %p8729_p7, %p8728_p6 }
  0x13   :  { %p8731_p9 = pnand %p8730_p8, %p8724_p5 }
  0x15   :  { %8734 = shalt.err (!%p8731_p9)
}
  0x16   :  { %61 = dma.hbm_to_vmem [thread:$0]  %s9164_s4, 32, %s59_s27, [#allocation8]  }
  0x17   :  { %s8825_s11 = smov [#allocation2]  }
  0x18   :  { %s23_s12 = sshll.u32 %s8825_s11, 4  ;;  %s24_s12 = int_to_ptr.vmem [resolvable:$true] %s23_s12 }
  0x19   :  { %s8743_s13 = scalar_lea.vmem %s24_s12, 98304  ;;  %p8748_p11 = scmp.lt.s32.totalorder %s24_s12, %s24_s12 }
  0x1a   :  { %p8744_p10 = scmp.ne.s32.totalorder %s24_s12, %s8743_s13  ;;  %p8749_p12 = scmp.lt.s32.totalorder %s8743_s13, %s8743_s13 }
  0x1c   :  { %p8750_p13 = por %p8749_p12, %p8748_p11 }
  0x1e   :  { %p8751_p0 = pnand %p8750_p13, %p8744_p10 }
  0x20   :  { %8754 = shalt.err (!%p8751_p0)
}
  0x21   :  { %s8826_s2 = smov 256   ;;  %s8827_s14 = smov 16  }
  0x22   :  { %29 = dma.hbm_to_vmem [thread:$0]  %s9161_s1, 98304, %s24_s12, [#allocation3], %s8826_s2, %s8826_s2, %s8827_s14  }
  0x23   :  { %s8828_s17 = smov [#allocation6]  }
  0x24   :  { %s45_s18 = sshll.u32 %s8828_s17, 4  ;;  %s46_s18 = int_to_ptr.vmem [resolvable:$true] %s45_s18 }
  0x25   :  { %s8763_s4 = scalar_lea.vmem %s46_s18, 8192  ;;  %p8768_p2 = scmp.lt.s32.totalorder %s46_s18, %s46_s18 }
  0x26   :  { %p8764_p1 = scmp.ne.s32.totalorder %s46_s18, %s8763_s4  ;;  %p8769_p3 = scmp.lt.s32.totalorder %s8763_s4, %s8763_s4 }
  0x28   :  { %p8770_p4 = por %p8769_p3, %p8768_p2 }
  0x2a   :  { %p8771_p5 = pnand %p8770_p4, %p8764_p1 }
  0x2c   :  { %8774 = shalt.err (!%p8771_p5)
}
  0x2d   :  { %s8829_s19 = smov 128   ;;  %s8830_s20 = smov 8  }
  0x2e   :  { %51 = dma.hbm_to_vmem [thread:$0]  %s9163_s3, 8192, %s46_s18, [#allocation5], %s8829_s19, %s8829_s19, %s8830_s20  }
  0x2f   :  { %s8831_s23 = smov [#allocation9]  }
  0x30   :  { %s67_s24 = sshll.u32 %s8831_s23, 4  ;;  %s68_s24 = int_to_ptr.vmem [resolvable:$true] %s67_s24 }
  0x31   :  { %s8783_s1 = scalar_lea.vmem %s68_s24, 2048  ;;  %p8788_p7 = scmp.lt.s32.totalorder %s68_s24, %s68_s24 }
  0x32   :  { %p8784_p6 = scmp.ne.s32.totalorder %s68_s24, %s8783_s1  ;;  %p8789_p8 = scmp.lt.s32.totalorder %s8783_s1, %s8783_s1 }
  0x34   :  { %p8790_p9 = por %p8789_p8, %p8788_p7 }
  0x36   :  { %p8791_p10 = pnand %p8790_p9, %p8784_p6 }
  0x38   :  { %8794 = shalt.err (!%p8791_p10)
}
  0x39   :  { %s8832_s25 = smov 64   ;;  %s8833_s26 = smov 4  }
  0x3a   :  { %73 = dma.hbm_to_vmem [thread:$0]  %s9165_s5, 2048, %s68_s24, [#allocation8], %s8832_s25, %s8832_s25, %s8833_s26  }
  0x3b   :  { %s8834_s29 = smov [#allocation10]  }
  0x3c   :  { %s80_s30 = sshll.u32 %s8834_s29, 4  ;;  %s81_s30 = int_to_ptr.vmem [resolvable:$true] %s80_s30 }
  0x3d   :  { %s8803_s3 = scalar_lea.vmem %s81_s30, 16  ;;  %s8807_s8 = scalar_lea.vmem %s81_s30, 32 }
  0x3e   :  { %p8804_p11 = scmp.ne.s32.totalorder %s81_s30, %s8803_s3  ;;  %p8808_p12 = scmp.lt.s32.totalorder %s81_s30, %s81_s30 }
  0x3f   :  { %p8809_p13 = scmp.lt.s32.totalorder %s8807_s8, %s8803_s3 }
  0x41   :  { %p8810_p0 = por %p8809_p13, %p8808_p12 }
  0x43   :  { %p8811_p1 = pnand %p8810_p0, %p8804_p11 }
  0x45   :  { %8814 = shalt.err (!%p8811_p1)
}
  0x46   :  { %83 = dma.hbm_to_vmem [thread:$0]  %s9166_s6, 16, %s81_s30, [#allocation11]  }
  0x47   :  { %8815 = dma.done.wait [#allocation3], 98304  }
  0x48   :  { %8816 = vsyncadd [#allocation3], 4294868992 }
  0x49   :  { %8817 = dma.done.wait [#allocation5], 8256  }
  0x4a   :  { %8818 = vsyncadd [#allocation5], 4294959040 }
  0x4b   :  { %8819 = dma.done.wait [#allocation8], 2080  }
  0x4c   :  { %8820 = vsyncadd [#allocation8], 4294965216 }
  0x4d   :  { %8821 = dma.done.wait [#allocation11], 16  }
  0x4e   :  { %8822 = vsyncadd [#allocation11], 4294967280  ;;  %v7406_v0 = vld [vmem:[#allocation2 + $0xe4] ss:$16 sps:$4 sm:$0xff]   ;;  %v7410_v2 = vld [vmem:[#allocation2 + $0xe0] ss:$16 sps:$4 sm:$0xff]  }
  0x4f   :  { %v7408_v1 = vld [vmem:[#allocation2 + $0x2e4] ss:$16 sps:$4 sm:$0xff]   ;;  %4829 = vmatprep.subr.bf16.mxu0 %v7406_v0  ;;  %v7411_v3 = vld [vmem:[#allocation2 + $0x2e0] ss:$16 sps:$4 sm:$0xff]   ;;  %v104_v48 = vld [vmem:[%s9160_s0 + $0x8] sm:$0xff] }
  0x50   :  { %4870 = vmatprep.subr.bf16.mxu1 %v7408_v1  ;;  %v7412_v4 = vld [vmem:[#allocation2 + $0xc4] ss:$16 sps:$4 sm:$0xff]   ;;  %4830 = vmatpush1.bf16.msra.mxu0 %v7410_v2  ;;  %v7416_v6 = vld [vmem:[#allocation2 + $0xc0] ss:$16 sps:$4 sm:$0xff]   ;;  %v8901_v51 = vcombine.high %v104_v48, %v104_v48 }
  0x51   :  { %4871 = vmatpush1.bf16.msra.mxu1 %v7411_v3  ;;  %v7414_v5 = vld [vmem:[#allocation2 + $0x2c4] ss:$16 sps:$4 sm:$0xff]   ;;  %4831 = vmatprep.subr.bf16.mxu0 %v7412_v4  ;;  %v7417_v7 = vld [vmem:[#allocation2 + $0x2c0] ss:$16 sps:$4 sm:$0xff]  }
  0x52   :  { %4872 = vmatprep.subr.bf16.mxu1 %v7414_v5  ;;  %v7418_v8 = vld [vmem:[#allocation2 + $0xa4] ss:$16 sps:$4 sm:$0xff]   ;;  %v7422_v10 = vld [vmem:[#allocation2 + $0xa0] ss:$16 sps:$4 sm:$0xff]   ;;  %4902 = vmatprep.mubr.bf16.mxu1 %v8901_v51 }
  0x53   :  { %v7420_v9 = vld [vmem:[#allocation2 + $0x2a4] ss:$16 sps:$4 sm:$0xff]   ;;  %v7423_v11 = vld [vmem:[#allocation2 + $0x2a0] ss:$16 sps:$4 sm:$0xff]  }
  0x54   :  { %4832 = vmatpush1.bf16.msra.mxu0 %v7416_v6  ;;  %v7424_v12 = vld [vmem:[#allocation2 + $0x84] ss:$16 sps:$4 sm:$0xff]   ;;  %v7428_v14 = vld [vmem:[#allocation2 + $0x80] ss:$16 sps:$4 sm:$0xff]  }
  0x55   :  { %4873 = vmatpush1.bf16.msra.mxu1 %v7417_v7  ;;  %4833 = vmatprep.subr.bf16.mxu0 %v7418_v8  ;;  %v7426_v13 = vld [vmem:[#allocation2 + $0x284] ss:$16 sps:$4 sm:$0xff]   ;;  %v7429_v15 = vld [vmem:[#allocation2 + $0x280] ss:$16 sps:$4 sm:$0xff]   ;;  %v8907_v7 = vcombine.low %v104_v48, %v104_v48 }
  0x56   :  { %4874 = vmatprep.subr.bf16.mxu1 %v7420_v9  ;;  %v7430_v16 = vld [vmem:[#allocation2 + $0x64] ss:$16 sps:$4 sm:$0xff]   ;;  %v7434_v18 = vld [vmem:[#allocation2 + $0x60] ss:$16 sps:$4 sm:$0xff]  }
  0x57   :  { %v7432_v17 = vld [vmem:[#allocation2 + $0x264] ss:$16 sps:$4 sm:$0xff]   ;;  %v7435_v19 = vld [vmem:[#allocation2 + $0x260] ss:$16 sps:$4 sm:$0xff]  }
  0x58   :  { %4834 = vmatpush1.bf16.msra.mxu0 %v7422_v10  ;;  %v7436_v20 = vld [vmem:[#allocation2 + $0x44] ss:$16 sps:$4 sm:$0xff]   ;;  %v7440_v22 = vld [vmem:[#allocation2 + $0x40] ss:$16 sps:$4 sm:$0xff]  }
  0x59   :  { %4875 = vmatpush1.bf16.msra.mxu1 %v7423_v11  ;;  %4835 = vmatprep.subr.bf16.mxu0 %v7424_v12  ;;  %v7438_v21 = vld [vmem:[#allocation2 + $0x244] ss:$16 sps:$4 sm:$0xff]   ;;  %v7441_v23 = vld [vmem:[#allocation2 + $0x240] ss:$16 sps:$4 sm:$0xff]  }
  0x5a   :  { %4876 = vmatprep.subr.bf16.mxu1 %v7426_v13  ;;  %v7442_v24 = vld [vmem:[#allocation2 + $0x24] ss:$16 sps:$4 sm:$0xff]   ;;  %v7446_v26 = vld [vmem:[#allocation2 + $0x20] ss:$16 sps:$4 sm:$0xff]  }
  0x5b   :  { %v7444_v25 = vld [vmem:[#allocation2 + $0x224] ss:$16 sps:$4 sm:$0xff]   ;;  %v7447_v27 = vld [vmem:[#allocation2 + $0x220] ss:$16 sps:$4 sm:$0xff]  }
  0x5c   :  { %4836 = vmatpush1.bf16.msra.mxu0 %v7428_v14  ;;  %v7448_v28 = vld [vmem:[#allocation2 + $0x4] ss:$16 sps:$4 sm:$0xff]   ;;  %v7452_v30 = vld [vmem:[#allocation2] ss:$16 sps:$4 sm:$0xff]  }
  0x5d   :  { %4877 = vmatpush1.bf16.msra.mxu1 %v7429_v15  ;;  %4837 = vmatprep.subr.bf16.mxu0 %v7430_v16  ;;  %v7450_v29 = vld [vmem:[#allocation2 + $0x204] ss:$16 sps:$4 sm:$0xff]   ;;  %v7453_v31 = vld [vmem:[#allocation2 + $0x200] ss:$16 sps:$4 sm:$0xff]  }
  0x5e   :  { %4878 = vmatprep.subr.bf16.mxu1 %v7432_v17  ;;  %v7454_v32 = vld [vmem:[#allocation2 + $0x1e4] ss:$16 sps:$4 sm:$0xff]   ;;  %v7458_v34 = vld [vmem:[#allocation2 + $0x1e0] ss:$16 sps:$4 sm:$0xff]  }
  0x5f   :  { %v7456_v33 = vld [vmem:[#allocation2 + $0x3e4] ss:$16 sps:$4 sm:$0xff]   ;;  %v7459_v35 = vld [vmem:[#allocation2 + $0x3e0] ss:$16 sps:$4 sm:$0xff]  }
  0x60   :  { %4838 = vmatpush1.bf16.msra.mxu0 %v7434_v18  ;;  %v7460_v36 = vld [vmem:[#allocation2 + $0x1c4] ss:$16 sps:$4 sm:$0xff]   ;;  %v7464_v38 = vld [vmem:[#allocation2 + $0x1c0] ss:$16 sps:$4 sm:$0xff]  }
  0x61   :  { %4879 = vmatpush1.bf16.msra.mxu1 %v7435_v19  ;;  %4839 = vmatprep.subr.bf16.mxu0 %v7436_v20  ;;  %v7462_v37 = vld [vmem:[#allocation2 + $0x3c4] ss:$16 sps:$4 sm:$0xff]   ;;  %v7465_v39 = vld [vmem:[#allocation2 + $0x3c0] ss:$16 sps:$4 sm:$0xff]  }
  0x62   :  { %4880 = vmatprep.subr.bf16.mxu1 %v7438_v21  ;;  %v7466_v40 = vld [vmem:[#allocation2 + $0x1a4] ss:$16 sps:$4 sm:$0xff]   ;;  %v7470_v42 = vld [vmem:[#allocation2 + $0x1a0] ss:$16 sps:$4 sm:$0xff]  }
  0x63   :  { %v7468_v41 = vld [vmem:[#allocation2 + $0x3a4] ss:$16 sps:$4 sm:$0xff]   ;;  %v7471_v43 = vld [vmem:[#allocation2 + $0x3a0] ss:$16 sps:$4 sm:$0xff]  }
  0x64   :  { %4840 = vmatpush1.bf16.msra.mxu0 %v7440_v22  ;;  %v7472_v44 = vld [vmem:[#allocation2 + $0x184] ss:$16 sps:$4 sm:$0xff]   ;;  %v7476_v49 = vld [vmem:[#allocation2 + $0x180] ss:$16 sps:$4 sm:$0xff]  }
  0x65   :  { %4881 = vmatpush1.bf16.msra.mxu1 %v7441_v23  ;;  %4841 = vmatprep.subr.bf16.mxu0 %v7442_v24  ;;  %v7474_v45 = vld [vmem:[#allocation2 + $0x384] ss:$16 sps:$4 sm:$0xff]   ;;  %v7477_v50 = vld [vmem:[#allocation2 + $0x380] ss:$16 sps:$4 sm:$0xff]  }
  0x66   :  { %4882 = vmatprep.subr.bf16.mxu1 %v7444_v25  ;;  %v103_v46 = vld [vmem:[%s9160_s0] sm:$0xff] }
  0x67   :  { %v8896_v47 = vcombine.high %v103_v46, %v103_v46  ;;  %v7478_v52 = vld [vmem:[#allocation2 + $0x164] ss:$16 sps:$4 sm:$0xff]   ;;  %v7482_v54 = vld [vmem:[#allocation2 + $0x160] ss:$16 sps:$4 sm:$0xff]   ;;  %v8905_v6 = vcombine.low %v103_v46, %v103_v46 }
  0x68   :  { %4842 = vmatpush1.bf16.msra.mxu0 %v7446_v26  ;;  %v7480_v53 = vld [vmem:[#allocation2 + $0x364] ss:$16 sps:$4 sm:$0xff]   ;;  %v7483_v55 = vld [vmem:[#allocation2 + $0x360] ss:$16 sps:$4 sm:$0xff]  }
  0x69   :  { %4883 = vmatpush1.bf16.msra.mxu1 %v7447_v27  ;;  %4843 = vmatprep.subr.bf16.mxu0 %v7448_v28  ;;  %v7484_v56 = vld [vmem:[#allocation2 + $0x144] ss:$16 sps:$4 sm:$0xff]   ;;  %v7488_v58 = vld [vmem:[#allocation2 + $0x140] ss:$16 sps:$4 sm:$0xff]  }
  0x6a   :  { %4884 = vmatprep.subr.bf16.mxu1 %v7450_v29  ;;  %4861 = vmatprep.mubr.bf16.mxu0 %v8896_v47  ;;  %v7486_v57 = vld [vmem:[#allocation2 + $0x344] ss:$16 sps:$4 sm:$0xff]   ;;  %v7489_v59 = vld [vmem:[#allocation2 + $0x340] ss:$16 sps:$4 sm:$0xff]  }
  0x6b   :  { %v7490_v60 = vld [vmem:[#allocation2 + $0x124] ss:$16 sps:$4 sm:$0xff]   ;;  %v7494_v62 = vld [vmem:[#allocation2 + $0x120] ss:$16 sps:$4 sm:$0xff]  }
  0x6c   :  { %4844 = vmatpush1.bf16.msra.mxu0 %v7452_v30  ;;  %v7492_v61 = vld [vmem:[#allocation2 + $0x324] ss:$16 sps:$4 sm:$0xff]   ;;  %v7495_v63 = vld [vmem:[#allocation2 + $0x320] ss:$16 sps:$4 sm:$0xff]  }
  0x6d   :  { %4885 = vmatpush1.bf16.msra.mxu1 %v7453_v31  ;;  %4845 = vmatprep.subr.bf16.mxu0 %v7454_v32  ;;  %v7496_v0 = vld [vmem:[#allocation2 + $0x104] ss:$16 sps:$4 sm:$0xff]   ;;  %v7500_v2 = vld [vmem:[#allocation2 + $0x100] ss:$16 sps:$4 sm:$0xff]  }
  0x6e   :  { %4886 = vmatprep.subr.bf16.mxu1 %v7456_v33  ;;  %v7498_v1 = vld [vmem:[#allocation2 + $0x304] ss:$16 sps:$4 sm:$0xff]   ;;  %v7501_v3 = vld [vmem:[#allocation2 + $0x300] ss:$16 sps:$4 sm:$0xff]   ;;  %v8919_v33 = vld [vmem:[%s9160_s0 + $0x18] sm:$0xff] }
  0x6f   :  { %v7508_v4 = vld [vmem:[#allocation2 + $0x4e4] ss:$16 sps:$4 sm:$0xff]   ;;  %v7506_v8 = vld [vmem:[#allocation2 + $0x4e0] ss:$16 sps:$4 sm:$0xff]  }
  0x70   :  { %4846 = vmatpush2.bf16.msra.mxu0 %v7458_v34  ;;  %v7511_v5 = vld [vmem:[#allocation2 + $0x6e4] ss:$16 sps:$4 sm:$0xff]   ;;  %v7509_v9 = vld [vmem:[#allocation2 + $0x6e0] ss:$16 sps:$4 sm:$0xff]  }
  0x71   :  { %4887 = vmatpush2.bf16.msra.mxu1 %v7459_v35  ;;  %4847 = vmatprep.subr.bf16.mxu0 %v7460_v36  ;;  %v7514_v10 = vld [vmem:[#allocation2 + $0x4c4] ss:$16 sps:$4 sm:$0xff]   ;;  %v7512_v12 = vld [vmem:[#allocation2 + $0x4c0] ss:$16 sps:$4 sm:$0xff]  }
  0x72   :  { %4888 = vmatprep.subr.bf16.mxu1 %v7462_v37  ;;  %v7517_v11 = vld [vmem:[#allocation2 + $0x6c4] ss:$16 sps:$4 sm:$0xff]   ;;  %v7515_v13 = vld [vmem:[#allocation2 + $0x6c0] ss:$16 sps:$4 sm:$0xff]   ;;  %v8927_v37 = vcombine.high %v8919_v33, %v8919_v33 }
  0x73   :  { %v7520_v14 = vld [vmem:[#allocation2 + $0x4a4] ss:$16 sps:$4 sm:$0xff]   ;;  %v7518_v16 = vld [vmem:[#allocation2 + $0x4a0] ss:$16 sps:$4 sm:$0xff]  }
  0x74   :  { %4848 = vmatpush2.bf16.msra.mxu0 %v7464_v38  ;;  %v7523_v15 = vld [vmem:[#allocation2 + $0x6a4] ss:$16 sps:$4 sm:$0xff]   ;;  %v7521_v17 = vld [vmem:[#allocation2 + $0x6a0] ss:$16 sps:$4 sm:$0xff]  }
  0x75   :  { %4889 = vmatpush2.bf16.msra.mxu1 %v7465_v39  ;;  %4849 = vmatprep.subr.bf16.mxu0 %v7466_v40  ;;  %v7526_v18 = vld [vmem:[#allocation2 + $0x484] ss:$16 sps:$4 sm:$0xff]   ;;  %v7524_v20 = vld [vmem:[#allocation2 + $0x480] ss:$16 sps:$4 sm:$0xff]  }
  0x76   :  { %4890 = vmatprep.subr.bf16.mxu1 %v7468_v41  ;;  %v7529_v19 = vld [vmem:[#allocation2 + $0x684] ss:$16 sps:$4 sm:$0xff]   ;;  %v7527_v21 = vld [vmem:[#allocation2 + $0x680] ss:$16 sps:$4 sm:$0xff]  }
  0x77   :  { %v7532_v22 = vld [vmem:[#allocation2 + $0x464] ss:$16 sps:$4 sm:$0xff]   ;;  %v7530_v24 = vld [vmem:[#allocation2 + $0x460] ss:$16 sps:$4 sm:$0xff]  }
  0x78   :  { %4850 = vmatpush2.bf16.msra.mxu0 %v7470_v42  ;;  %v7535_v23 = vld [vmem:[#allocation2 + $0x664] ss:$16 sps:$4 sm:$0xff]   ;;  %v7533_v25 = vld [vmem:[#allocation2 + $0x660] ss:$16 sps:$4 sm:$0xff]  }
  0x79   :  { %4891 = vmatpush2.bf16.msra.mxu1 %v7471_v43  ;;  %4851 = vmatprep.subr.bf16.mxu0 %v7472_v44  ;;  %v7538_v26 = vld [vmem:[#allocation2 + $0x444] ss:$16 sps:$4 sm:$0xff]   ;;  %v7536_v28 = vld [vmem:[#allocation2 + $0x440] ss:$16 sps:$4 sm:$0xff]  }
  0x7a   :  { %4892 = vmatprep.subr.bf16.mxu1 %v7474_v45  ;;  %v7541_v27 = vld [vmem:[#allocation2 + $0x644] ss:$16 sps:$4 sm:$0xff]   ;;  %v7539_v29 = vld [vmem:[#allocation2 + $0x640] ss:$16 sps:$4 sm:$0xff]  }
  0x7b   :  { %v7544_v30 = vld [vmem:[#allocation2 + $0x424] ss:$16 sps:$4 sm:$0xff]   ;;  %v7542_v34 = vld [vmem:[#allocation2 + $0x420] ss:$16 sps:$4 sm:$0xff]  }
  0x7c   :  { %4852 = vmatpush2.bf16.msra.mxu0 %v7476_v49  ;;  %v7547_v31 = vld [vmem:[#allocation2 + $0x624] ss:$16 sps:$4 sm:$0xff]   ;;  %v7545_v35 = vld [vmem:[#allocation2 + $0x620] ss:$16 sps:$4 sm:$0xff]  }
  0x7d   :  { %4893 = vmatpush2.bf16.msra.mxu1 %v7477_v50  ;;  %4853 = vmatprep.subr.bf16.mxu0 %v7478_v52  ;;  %v8914_v32 = vld [vmem:[%s9160_s0 + $0x10] sm:$0xff] }
  0x7e   :  { %4894 = vmatprep.subr.bf16.mxu1 %v7480_v53  ;;  %v8923_v36 = vcombine.high %v8914_v32, %v8914_v32  ;;  %v7550_v38 = vld [vmem:[#allocation2 + $0x404] ss:$16 sps:$4 sm:$0xff]   ;;  %v7548_v40 = vld [vmem:[#allocation2 + $0x400] ss:$16 sps:$4 sm:$0xff]  }
  0x7f   :  { %v7553_v39 = vld [vmem:[#allocation2 + $0x604] ss:$16 sps:$4 sm:$0xff]   ;;  %v7551_v41 = vld [vmem:[#allocation2 + $0x600] ss:$16 sps:$4 sm:$0xff]  }
  0x80   :  { %4854 = vmatpush2.bf16.msra.mxu0 %v7482_v54  ;;  %v7556_v42 = vld [vmem:[#allocation2 + $0x5e4] ss:$16 sps:$4 sm:$0xff]   ;;  %v7554_v44 = vld [vmem:[#allocation2 + $0x5e0] ss:$16 sps:$4 sm:$0xff]  }
  0x81   :  { %4895 = vmatpush2.bf16.msra.mxu1 %v7483_v55  ;;  %4855 = vmatprep.subr.bf16.mxu0 %v7484_v56  ;;  %v7559_v43 = vld [vmem:[#allocation2 + $0x7e4] ss:$16 sps:$4 sm:$0xff]   ;;  %v7557_v45 = vld [vmem:[#allocation2 + $0x7e0] ss:$16 sps:$4 sm:$0xff]  }
  0x82   :  { %4896 = vmatprep.subr.bf16.mxu1 %v7486_v57  ;;  %v7562_v46 = vld [vmem:[#allocation2 + $0x5c4] ss:$16 sps:$4 sm:$0xff]   ;;  %v7560_v49 = vld [vmem:[#allocation2 + $0x5c0] ss:$16 sps:$4 sm:$0xff]  }
  0x83   :  { %v7565_v48 = vld [vmem:[#allocation2 + $0x7c4] ss:$16 sps:$4 sm:$0xff]   ;;  %v7563_v50 = vld [vmem:[#allocation2 + $0x7c0] ss:$16 sps:$4 sm:$0xff]  }
  0x84   :  { %4856 = vmatpush2.bf16.msra.mxu0 %v7488_v58  ;;  %v7568_v52 = vld [vmem:[#allocation2 + $0x5a4] ss:$16 sps:$4 sm:$0xff]   ;;  %v7566_v54 = vld [vmem:[#allocation2 + $0x5a0] ss:$16 sps:$4 sm:$0xff]  }
  0x85   :  { %4897 = vmatpush2.bf16.msra.mxu1 %v7489_v59  ;;  %4857 = vmatprep.subr.bf16.mxu0 %v7490_v60  ;;  %v7571_v53 = vld [vmem:[#allocation2 + $0x7a4] ss:$16 sps:$4 sm:$0xff]   ;;  %v7569_v55 = vld [vmem:[#allocation2 + $0x7a0] ss:$16 sps:$4 sm:$0xff]  }
  0x86   :  { %4898 = vmatprep.subr.bf16.mxu1 %v7492_v61  ;;  %v7574_v56 = vld [vmem:[#allocation2 + $0x584] ss:$16 sps:$4 sm:$0xff]   ;;  %v7572_v58 = vld [vmem:[#allocation2 + $0x580] ss:$16 sps:$4 sm:$0xff]  }
  0x87   :  { %v7577_v57 = vld [vmem:[#allocation2 + $0x784] ss:$16 sps:$4 sm:$0xff]   ;;  %v7575_v59 = vld [vmem:[#allocation2 + $0x780] ss:$16 sps:$4 sm:$0xff]  }
  0x88   :  { %4858 = vmatpush2.bf16.msra.mxu0 %v7494_v62  ;;  %v7580_v60 = vld [vmem:[#allocation2 + $0x564] ss:$16 sps:$4 sm:$0xff]   ;;  %v7578_v62 = vld [vmem:[#allocation2 + $0x560] ss:$16 sps:$4 sm:$0xff]  }
  0x89   :  { %4899 = vmatpush2.bf16.msra.mxu1 %v7495_v63  ;;  %4859 = vmatprep.subr.bf16.mxu0 %v7496_v0  ;;  %v7583_v61 = vld [vmem:[#allocation2 + $0x764] ss:$16 sps:$4 sm:$0xff]   ;;  %v7581_v63 = vld [vmem:[#allocation2 + $0x760] ss:$16 sps:$4 sm:$0xff]  }
  0x8a   :  { %4900 = vmatprep.subr.bf16.mxu1 %v7498_v1  ;;  %v7586_v0 = vld [vmem:[#allocation2 + $0x544] ss:$16 sps:$4 sm:$0xff]  }
  0x8b   :  { %v7589_v1 = vld [vmem:[#allocation2 + $0x744] ss:$16 sps:$4 sm:$0xff]  }
  0x8c   :  { %4860 = vmatpush2.bf16.msra.mxu0 %v7500_v2  ;;  %v7584_v2 = vld [vmem:[#allocation2 + $0x540] ss:$16 sps:$4 sm:$0xff]  }
  0x8d   :  { %4901 = vmatpush2.bf16.msra.mxu1 %v7501_v3  ;;  %4911 = vmatprep.subr.bf16.mxu0 %v7508_v4  ;;  %v7587_v3 = vld [vmem:[#allocation2 + $0x740] ss:$16 sps:$4 sm:$0xff]   ;;  %v7592_v4 = vld [vmem:[#allocation2 + $0x524] ss:$16 sps:$4 sm:$0xff]  }
  0x8e   :  { %4952 = vmatprep.subr.bf16.mxu1 %v7511_v5  ;;  %v7595_v5 = vld [vmem:[#allocation2 + $0x724] ss:$16 sps:$4 sm:$0xff]  }
  0x8f   :  { %4862 = vmatmul.mubr.bf16.vlgmr.msra.gmra.mxu0 %v8905_v6 }
  0x90   :  { %4903 = vmatmul.mubr.bf16.vlgmr.msra.gmra.mxu1 %v8907_v7  ;;  %4912 = vmatpush1.bf16.msra.mxu0 %v7506_v8  ;;  %v7590_v8 = vld [vmem:[#allocation2 + $0x520] ss:$16 sps:$4 sm:$0xff]  }
  0x91   :  { %4953 = vmatpush1.bf16.msra.mxu1 %v7509_v9  ;;  %4913 = vmatprep.subr.bf16.mxu0 %v7514_v10  ;;  %v7593_v9 = vld [vmem:[#allocation2 + $0x720] ss:$16 sps:$4 sm:$0xff]   ;;  %v7598_v10 = vld [vmem:[#allocation2 + $0x504] ss:$16 sps:$4 sm:$0xff]  }
  0x92   :  { %4954 = vmatprep.subr.bf16.mxu1 %v7517_v11  ;;  %4943 = vmatprep.mubr.bf16.mxu0 %v8923_v36  ;;  %v7601_v11 = vld [vmem:[#allocation2 + $0x704] ss:$16 sps:$4 sm:$0xff]  }
  0x93   :  { %4984 = vmatprep.mubr.bf16.mxu1 %v8927_v37 }
  0x94   :  { %4914 = vmatpush1.bf16.msra.mxu0 %v7512_v12  ;;  %v7596_v12 = vld [vmem:[#allocation2 + $0x500] ss:$16 sps:$4 sm:$0xff]  }
  0x95   :  { %4955 = vmatpush1.bf16.msra.mxu1 %v7515_v13  ;;  %4915 = vmatprep.subr.bf16.mxu0 %v7520_v14  ;;  %v7599_v13 = vld [vmem:[#allocation2 + $0x700] ss:$16 sps:$4 sm:$0xff]   ;;  %v7608_v14 = vld [vmem:[#allocation2 + $0x8e4] ss:$16 sps:$4 sm:$0xff]  }
  0x96   :  { %4956 = vmatprep.subr.bf16.mxu1 %v7523_v15  ;;  %v7611_v15 = vld [vmem:[#allocation2 + $0xae4] ss:$16 sps:$4 sm:$0xff]  }
  0x98   :  { %4916 = vmatpush1.bf16.msra.mxu0 %v7518_v16  ;;  %v8933_v16 = vcombine.low %v8914_v32, %v8914_v32  ;;  %v7626_v32 = vld [vmem:[#allocation2 + $0x884] ss:$16 sps:$4 sm:$0xff]  }
  0x99   :  { %4957 = vmatpush1.bf16.msra.mxu1 %v7521_v17  ;;  %4917 = vmatprep.subr.bf16.mxu0 %v7526_v18  ;;  %v8937_v17 = vcombine.low %v8919_v33, %v8919_v33  ;;  %v7606_v18 = vld [vmem:[#allocation2 + $0x8e0] ss:$16 sps:$4 sm:$0xff]   ;;  %v7629_v33 = vld [vmem:[#allocation2 + $0xa84] ss:$16 sps:$4 sm:$0xff]  }
  0x9a   :  { %4958 = vmatprep.subr.bf16.mxu1 %v7529_v19  ;;  %v7609_v19 = vld [vmem:[#allocation2 + $0xae0] ss:$16 sps:$4 sm:$0xff]  }
  0x9c   :  { %4918 = vmatpush1.bf16.msra.mxu0 %v7524_v20  ;;  %v7614_v20 = vld [vmem:[#allocation2 + $0x8c4] ss:$16 sps:$4 sm:$0xff]  }
  0x9d   :  { %4959 = vmatpush1.bf16.msra.mxu1 %v7527_v21  ;;  %4919 = vmatprep.subr.bf16.mxu0 %v7532_v22  ;;  %v7617_v21 = vld [vmem:[#allocation2 + $0xac4] ss:$16 sps:$4 sm:$0xff]  }
  0x9e   :  { %4960 = vmatprep.subr.bf16.mxu1 %v7535_v23  ;;  %v8942_v22 = vld [vmem:[%s9160_s0 + $0x20] sm:$0xff]  ;;  %v8947_v23 = vld [vmem:[%s9160_s0 + $0x28] sm:$0xff] }
  0xa0   :  { %4920 = vmatpush1.bf16.msra.mxu0 %v7530_v24  ;;  %v8951_v24 = vcombine.high %v8942_v22, %v8942_v22 }
  0xa1   :  { %4961 = vmatpush1.bf16.msra.mxu1 %v7533_v25  ;;  %4921 = vmatprep.subr.bf16.mxu0 %v7538_v26  ;;  %v8955_v25 = vcombine.high %v8947_v23, %v8947_v23  ;;  %v7612_v26 = vld [vmem:[#allocation2 + $0x8c0] ss:$16 sps:$4 sm:$0xff]  }
  0xa2   :  { %4962 = vmatprep.subr.bf16.mxu1 %v7541_v27  ;;  %v7615_v27 = vld [vmem:[#allocation2 + $0xac0] ss:$16 sps:$4 sm:$0xff]  }
  0xa4   :  { %4922 = vmatpush1.bf16.msra.mxu0 %v7536_v28  ;;  %v7620_v28 = vld [vmem:[#allocation2 + $0x8a4] ss:$16 sps:$4 sm:$0xff]  }
  0xa5   :  { %4963 = vmatpush1.bf16.msra.mxu1 %v7539_v29  ;;  %4923 = vmatprep.subr.bf16.mxu0 %v7544_v30  ;;  %v7623_v29 = vld [vmem:[#allocation2 + $0xaa4] ss:$16 sps:$4 sm:$0xff]   ;;  %v7618_v30 = vld [vmem:[#allocation2 + $0x8a0] ss:$16 sps:$4 sm:$0xff]  }
  0xa6   :  { %4964 = vmatprep.subr.bf16.mxu1 %v7547_v31  ;;  %v7621_v31 = vld [vmem:[#allocation2 + $0xaa0] ss:$16 sps:$4 sm:$0xff]  }
  0xa8   :  { %4924 = vmatpush1.bf16.msra.mxu0 %v7542_v34  ;;  %v7624_v34 = vld [vmem:[#allocation2 + $0x880] ss:$16 sps:$4 sm:$0xff]  }
  0xa9   :  { %4965 = vmatpush1.bf16.msra.mxu1 %v7545_v35  ;;  %4925 = vmatprep.subr.bf16.mxu0 %v7550_v38  ;;  %v7627_v35 = vld [vmem:[#allocation2 + $0xa80] ss:$16 sps:$4 sm:$0xff]   ;;  %v7632_v38 = vld [vmem:[#allocation2 + $0x864] ss:$16 sps:$4 sm:$0xff]  }
  0xaa   :  { %4966 = vmatprep.subr.bf16.mxu1 %v7553_v39  ;;  %v7635_v39 = vld [vmem:[#allocation2 + $0xa64] ss:$16 sps:$4 sm:$0xff]  }
  0xac   :  { %4926 = vmatpush1.bf16.msra.mxu0 %v7548_v40  ;;  %v7630_v40 = vld [vmem:[#allocation2 + $0x860] ss:$16 sps:$4 sm:$0xff]  }
  0xad   :  { %4967 = vmatpush1.bf16.msra.mxu1 %v7551_v41  ;;  %4927 = vmatprep.subr.bf16.mxu0 %v7556_v42  ;;  %v7633_v41 = vld [vmem:[#allocation2 + $0xa60] ss:$16 sps:$4 sm:$0xff]   ;;  %v7638_v42 = vld [vmem:[#allocation2 + $0x844] ss:$16 sps:$4 sm:$0xff]  }
  0xae   :  { %4968 = vmatprep.subr.bf16.mxu1 %v7559_v43  ;;  %v7641_v43 = vld [vmem:[#allocation2 + $0xa44] ss:$16 sps:$4 sm:$0xff]  }
  0xb0   :  { %4928 = vmatpush2.bf16.msra.mxu0 %v7554_v44  ;;  %v7636_v44 = vld [vmem:[#allocation2 + $0x840] ss:$16 sps:$4 sm:$0xff]  }
  0xb1   :  { %4969 = vmatpush2.bf16.msra.mxu1 %v7557_v45  ;;  %4929 = vmatprep.subr.bf16.mxu0 %v7562_v46  ;;  %v7639_v45 = vld [vmem:[#allocation2 + $0xa40] ss:$16 sps:$4 sm:$0xff]   ;;  %v7644_v46 = vld [vmem:[#allocation2 + $0x824] ss:$16 sps:$4 sm:$0xff]  }
  0xb2   :  { %4970 = vmatprep.subr.bf16.mxu1 %v7565_v48  ;;  %v7647_v48 = vld [vmem:[#allocation2 + $0xa24] ss:$16 sps:$4 sm:$0xff]  }
  0xb4   :  { %4930 = vmatpush2.bf16.msra.mxu0 %v7560_v49  ;;  %v7642_v49 = vld [vmem:[#allocation2 + $0x820] ss:$16 sps:$4 sm:$0xff]  }
  0xb5   :  { %4971 = vmatpush2.bf16.msra.mxu1 %v7563_v50  ;;  %4931 = vmatprep.subr.bf16.mxu0 %v7568_v52  ;;  %v7645_v50 = vld [vmem:[#allocation2 + $0xa20] ss:$16 sps:$4 sm:$0xff]   ;;  %v7650_v52 = vld [vmem:[#allocation2 + $0x804] ss:$16 sps:$4 sm:$0xff]  }
  0xb6   :  { %4972 = vmatprep.subr.bf16.mxu1 %v7571_v53  ;;  %v7653_v53 = vld [vmem:[#allocation2 + $0xa04] ss:$16 sps:$4 sm:$0xff]  }
  0xb8   :  { %4932 = vmatpush2.bf16.msra.mxu0 %v7566_v54  ;;  %v7648_v54 = vld [vmem:[#allocation2 + $0x800] ss:$16 sps:$4 sm:$0xff]  }
  0xb9   :  { %4973 = vmatpush2.bf16.msra.mxu1 %v7569_v55  ;;  %4933 = vmatprep.subr.bf16.mxu0 %v7574_v56  ;;  %v7651_v55 = vld [vmem:[#allocation2 + $0xa00] ss:$16 sps:$4 sm:$0xff]   ;;  %v7656_v56 = vld [vmem:[#allocation2 + $0x9e4] ss:$16 sps:$4 sm:$0xff]  }
  0xba   :  { %4974 = vmatprep.subr.bf16.mxu1 %v7577_v57  ;;  %v7659_v57 = vld [vmem:[#allocation2 + $0xbe4] ss:$16 sps:$4 sm:$0xff]  }
  0xbc   :  { %4934 = vmatpush2.bf16.msra.mxu0 %v7572_v58  ;;  %v7654_v58 = vld [vmem:[#allocation2 + $0x9e0] ss:$16 sps:$4 sm:$0xff]  }
  0xbd   :  { %4975 = vmatpush2.bf16.msra.mxu1 %v7575_v59  ;;  %4935 = vmatprep.subr.bf16.mxu0 %v7580_v60  ;;  %v7657_v59 = vld [vmem:[#allocation2 + $0xbe0] ss:$16 sps:$4 sm:$0xff]   ;;  %v7662_v60 = vld [vmem:[#allocation2 + $0x9c4] ss:$16 sps:$4 sm:$0xff]  }
  0xbe   :  { %4976 = vmatprep.subr.bf16.mxu1 %v7583_v61  ;;  %v7665_v61 = vld [vmem:[#allocation2 + $0xbc4] ss:$16 sps:$4 sm:$0xff]  }
  0xc0   :  { %4936 = vmatpush2.bf16.msra.mxu0 %v7578_v62  ;;  %v7660_v62 = vld [vmem:[#allocation2 + $0x9c0] ss:$16 sps:$4 sm:$0xff]  }
  0xc1   :  { %4977 = vmatpush2.bf16.msra.mxu1 %v7581_v63  ;;  %4937 = vmatprep.subr.bf16.mxu0 %v7586_v0  ;;  %v7663_v63 = vld [vmem:[#allocation2 + $0xbc0] ss:$16 sps:$4 sm:$0xff]   ;;  %v7668_v0 = vld [vmem:[#allocation2 + $0x9a4] ss:$16 sps:$4 sm:$0xff]  }
  0xc2   :  { %4978 = vmatprep.subr.bf16.mxu1 %v7589_v1  ;;  %v7671_v1 = vld [vmem:[#allocation2 + $0xba4] ss:$16 sps:$4 sm:$0xff]  }
  0xc4   :  { %4938 = vmatpush2.bf16.msra.mxu0 %v7584_v2  ;;  %v7666_v2 = vld [vmem:[#allocation2 + $0x9a0] ss:$16 sps:$4 sm:$0xff]  }
  0xc5   :  { %4979 = vmatpush2.bf16.msra.mxu1 %v7587_v3  ;;  %4939 = vmatprep.subr.bf16.mxu0 %v7592_v4  ;;  %v7669_v3 = vld [vmem:[#allocation2 + $0xba0] ss:$16 sps:$4 sm:$0xff]   ;;  %v7674_v4 = vld [vmem:[#allocation2 + $0x984] ss:$16 sps:$4 sm:$0xff]  }
  0xc6   :  { %4980 = vmatprep.subr.bf16.mxu1 %v7595_v5  ;;  %v7677_v5 = vld [vmem:[#allocation2 + $0xb84] ss:$16 sps:$4 sm:$0xff]  }
  0xc8   :  { %4940 = vmatpush2.bf16.msra.mxu0 %v7590_v8  ;;  %v7672_v8 = vld [vmem:[#allocation2 + $0x980] ss:$16 sps:$4 sm:$0xff]  }
  0xc9   :  { %4981 = vmatpush2.bf16.msra.mxu1 %v7593_v9  ;;  %4941 = vmatprep.subr.bf16.mxu0 %v7598_v10  ;;  %v7675_v9 = vld [vmem:[#allocation2 + $0xb80] ss:$16 sps:$4 sm:$0xff]   ;;  %v7680_v10 = vld [vmem:[#allocation2 + $0x964] ss:$16 sps:$4 sm:$0xff]  }
  0xca   :  { %4982 = vmatprep.subr.bf16.mxu1 %v7601_v11  ;;  %v7683_v11 = vld [vmem:[#allocation2 + $0xb64] ss:$16 sps:$4 sm:$0xff]  }
  0xcc   :  { %4942 = vmatpush2.bf16.msra.mxu0 %v7596_v12  ;;  %v7678_v12 = vld [vmem:[#allocation2 + $0x960] ss:$16 sps:$4 sm:$0xff]  }
  0xcd   :  { %4983 = vmatpush2.bf16.msra.mxu1 %v7599_v13  ;;  %4993 = vmatprep.subr.bf16.mxu0 %v7608_v14  ;;  %v7681_v13 = vld [vmem:[#allocation2 + $0xb60] ss:$16 sps:$4 sm:$0xff]   ;;  %v7686_v14 = vld [vmem:[#allocation2 + $0x944] ss:$16 sps:$4 sm:$0xff]  }
  0xce   :  { %5034 = vmatprep.subr.bf16.mxu1 %v7611_v15  ;;  %v7689_v15 = vld [vmem:[#allocation2 + $0xb44] ss:$16 sps:$4 sm:$0xff]  }
  0xcf   :  { %4944 = vmatmul.mubr.bf16.vlgmr.msra.gmra.mxu0 %v8933_v16 }
  0xd0   :  { %4985 = vmatmul.mubr.bf16.vlgmr.msra.gmra.mxu1 %v8937_v17  ;;  %4994 = vmatpush1.bf16.msra.mxu0 %v7606_v18  ;;  %v7684_v18 = vld [vmem:[#allocation2 + $0x940] ss:$16 sps:$4 sm:$0xff]  }
  0xd1   :  { %5035 = vmatpush1.bf16.msra.mxu1 %v7609_v19  ;;  %4995 = vmatprep.subr.bf16.mxu0 %v7614_v20  ;;  %v7687_v19 = vld [vmem:[#allocation2 + $0xb40] ss:$16 sps:$4 sm:$0xff]   ;;  %v7692_v20 = vld [vmem:[#allocation2 + $0x924] ss:$16 sps:$4 sm:$0xff]  }
  0xd2   :  { %5036 = vmatprep.subr.bf16.mxu1 %v7617_v21  ;;  %5025 = vmatprep.mubr.bf16.mxu0 %v8951_v24  ;;  %v7695_v21 = vld [vmem:[#allocation2 + $0xb24] ss:$16 sps:$4 sm:$0xff]  }
  0xd3   :  { %5066 = vmatprep.mubr.bf16.mxu1 %v8955_v25 }
  0xd4   :  { %4996 = vmatpush1.bf16.msra.mxu0 %v7612_v26  ;;  %v7690_v26 = vld [vmem:[#allocation2 + $0x920] ss:$16 sps:$4 sm:$0xff]  }
  0xd5   :  { %5037 = vmatpush1.bf16.msra.mxu1 %v7615_v27  ;;  %4997 = vmatprep.subr.bf16.mxu0 %v7620_v28  ;;  %v7693_v27 = vld [vmem:[#allocation2 + $0xb20] ss:$16 sps:$4 sm:$0xff]   ;;  %v7698_v28 = vld [vmem:[#allocation2 + $0x904] ss:$16 sps:$4 sm:$0xff]  }
  0xd6   :  { %5038 = vmatprep.subr.bf16.mxu1 %v7623_v29  ;;  %v7701_v29 = vld [vmem:[#allocation2 + $0xb04] ss:$16 sps:$4 sm:$0xff]  }
  0xd8   :  { %4998 = vmatpush1.bf16.msra.mxu0 %v7618_v30  ;;  %v7696_v30 = vld [vmem:[#allocation2 + $0x900] ss:$16 sps:$4 sm:$0xff]  }
  0xd9   :  { %5039 = vmatpush1.bf16.msra.mxu1 %v7621_v31  ;;  %4999 = vmatprep.subr.bf16.mxu0 %v7626_v32  ;;  %v7699_v31 = vld [vmem:[#allocation2 + $0xb00] ss:$16 sps:$4 sm:$0xff]   ;;  %v7708_v32 = vld [vmem:[#allocation2 + $0xce4] ss:$16 sps:$4 sm:$0xff]  }
  0xda   :  { %5040 = vmatprep.subr.bf16.mxu1 %v7629_v33  ;;  %v7711_v33 = vld [vmem:[#allocation2 + $0xee4] ss:$16 sps:$4 sm:$0xff]  }
  0xdc   :  { %5000 = vmatpush1.bf16.msra.mxu0 %v7624_v34  ;;  %v7706_v34 = vld [vmem:[#allocation2 + $0xce0] ss:$16 sps:$4 sm:$0xff]  }
  0xdd   :  { %5041 = vmatpush1.bf16.msra.mxu1 %v7627_v35  ;;  %5001 = vmatprep.subr.bf16.mxu0 %v7632_v38  ;;  %v8964_v35 = vld [vmem:[%s9160_s0 + $0x30] sm:$0xff]  ;;  %v8968_v38 = vcombine.low %v8942_v22, %v8942_v22 }
  0xde   :  { %5042 = vmatprep.subr.bf16.mxu1 %v7635_v39  ;;  %v8972_v39 = vcombine.low %v8947_v23, %v8947_v23  ;;  %v8981_v22 = vcombine.high %v8964_v35, %v8964_v35 }
  0xe0   :  { %5002 = vmatpush1.bf16.msra.mxu0 %v7630_v40  ;;  %v8977_v40 = vld [vmem:[%s9160_s0 + $0x38] sm:$0xff] }
  0xe1   :  { %5043 = vmatpush1.bf16.msra.mxu1 %v7633_v41  ;;  %5003 = vmatprep.subr.bf16.mxu0 %v7638_v42  ;;  %v7709_v41 = vld [vmem:[#allocation2 + $0xee0] ss:$16 sps:$4 sm:$0xff]   ;;  %v7714_v42 = vld [vmem:[#allocation2 + $0xcc4] ss:$16 sps:$4 sm:$0xff]   ;;  %v8985_v23 = vcombine.high %v8977_v40, %v8977_v40 }
  0xe2   :  { %5044 = vmatprep.subr.bf16.mxu1 %v7641_v43  ;;  %v7717_v43 = vld [vmem:[#allocation2 + $0xec4] ss:$16 sps:$4 sm:$0xff]  }
  0xe4   :  { %5004 = vmatpush1.bf16.msra.mxu0 %v7636_v44  ;;  %v7712_v44 = vld [vmem:[#allocation2 + $0xcc0] ss:$16 sps:$4 sm:$0xff]  }
  0xe5   :  { %5045 = vmatpush1.bf16.msra.mxu1 %v7639_v45  ;;  %5005 = vmatprep.subr.bf16.mxu0 %v7644_v46  ;;  %v7715_v45 = vld [vmem:[#allocation2 + $0xec0] ss:$16 sps:$4 sm:$0xff]   ;;  %v7720_v46 = vld [vmem:[#allocation2 + $0xca4] ss:$16 sps:$4 sm:$0xff]  }
  0xe6   :  { %5046 = vmatprep.subr.bf16.mxu1 %v7647_v48  ;;  %v7723_v48 = vld [vmem:[#allocation2 + $0xea4] ss:$16 sps:$4 sm:$0xff]  }
  0xe8   :  { %5006 = vmatpush1.bf16.msra.mxu0 %v7642_v49  ;;  %v7718_v49 = vld [vmem:[#allocation2 + $0xca0] ss:$16 sps:$4 sm:$0xff]  }
  0xe9   :  { %5047 = vmatpush1.bf16.msra.mxu1 %v7645_v50  ;;  %5007 = vmatprep.subr.bf16.mxu0 %v7650_v52  ;;  %v7721_v50 = vld [vmem:[#allocation2 + $0xea0] ss:$16 sps:$4 sm:$0xff]   ;;  %v7726_v52 = vld [vmem:[#allocation2 + $0xc84] ss:$16 sps:$4 sm:$0xff]  }
  0xea   :  { %5048 = vmatprep.subr.bf16.mxu1 %v7653_v53  ;;  %v7729_v53 = vld [vmem:[#allocation2 + $0xe84] ss:$16 sps:$4 sm:$0xff]  }
  0xec   :  { %5008 = vmatpush1.bf16.msra.mxu0 %v7648_v54  ;;  %v7724_v54 = vld [vmem:[#allocation2 + $0xc80] ss:$16 sps:$4 sm:$0xff]  }
  0xed   :  { %5049 = vmatpush1.bf16.msra.mxu1 %v7651_v55  ;;  %5009 = vmatprep.subr.bf16.mxu0 %v7656_v56  ;;  %v7727_v55 = vld [vmem:[#allocation2 + $0xe80] ss:$16 sps:$4 sm:$0xff]   ;;  %v7732_v56 = vld [vmem:[#allocation2 + $0xc64] ss:$16 sps:$4 sm:$0xff]  }
  0xee   :  { %5050 = vmatprep.subr.bf16.mxu1 %v7659_v57  ;;  %v7735_v57 = vld [vmem:[#allocation2 + $0xe64] ss:$16 sps:$4 sm:$0xff]  }
  0xf0   :  { %5010 = vmatpush2.bf16.msra.mxu0 %v7654_v58  ;;  %v7730_v58 = vld [vmem:[#allocation2 + $0xc60] ss:$16 sps:$4 sm:$0xff]  }
  0xf1   :  { %5051 = vmatpush2.bf16.msra.mxu1 %v7657_v59  ;;  %5011 = vmatprep.subr.bf16.mxu0 %v7662_v60  ;;  %v7733_v59 = vld [vmem:[#allocation2 + $0xe60] ss:$16 sps:$4 sm:$0xff]   ;;  %v7738_v60 = vld [vmem:[#allocation2 + $0xc44] ss:$16 sps:$4 sm:$0xff]  }
  0xf2   :  { %5052 = vmatprep.subr.bf16.mxu1 %v7665_v61  ;;  %v7741_v61 = vld [vmem:[#allocation2 + $0xe44] ss:$16 sps:$4 sm:$0xff]  }
  0xf4   :  { %5012 = vmatpush2.bf16.msra.mxu0 %v7660_v62  ;;  %v7736_v62 = vld [vmem:[#allocation2 + $0xc40] ss:$16 sps:$4 sm:$0xff]  }
  0xf5   :  { %5053 = vmatpush2.bf16.msra.mxu1 %v7663_v63  ;;  %5013 = vmatprep.subr.bf16.mxu0 %v7668_v0  ;;  %v7739_v63 = vld [vmem:[#allocation2 + $0xe40] ss:$16 sps:$4 sm:$0xff]   ;;  %v7744_v0 = vld [vmem:[#allocation2 + $0xc24] ss:$16 sps:$4 sm:$0xff]  }
  0xf6   :  { %5054 = vmatprep.subr.bf16.mxu1 %v7671_v1  ;;  %v7747_v1 = vld [vmem:[#allocation2 + $0xe24] ss:$16 sps:$4 sm:$0xff]  }
  0xf8   :  { %5014 = vmatpush2.bf16.msra.mxu0 %v7666_v2  ;;  %v7742_v2 = vld [vmem:[#allocation2 + $0xc20] ss:$16 sps:$4 sm:$0xff]  }
  0xf9   :  { %5055 = vmatpush2.bf16.msra.mxu1 %v7669_v3  ;;  %5015 = vmatprep.subr.bf16.mxu0 %v7674_v4  ;;  %v7745_v3 = vld [vmem:[#allocation2 + $0xe20] ss:$16 sps:$4 sm:$0xff]   ;;  %v7750_v4 = vld [vmem:[#allocation2 + $0xc04] ss:$16 sps:$4 sm:$0xff]  }
  0xfa   :  { %5056 = vmatprep.subr.bf16.mxu1 %v7677_v5  ;;  %v7753_v5 = vld [vmem:[#allocation2 + $0xe04] ss:$16 sps:$4 sm:$0xff]  }
  0xfc   :  { %5016 = vmatpush2.bf16.msra.mxu0 %v7672_v8  ;;  %v7748_v8 = vld [vmem:[#allocation2 + $0xc00] ss:$16 sps:$4 sm:$0xff]  }
  0xfd   :  { %5057 = vmatpush2.bf16.msra.mxu1 %v7675_v9  ;;  %5017 = vmatprep.subr.bf16.mxu0 %v7680_v10  ;;  %v7751_v9 = vld [vmem:[#allocation2 + $0xe00] ss:$16 sps:$4 sm:$0xff]   ;;  %v7756_v10 = vld [vmem:[#allocation2 + $0xde4] ss:$16 sps:$4 sm:$0xff]  }
  0xfe   :  { %5058 = vmatprep.subr.bf16.mxu1 %v7683_v11  ;;  %v7759_v11 = vld [vmem:[#allocation2 + $0xfe4] ss:$16 sps:$4 sm:$0xff]  }
 0x100   :  { %5018 = vmatpush2.bf16.msra.mxu0 %v7678_v12  ;;  %v7754_v12 = vld [vmem:[#allocation2 + $0xde0] ss:$16 sps:$4 sm:$0xff]  }
 0x101   :  { %5059 = vmatpush2.bf16.msra.mxu1 %v7681_v13  ;;  %5019 = vmatprep.subr.bf16.mxu0 %v7686_v14  ;;  %v7757_v13 = vld [vmem:[#allocation2 + $0xfe0] ss:$16 sps:$4 sm:$0xff]   ;;  %v7762_v14 = vld [vmem:[#allocation2 + $0xdc4] ss:$16 sps:$4 sm:$0xff]  }
 0x102   :  { %5060 = vmatprep.subr.bf16.mxu1 %v7689_v15  ;;  %v7765_v15 = vld [vmem:[#allocation2 + $0xfc4] ss:$16 sps:$4 sm:$0xff]  }
 0x104   :  { %5020 = vmatpush2.bf16.msra.mxu0 %v7684_v18  ;;  %v7760_v18 = vld [vmem:[#allocation2 + $0xdc0] ss:$16 sps:$4 sm:$0xff]  }
 0x105   :  { %5061 = vmatpush2.bf16.msra.mxu1 %v7687_v19  ;;  %5021 = vmatprep.subr.bf16.mxu0 %v7692_v20  ;;  %v7763_v19 = vld [vmem:[#allocation2 + $0xfc0] ss:$16 sps:$4 sm:$0xff]   ;;  %v7768_v20 = vld [vmem:[#allocation2 + $0xda4] ss:$16 sps:$4 sm:$0xff]  }
 0x106   :  { %5062 = vmatprep.subr.bf16.mxu1 %v7695_v21  ;;  %v7771_v21 = vld [vmem:[#allocation2 + $0xfa4] ss:$16 sps:$4 sm:$0xff]  }
 0x108   :  { %5022 = vmatpush2.bf16.msra.mxu0 %v7690_v26  ;;  %v7766_v26 = vld [vmem:[#allocation2 + $0xda0] ss:$16 sps:$4 sm:$0xff]  }
 0x109   :  { %5063 = vmatpush2.bf16.msra.mxu1 %v7693_v27  ;;  %5023 = vmatprep.subr.bf16.mxu0 %v7698_v28  ;;  %v7769_v27 = vld [vmem:[#allocation2 + $0xfa0] ss:$16 sps:$4 sm:$0xff]   ;;  %v7774_v28 = vld [vmem:[#allocation2 + $0xd84] ss:$16 sps:$4 sm:$0xff]  }
 0x10a   :  { %5064 = vmatprep.subr.bf16.mxu1 %v7701_v29  ;;  %v7777_v29 = vld [vmem:[#allocation2 + $0xf84] ss:$16 sps:$4 sm:$0xff]  }
 0x10c   :  { %5024 = vmatpush2.bf16.msra.mxu0 %v7696_v30  ;;  %v7772_v30 = vld [vmem:[#allocation2 + $0xd80] ss:$16 sps:$4 sm:$0xff]  }
 0x10d   :  { %5065 = vmatpush2.bf16.msra.mxu1 %v7699_v31  ;;  %5075 = vmatprep.subr.bf16.mxu0 %v7708_v32  ;;  %v7775_v31 = vld [vmem:[#allocation2 + $0xf80] ss:$16 sps:$4 sm:$0xff]   ;;  %v7780_v32 = vld [vmem:[#allocation2 + $0xd64] ss:$16 sps:$4 sm:$0xff]  }
 0x10e   :  { %5116 = vmatprep.subr.bf16.mxu1 %v7711_v33  ;;  %v7783_v33 = vld [vmem:[#allocation2 + $0xf64] ss:$16 sps:$4 sm:$0xff]  }
 0x10f   :  { %5026 = vmatmul.mubr.bf16.vlgmr.msra.gmra.mxu0 %v8968_v38 }
 0x110   :  { %5067 = vmatmul.mubr.bf16.vlgmr.msra.gmra.mxu1 %v8972_v39  ;;  %5076 = vmatpush1.bf16.msra.mxu0 %v7706_v34  ;;  %v7778_v34 = vld [vmem:[#allocation2 + $0xd60] ss:$16 sps:$4 sm:$0xff]  }
 0x111   :  { %5117 = vmatpush1.bf16.msra.mxu1 %v7709_v41  ;;  %5077 = vmatprep.subr.bf16.mxu0 %v7714_v42  ;;  %v7781_v41 = vld [vmem:[#allocation2 + $0xf60] ss:$16 sps:$4 sm:$0xff]   ;;  %v7786_v42 = vld [vmem:[#allocation2 + $0xd44] ss:$16 sps:$4 sm:$0xff]  }
 0x112   :  { %5118 = vmatprep.subr.bf16.mxu1 %v7717_v43  ;;  %5107 = vmatprep.mubr.bf16.mxu0 %v8981_v22  ;;  %v7789_v43 = vld [vmem:[#allocation2 + $0xf44] ss:$16 sps:$4 sm:$0xff]  }
 0x113   :  { %5148 = vmatprep.mubr.bf16.mxu1 %v8985_v23 }
 0x114   :  { %5078 = vmatpush1.bf16.msra.mxu0 %v7712_v44  ;;  %v7784_v44 = vld [vmem:[#allocation2 + $0xd40] ss:$16 sps:$4 sm:$0xff]  }
 0x115   :  { %5119 = vmatpush1.bf16.msra.mxu1 %v7715_v45  ;;  %5079 = vmatprep.subr.bf16.mxu0 %v7720_v46  ;;  %v7787_v45 = vld [vmem:[#allocation2 + $0xf40] ss:$16 sps:$4 sm:$0xff]   ;;  %v7792_v46 = vld [vmem:[#allocation2 + $0xd24] ss:$16 sps:$4 sm:$0xff]  }
 0x116   :  { %5120 = vmatprep.subr.bf16.mxu1 %v7723_v48  ;;  %v885_v48 = vlaneseq }
 0x118   :  { %5080 = vmatpush1.bf16.msra.mxu0 %v7718_v49  ;;  %v7795_v49 = vld [vmem:[#allocation2 + $0xf24] ss:$16 sps:$4 sm:$0xff]  }
 0x119   :  { %5121 = vmatpush1.bf16.msra.mxu1 %v7721_v50  ;;  %5081 = vmatprep.subr.bf16.mxu0 %v7726_v52  ;;  %v7790_v50 = vld [vmem:[#allocation2 + $0xd20] ss:$16 sps:$4 sm:$0xff]  }
 0x11a   :  { %5122 = vmatprep.subr.bf16.mxu1 %v7729_v53  ;;  %v7793_v52 = vld [vmem:[#allocation2 + $0xf20] ss:$16 sps:$4 sm:$0xff]   ;;  %v7798_v53 = vld [vmem:[#allocation2 + $0xd04] ss:$16 sps:$4 sm:$0xff]  }
 0x11c   :  { %5082 = vmatpush1.bf16.msra.mxu0 %v7724_v54  ;;  %v8991_v54 = vshrl.u32 %v885_v48, 7  ;;  %v7830_v48 = vld [vmem:[#allocation2 + $0x1060] ss:$16 sps:$4 sm:$0xff]  }
 0x11d   :  { %5123 = vmatpush1.bf16.msra.mxu1 %v7727_v55  ;;  %5083 = vmatprep.subr.bf16.mxu0 %v7732_v56  ;;  %v7801_v55 = vld [vmem:[#allocation2 + $0xf04] ss:$16 sps:$4 sm:$0xff]   ;;  %v7796_v56 = vld [vmem:[#allocation2 + $0xd00] ss:$16 sps:$4 sm:$0xff]  }
 0x11e   :  { %5124 = vmatprep.subr.bf16.mxu1 %v7735_v57  ;;  %v7799_v57 = vld [vmem:[#allocation2 + $0xf00] ss:$16 sps:$4 sm:$0xff]  }
 0x120   :  { %5084 = vmatpush1.bf16.msra.mxu0 %v7730_v58  ;;  %v883_v58 = vld [vmem:[#allocation4] sm:$0xf] }
 0x121   :  { %5125 = vmatpush1.bf16.msra.mxu1 %v7733_v59  ;;  %5085 = vmatprep.subr.bf16.mxu0 %v7738_v60  ;;  %v887_v59 = vsub.s32 0, %v8991_v54  ;;  %v7808_v60 = vld [vmem:[#allocation2 + $0x10e4] ss:$16 sps:$4 sm:$0xff]  }
 0x122   :  { %5126 = vmatprep.subr.bf16.mxu1 %v7741_v61  ;;  %v7811_v61 = vld [vmem:[#allocation2 + $0x12e4] ss:$16 sps:$4 sm:$0xff]  }
 0x124   :  { %5086 = vmatpush1.bf16.msra.mxu0 %v7736_v62  ;;  %v7806_v62 = vld [vmem:[#allocation2 + $0x10e0] ss:$16 sps:$4 sm:$0xff]  }
 0x125   :  { %5127 = vmatpush1.bf16.msra.mxu1 %v7739_v63  ;;  %5087 = vmatprep.subr.bf16.mxu0 %v7744_v0  ;;  %v891_v63 = vsub.s32 1, %v8991_v54  ;;  %v8997_v0 = vcombine.low %v8964_v35, %v8964_v35  ;;  %v888_v35 = vrot.slane %v883_v58, %v887_v59 }
 0x126   :  { %5128 = vmatprep.subr.bf16.mxu1 %v7747_v1  ;;  %v9001_v1 = vcombine.low %v8977_v40, %v8977_v40  ;;  %v7817_v40 = vld [vmem:[#allocation2 + $0x12c4] ss:$16 sps:$4 sm:$0xff]  }
 0x128   :  { %5088 = vmatpush1.bf16.msra.mxu0 %v7742_v2  ;;  %v9006_v2 = vld [vmem:[%s9160_s0 + $0x40] sm:$0xff] }
 0x129   :  { %5129 = vmatpush1.bf16.msra.mxu1 %v7745_v3  ;;  %5089 = vmatprep.subr.bf16.mxu0 %v7750_v4  ;;  %v9011_v3 = vld [vmem:[%s9160_s0 + $0x48] sm:$0xff]  ;;  %v7809_v4 = vld [vmem:[#allocation2 + $0x12e0] ss:$16 sps:$4 sm:$0xff]  }
 0x12a   :  { %5130 = vmatprep.subr.bf16.mxu1 %v7753_v5  ;;  %v7814_v5 = vld [vmem:[#allocation2 + $0x10c4] ss:$16 sps:$4 sm:$0xff]  }
 0x12c   :  { %5090 = vmatpush1.bf16.msra.mxu0 %v7748_v8  ;;  %v892_v8 = vrot.slane %v883_v58, %v891_v63  ;;  %v7842_v58 = vld [vmem:[#allocation2 + $0x1020] ss:$16 sps:$4 sm:$0xff]  }
 0x12d   :  { %5131 = vmatpush1.bf16.msra.mxu1 %v7751_v9  ;;  %5091 = vmatprep.subr.bf16.mxu0 %v7756_v10  ;;  %v9019_v9 = vcombine.high %v9006_v2, %v9006_v2  ;;  %v9023_v10 = vcombine.high %v9011_v3, %v9011_v3 }
 0x12e   :  { %5132 = vmatprep.subr.bf16.mxu1 %v7759_v11 }
 0x130   :  { %5092 = vmatpush2.bf16.msra.mxu0 %v7754_v12 }
 0x131   :  { %5133 = vmatpush2.bf16.msra.mxu1 %v7757_v13  ;;  %5093 = vmatprep.subr.bf16.mxu0 %v7762_v14  ;;  %v7812_v13 = vld [vmem:[#allocation2 + $0x10c0] ss:$16 sps:$4 sm:$0xff]  }
 0x132   :  { %5134 = vmatprep.subr.bf16.mxu1 %v7765_v15  ;;  %v7815_v15 = vld [vmem:[#allocation2 + $0x12c0] ss:$16 sps:$4 sm:$0xff]  }
 0x134   :  { %5094 = vmatpush2.bf16.msra.mxu0 %v7760_v18 }
 0x135   :  { %5135 = vmatpush2.bf16.msra.mxu1 %v7763_v19  ;;  %5095 = vmatprep.subr.bf16.mxu0 %v7768_v20  ;;  %v7820_v20 = vld [vmem:[#allocation2 + $0x10a4] ss:$16 sps:$4 sm:$0xff]  }
 0x136   :  { %5136 = vmatprep.subr.bf16.mxu1 %v7771_v21  ;;  %v7823_v21 = vld [vmem:[#allocation2 + $0x12a4] ss:$16 sps:$4 sm:$0xff]  }
 0x138   :  { %5096 = vmatpush2.bf16.msra.mxu0 %v7766_v26 }
 0x139   :  { %5137 = vmatpush2.bf16.msra.mxu1 %v7769_v27  ;;  %5097 = vmatprep.subr.bf16.mxu0 %v7774_v28 }
 0x13a   :  { %5138 = vmatprep.subr.bf16.mxu1 %v7777_v29 }
 0x13c   :  { %5098 = vmatpush2.bf16.msra.mxu0 %v7772_v30  ;;  %v7818_v30 = vld [vmem:[#allocation2 + $0x10a0] ss:$16 sps:$4 sm:$0xff]  }
 0x13d   :  { %5139 = vmatpush2.bf16.msra.mxu1 %v7775_v31  ;;  %5099 = vmatprep.subr.bf16.mxu0 %v7780_v32  ;;  %v7821_v32 = vld [vmem:[#allocation2 + $0x12a0] ss:$16 sps:$4 sm:$0xff]  }
 0x13e   :  { %5140 = vmatprep.subr.bf16.mxu1 %v7783_v33 }
 0x140   :  { %5100 = vmatpush2.bf16.msra.mxu0 %v7778_v34 }
 0x141   :  { %5141 = vmatpush2.bf16.msra.mxu1 %v7781_v41  ;;  %5101 = vmatprep.subr.bf16.mxu0 %v7786_v42  ;;  %v7826_v41 = vld [vmem:[#allocation2 + $0x1084] ss:$16 sps:$4 sm:$0xff]  }
 0x142   :  { %5142 = vmatprep.subr.bf16.mxu1 %v7789_v43  ;;  %v7829_v42 = vld [vmem:[#allocation2 + $0x1284] ss:$16 sps:$4 sm:$0xff]   ;;  %v7824_v43 = vld [vmem:[#allocation2 + $0x1080] ss:$16 sps:$4 sm:$0xff]  }
 0x144   :  { %5102 = vmatpush2.bf16.msra.mxu0 %v7784_v44  ;;  %v7827_v44 = vld [vmem:[#allocation2 + $0x1280] ss:$16 sps:$4 sm:$0xff]  }
 0x145   :  { %5143 = vmatpush2.bf16.msra.mxu1 %v7787_v45  ;;  %5103 = vmatprep.subr.bf16.mxu0 %v7792_v46  ;;  %v7832_v45 = vld [vmem:[#allocation2 + $0x1064] ss:$16 sps:$4 sm:$0xff]  }
 0x146   :  { %5144 = vmatprep.subr.bf16.mxu1 %v7795_v49  ;;  %v7835_v46 = vld [vmem:[#allocation2 + $0x1264] ss:$16 sps:$4 sm:$0xff]   ;;  %v7833_v49 = vld [vmem:[#allocation2 + $0x1260] ss:$16 sps:$4 sm:$0xff]  }
 0x148   :  { %5104 = vmatpush2.bf16.msra.mxu0 %v7790_v50  ;;  %v7838_v50 = vld [vmem:[#allocation2 + $0x1044] ss:$16 sps:$4 sm:$0xff]  }
 0x149   :  { %5145 = vmatpush2.bf16.msra.mxu1 %v7793_v52  ;;  %5105 = vmatprep.subr.bf16.mxu0 %v7798_v53  ;;  %v7841_v52 = vld [vmem:[#allocation2 + $0x1244] ss:$16 sps:$4 sm:$0xff]   ;;  %v7836_v53 = vld [vmem:[#allocation2 + $0x1040] ss:$16 sps:$4 sm:$0xff]  }
 0x14a   :  { %5146 = vmatprep.subr.bf16.mxu1 %v7801_v55  ;;  %v7839_v55 = vld [vmem:[#allocation2 + $0x1240] ss:$16 sps:$4 sm:$0xff]  }
 0x14c   :  { %5106 = vmatpush2.bf16.msra.mxu0 %v7796_v56  ;;  %v7844_v56 = vld [vmem:[#allocation2 + $0x1024] ss:$16 sps:$4 sm:$0xff]  }
 0x14d   :  { %5147 = vmatpush2.bf16.msra.mxu1 %v7799_v57  ;;  %5157 = vmatprep.subr.bf16.mxu0 %v7808_v60  ;;  %v7847_v57 = vld [vmem:[#allocation2 + $0x1224] ss:$16 sps:$4 sm:$0xff]   ;;  %v7845_v60 = vld [vmem:[#allocation2 + $0x1220] ss:$16 sps:$4 sm:$0xff]  }
 0x14e   :  { %5198 = vmatprep.subr.bf16.mxu1 %v7811_v61  ;;  %v7850_v61 = vld [vmem:[#allocation2 + $0x1004] ss:$16 sps:$4 sm:$0xff]  }
 0x14f   :  { %v4863_v11 = vpop.f32.mrf.mxu0  ;;  %5108 = vmatmul.mubr.bf16.vlgmr.msra.gmra.mxu0 %v8997_v0 }
 0x150   :  { %v4904_v12 = vpop.f32.mrf.mxu1  ;;  %5149 = vmatmul.mubr.bf16.vlgmr.msra.gmra.mxu1 %v9001_v1  ;;  %v4864_v14 = vadd.f32 %v4863_v11, %v888_v35  ;;  %5158 = vmatpush1.bf16.msra.mxu0 %v7806_v62  ;;  %v7853_v62 = vld [vmem:[#allocation2 + $0x1204] ss:$16 sps:$4 sm:$0xff]   ;;  %v7848_v35 = vld [vmem:[#allocation2 + $0x1000] ss:$16 sps:$4 sm:$0xff]  }
 0x151   :  { %5199 = vmatpush1.bf16.msra.mxu1 %v7809_v4  ;;  %v4865_v18 = vpop.f32.mrf.mxu0  ;;  %5159 = vmatprep.subr.bf16.mxu0 %v7814_v5  ;;  %v7851_v4 = vld [vmem:[#allocation2 + $0x1200] ss:$16 sps:$4 sm:$0xff]   ;;  %v7856_v5 = vld [vmem:[#allocation2 + $0x11e4] ss:$16 sps:$4 sm:$0xff]  }
 0x152   :  { %v4906_v19 = vpop.f32.mrf.mxu1  ;;  %5200 = vmatprep.subr.bf16.mxu1 %v7817_v40  ;;  %v9027_v26 = vadd.f32 %v4904_v12, %v4864_v14  ;;  %v4866_v27 = vadd.f32 %v4865_v18, %v892_v8  ;;  %5189 = vmatprep.mubr.bf16.mxu0 %v9019_v9  ;;  %v7859_v40 = vld [vmem:[#allocation2 + $0x13e4] ss:$16 sps:$4 sm:$0xff]   ;;  %v7854_v8 = vld [vmem:[#allocation2 + $0x11e0] ss:$16 sps:$4 sm:$0xff]  }
 0x153   :  { %5230 = vmatprep.mubr.bf16.mxu1 %v9023_v10  ;;  %v4867_v28 = vpop.f32.mrf.mxu0  ;;  %v7857_v11 = vld [vmem:[#allocation2 + $0x13e0] ss:$16 sps:$4 sm:$0xff]   ;;  %v7862_v12 = vld [vmem:[#allocation2 + $0x11c4] ss:$16 sps:$4 sm:$0xff]  }
 0x154   :  { %v4908_v29 = vpop.f32.mrf.mxu1  ;;  %v9031_v31 = vadd.f32 %v4906_v19, %v4866_v27  ;;  %5160 = vmatpush1.bf16.msra.mxu0 %v7812_v13  ;;  %v7865_v13 = vld [vmem:[#allocation2 + $0x13c4] ss:$16 sps:$4 sm:$0xff]   ;;  %v7860_v14 = vld [vmem:[#allocation2 + $0x11c0] ss:$16 sps:$4 sm:$0xff]  }
 0x155   :  { %5201 = vmatpush1.bf16.msra.mxu1 %v7815_v15  ;;  %v4868_v33 = vpop.f32.mrf.mxu0  ;;  %5161 = vmatprep.subr.bf16.mxu0 %v7820_v20  ;;  %v7863_v15 = vld [vmem:[#allocation2 + $0x13c0] ss:$16 sps:$4 sm:$0xff]   ;;  %v7868_v18 = vld [vmem:[#allocation2 + $0x11a4] ss:$16 sps:$4 sm:$0xff]  }
 0x156   :  { %v4909_v34 = vpop.f32.mrf.mxu1  ;;  %5202 = vmatprep.subr.bf16.mxu1 %v7823_v21  ;;  %v7871_v19 = vld [vmem:[#allocation2 + $0x13a4] ss:$16 sps:$4 sm:$0xff]   ;;  %v7866_v20 = vld [vmem:[#allocation2 + $0x11a0] ss:$16 sps:$4 sm:$0xff]  }
 0x157   :  { %v7869_v21 = vld [vmem:[#allocation2 + $0x13a0] ss:$16 sps:$4 sm:$0xff]   ;;  %v7874_v27 = vld [vmem:[#allocation2 + $0x1184] ss:$16 sps:$4 sm:$0xff]  }
 0x158   :  { %5162 = vmatpush1.bf16.msra.mxu0 %v7818_v30  ;;  %v7877_v28 = vld [vmem:[#allocation2 + $0x1384] ss:$16 sps:$4 sm:$0xff]   ;;  %v7872_v29 = vld [vmem:[#allocation2 + $0x1180] ss:$16 sps:$4 sm:$0xff]  }
 0x159   :  { %5203 = vmatpush1.bf16.msra.mxu1 %v7821_v32  ;;  %5163 = vmatprep.subr.bf16.mxu0 %v7826_v41  ;;  %v7875_v30 = vld [vmem:[#allocation2 + $0x1380] ss:$16 sps:$4 sm:$0xff]   ;;  %v7880_v32 = vld [vmem:[#allocation2 + $0x1164] ss:$16 sps:$4 sm:$0xff]  }
 0x15a   :  { %5204 = vmatprep.subr.bf16.mxu1 %v7829_v42  ;;  %v7883_v33 = vld [vmem:[#allocation2 + $0x1364] ss:$16 sps:$4 sm:$0xff]   ;;  %v7878_v34 = vld [vmem:[#allocation2 + $0x1160] ss:$16 sps:$4 sm:$0xff]  }
 0x15b   :  { %v7881_v41 = vld [vmem:[#allocation2 + $0x1360] ss:$16 sps:$4 sm:$0xff]   ;;  %v7886_v42 = vld [vmem:[#allocation2 + $0x1144] ss:$16 sps:$4 sm:$0xff]  }
 0x15c   :  { %5164 = vmatpush1.bf16.msra.mxu0 %v7824_v43  ;;  %v7889_v43 = vld [vmem:[#allocation2 + $0x1344] ss:$16 sps:$4 sm:$0xff]  }
 0x15d   :  { %5205 = vmatpush1.bf16.msra.mxu1 %v7827_v44  ;;  %5165 = vmatprep.subr.bf16.mxu0 %v7832_v45  ;;  %v7884_v44 = vld [vmem:[#allocation2 + $0x1140] ss:$16 sps:$4 sm:$0xff]  }
 0x15e   :  { %5206 = vmatprep.subr.bf16.mxu1 %v7835_v46  ;;  %v7887_v45 = vld [vmem:[#allocation2 + $0x1340] ss:$16 sps:$4 sm:$0xff]   ;;  %v7892_v46 = vld [vmem:[#allocation2 + $0x1124] ss:$16 sps:$4 sm:$0xff]  }
 0x160   :  { %5166 = vmatpush1.bf16.msra.mxu0 %v7830_v48  ;;  %v7895_v48 = vld [vmem:[#allocation2 + $0x1324] ss:$16 sps:$4 sm:$0xff]  }
 0x161   :  { %5207 = vmatpush1.bf16.msra.mxu1 %v7833_v49  ;;  %5167 = vmatprep.subr.bf16.mxu0 %v7838_v50  ;;  %v7890_v49 = vld [vmem:[#allocation2 + $0x1120] ss:$16 sps:$4 sm:$0xff]  }
 0x162   :  { %5208 = vmatprep.subr.bf16.mxu1 %v7841_v52  ;;  %v7893_v50 = vld [vmem:[#allocation2 + $0x1320] ss:$16 sps:$4 sm:$0xff]   ;;  %v7898_v52 = vld [vmem:[#allocation2 + $0x1104] ss:$16 sps:$4 sm:$0xff]  }
 0x164   :  { %5168 = vmatpush1.bf16.msra.mxu0 %v7836_v53  ;;  %v7901_v53 = vld [vmem:[#allocation2 + $0x1304] ss:$16 sps:$4 sm:$0xff]  }
 0x165   :  { %5209 = vmatpush1.bf16.msra.mxu1 %v7839_v55  ;;  %5169 = vmatprep.subr.bf16.mxu0 %v7844_v56  ;;  %v7896_v55 = vld [vmem:[#allocation2 + $0x1100] ss:$16 sps:$4 sm:$0xff]  }
 0x166   :  { %5210 = vmatprep.subr.bf16.mxu1 %v7847_v57  ;;  %v7899_v56 = vld [vmem:[#allocation2 + $0x1300] ss:$16 sps:$4 sm:$0xff]   ;;  %v7908_v57 = vld [vmem:[#allocation2 + $0x14e4] ss:$16 sps:$4 sm:$0xff]  }
 0x168   :  { %5170 = vmatpush1.bf16.msra.mxu0 %v7842_v58  ;;  %v7911_v58 = vld [vmem:[#allocation2 + $0x16e4] ss:$16 sps:$4 sm:$0xff]  }
 0x169   :  { %5211 = vmatpush1.bf16.msra.mxu1 %v7845_v60  ;;  %5171 = vmatprep.subr.bf16.mxu0 %v7850_v61  ;;  %v9036_v60 = vld [vmem:[%s9160_s0 + $0x50] sm:$0xff]  ;;  %v9041_v61 = vld [vmem:[%s9160_s0 + $0x58] sm:$0xff] }
 0x16a   :  { %5212 = vmatprep.subr.bf16.mxu1 %v7853_v62  ;;  %v7906_v62 = vld [vmem:[#allocation2 + $0x14e0] ss:$16 sps:$4 sm:$0xff]  }
 0x16c   :  { %5172 = vmatpush1.bf16.msra.mxu0 %v7848_v35  ;;  %v7909_v35 = vld [vmem:[#allocation2 + $0x16e0] ss:$16 sps:$4 sm:$0xff]  }
 0x16d   :  { %5213 = vmatpush1.bf16.msra.mxu1 %v7851_v4  ;;  %5173 = vmatprep.subr.bf16.mxu0 %v7856_v5  ;;  %v9045_v4 = vcombine.low %v9006_v2, %v9006_v2  ;;  %v9049_v5 = vcombine.low %v9011_v3, %v9011_v3  ;;  %v9057_v2 = vcombine.high %v9041_v61, %v9041_v61 }
 0x16e   :  { %5214 = vmatprep.subr.bf16.mxu1 %v7859_v40  ;;  %v7914_v40 = vld [vmem:[#allocation2 + $0x14c4] ss:$16 sps:$4 sm:$0xff]  }
 0x170   :  { %5174 = vmatpush2.bf16.msra.mxu0 %v7854_v8  ;;  %v7917_v8 = vld [vmem:[#allocation2 + $0x16c4] ss:$16 sps:$4 sm:$0xff]  }
 0x171   :  { %5215 = vmatpush2.bf16.msra.mxu1 %v7857_v11  ;;  %5175 = vmatprep.subr.bf16.mxu0 %v7862_v12  ;;  %v7912_v11 = vld [vmem:[#allocation2 + $0x14c0] ss:$16 sps:$4 sm:$0xff]  }
 0x172   :  { %5216 = vmatprep.subr.bf16.mxu1 %v7865_v13  ;;  %v7915_v12 = vld [vmem:[#allocation2 + $0x16c0] ss:$16 sps:$4 sm:$0xff]   ;;  %v9053_v13 = vcombine.high %v9036_v60, %v9036_v60 }
 0x174   :  { %5176 = vmatpush2.bf16.msra.mxu0 %v7860_v14 }
 0x175   :  { %5217 = vmatpush2.bf16.msra.mxu1 %v7863_v15  ;;  %5177 = vmatprep.subr.bf16.mxu0 %v7868_v18 }
 0x176   :  { %5218 = vmatprep.subr.bf16.mxu1 %v7871_v19 }
 0x178   :  { %5178 = vmatpush2.bf16.msra.mxu0 %v7866_v20  ;;  %v7920_v20 = vld [vmem:[#allocation2 + $0x14a4] ss:$16 sps:$4 sm:$0xff]  }
 0x179   :  { %5219 = vmatpush2.bf16.msra.mxu1 %v7869_v21  ;;  %5179 = vmatprep.subr.bf16.mxu0 %v7874_v27  ;;  %v7923_v21 = vld [vmem:[#allocation2 + $0x16a4] ss:$16 sps:$4 sm:$0xff]  }
 0x17a   :  { %5220 = vmatprep.subr.bf16.mxu1 %v7877_v28 }
 0x17c   :  { %5180 = vmatpush2.bf16.msra.mxu0 %v7872_v29  ;;  %v7918_v29 = vld [vmem:[#allocation2 + $0x14a0] ss:$16 sps:$4 sm:$0xff]  }
 0x17d   :  { %5221 = vmatpush2.bf16.msra.mxu1 %v7875_v30  ;;  %5181 = vmatprep.subr.bf16.mxu0 %v7880_v32  ;;  %v7921_v30 = vld [vmem:[#allocation2 + $0x16a0] ss:$16 sps:$4 sm:$0xff]  }
 0x17e   :  { %5222 = vmatprep.subr.bf16.mxu1 %v7883_v33 }
 0x180   :  { %5182 = vmatpush2.bf16.msra.mxu0 %v7878_v34 }
 0x181   :  { %5223 = vmatpush2.bf16.msra.mxu1 %v7881_v41  ;;  %5183 = vmatprep.subr.bf16.mxu0 %v7886_v42  ;;  %v7926_v42 = vld [vmem:[#allocation2 + $0x1484] ss:$16 sps:$4 sm:$0xff]  }
 0x182   :  { %5224 = vmatprep.subr.bf16.mxu1 %v7889_v43  ;;  %v7929_v43 = vld [vmem:[#allocation2 + $0x1684] ss:$16 sps:$4 sm:$0xff]  }
 0x184   :  { %5184 = vmatpush2.bf16.msra.mxu0 %v7884_v44  ;;  %v7927_v44 = vld [vmem:[#allocation2 + $0x1680] ss:$16 sps:$4 sm:$0xff]  }
 0x185   :  { %5225 = vmatpush2.bf16.msra.mxu1 %v7887_v45  ;;  %5185 = vmatprep.subr.bf16.mxu0 %v7892_v46  ;;  %v7932_v45 = vld [vmem:[#allocation2 + $0x1464] ss:$16 sps:$4 sm:$0xff]  }
 0x186   :  { %5226 = vmatprep.subr.bf16.mxu1 %v7895_v48  ;;  %v7935_v46 = vld [vmem:[#allocation2 + $0x1664] ss:$16 sps:$4 sm:$0xff]   ;;  %v7930_v48 = vld [vmem:[#allocation2 + $0x1460] ss:$16 sps:$4 sm:$0xff]  }
 0x188   :  { %5186 = vmatpush2.bf16.msra.mxu0 %v7890_v49  ;;  %v7933_v49 = vld [vmem:[#allocation2 + $0x1660] ss:$16 sps:$4 sm:$0xff]  }
 0x189   :  { %5227 = vmatpush2.bf16.msra.mxu1 %v7893_v50  ;;  %5187 = vmatprep.subr.bf16.mxu0 %v7898_v52  ;;  %v7938_v50 = vld [vmem:[#allocation2 + $0x1444] ss:$16 sps:$4 sm:$0xff]  }
 0x18a   :  { %5228 = vmatprep.subr.bf16.mxu1 %v7901_v53  ;;  %v7941_v52 = vld [vmem:[#allocation2 + $0x1644] ss:$16 sps:$4 sm:$0xff]   ;;  %v7936_v53 = vld [vmem:[#allocation2 + $0x1440] ss:$16 sps:$4 sm:$0xff]  }
 0x18c   :  { %5188 = vmatpush2.bf16.msra.mxu0 %v7896_v55  ;;  %v7939_v55 = vld [vmem:[#allocation2 + $0x1640] ss:$16 sps:$4 sm:$0xff]  }
 0x18d   :  { %5229 = vmatpush2.bf16.msra.mxu1 %v7899_v56  ;;  %5239 = vmatprep.subr.bf16.mxu0 %v7908_v57  ;;  %v7944_v56 = vld [vmem:[#allocation2 + $0x1424] ss:$16 sps:$4 sm:$0xff]  }
 0x18e   :  { %5280 = vmatprep.subr.bf16.mxu1 %v7911_v58  ;;  %v7947_v57 = vld [vmem:[#allocation2 + $0x1624] ss:$16 sps:$4 sm:$0xff]   ;;  %v7942_v58 = vld [vmem:[#allocation2 + $0x1420] ss:$16 sps:$4 sm:$0xff]  }
 0x18f   :  { %v4945_v14 = vpop.f32.mrf.mxu0  ;;  %5190 = vmatmul.mubr.bf16.vlgmr.msra.gmra.mxu0 %v9045_v4 }
 0x190   :  { %v4986_v15 = vpop.f32.mrf.mxu1  ;;  %5231 = vmatmul.mubr.bf16.vlgmr.msra.gmra.mxu1 %v9049_v5  ;;  %v4946_v3 = vadd.f32 %v4945_v14, %v9027_v26  ;;  %5240 = vmatpush1.bf16.msra.mxu0 %v7906_v62  ;;  %v7945_v62 = vld [vmem:[#allocation2 + $0x1620] ss:$16 sps:$4 sm:$0xff]   ;;  %v7959_v14 = vld [vmem:[#allocation2 + $0x17e4] ss:$16 sps:$4 sm:$0xff]  }
 0x191   :  { %5281 = vmatpush1.bf16.msra.mxu1 %v7909_v35  ;;  %v4947_v18 = vpop.f32.mrf.mxu0  ;;  %5241 = vmatprep.subr.bf16.mxu0 %v7914_v40  ;;  %v7950_v35 = vld [vmem:[#allocation2 + $0x1404] ss:$16 sps:$4 sm:$0xff]  }
 0x192   :  { %v4988_v19 = vpop.f32.mrf.mxu1  ;;  %5282 = vmatprep.subr.bf16.mxu1 %v7917_v8  ;;  %v9062_v27 = vadd.f32 %v4986_v15, %v4946_v3  ;;  %v4948_v28 = vadd.f32 %v4947_v18, %v9031_v31  ;;  %5271 = vmatprep.mubr.bf16.mxu0 %v9053_v13  ;;  %v7924_v31 = vld [vmem:[#allocation2 + $0x1480] ss:$16 sps:$4 sm:$0xff]   ;;  %v7953_v40 = vld [vmem:[#allocation2 + $0x1604] ss:$16 sps:$4 sm:$0xff]  }
 0x193   :  { %5312 = vmatprep.mubr.bf16.mxu1 %v9057_v2  ;;  %v4949_v32 = vpop.f32.mrf.mxu0  ;;  %v7948_v8 = vld [vmem:[#allocation2 + $0x1400] ss:$16 sps:$4 sm:$0xff]   ;;  %v7962_v18 = vld [vmem:[#allocation2 + $0x15c4] ss:$16 sps:$4 sm:$0xff]  }
 0x194   :  { %v4990_v26 = vpop.f32.mrf.mxu1  ;;  %v9067_v33 = vadd.f32 %v4988_v19, %v4948_v28  ;;  %5242 = vmatpush1.bf16.msra.mxu0 %v7912_v11  ;;  %v7951_v11 = vld [vmem:[#allocation2 + $0x1600] ss:$16 sps:$4 sm:$0xff]   ;;  %v7965_v19 = vld [vmem:[#allocation2 + $0x17c4] ss:$16 sps:$4 sm:$0xff]  }
 0x195   :  { %5283 = vmatpush1.bf16.msra.mxu1 %v7915_v12  ;;  %v4950_v34 = vpop.f32.mrf.mxu0  ;;  %5243 = vmatprep.subr.bf16.mxu0 %v7920_v20  ;;  %v7956_v12 = vld [vmem:[#allocation2 + $0x15e4] ss:$16 sps:$4 sm:$0xff]   ;;  %v7954_v15 = vld [vmem:[#allocation2 + $0x15e0] ss:$16 sps:$4 sm:$0xff]  }
 0x196   :  { %v4991_v41 = vpop.f32.mrf.mxu1  ;;  %5284 = vmatprep.subr.bf16.mxu1 %v7923_v21  ;;  %v7957_v3 = vld [vmem:[#allocation2 + $0x17e0] ss:$16 sps:$4 sm:$0xff]   ;;  %v7968_v28 = vld [vmem:[#allocation2 + $0x15a4] ss:$16 sps:$4 sm:$0xff]  }
 0x197   :  { %v7960_v20 = vld [vmem:[#allocation2 + $0x15c0] ss:$16 sps:$4 sm:$0xff]   ;;  %v7974_v26 = vld [vmem:[#allocation2 + $0x1584] ss:$16 sps:$4 sm:$0xff]  }
 0x198   :  { %5244 = vmatpush1.bf16.msra.mxu0 %v7918_v29  ;;  %v7963_v21 = vld [vmem:[#allocation2 + $0x17c0] ss:$16 sps:$4 sm:$0xff]   ;;  %v7971_v29 = vld [vmem:[#allocation2 + $0x17a4] ss:$16 sps:$4 sm:$0xff]  }
 0x199   :  { %5285 = vmatpush1.bf16.msra.mxu1 %v7921_v30  ;;  %5245 = vmatprep.subr.bf16.mxu0 %v7926_v42  ;;  %v7966_v30 = vld [vmem:[#allocation2 + $0x15a0] ss:$16 sps:$4 sm:$0xff]   ;;  %v7977_v34 = vld [vmem:[#allocation2 + $0x1784] ss:$16 sps:$4 sm:$0xff]  }
 0x19a   :  { %5286 = vmatprep.subr.bf16.mxu1 %v7929_v43  ;;  %v7969_v32 = vld [vmem:[#allocation2 + $0x17a0] ss:$16 sps:$4 sm:$0xff]   ;;  %v7980_v43 = vld [vmem:[#allocation2 + $0x1564] ss:$16 sps:$4 sm:$0xff]  }
 0x19b   :  { %v7972_v41 = vld [vmem:[#allocation2 + $0x1580] ss:$16 sps:$4 sm:$0xff]  }
 0x19c   :  { %5246 = vmatpush1.bf16.msra.mxu0 %v7924_v31  ;;  %v7975_v42 = vld [vmem:[#allocation2 + $0x1780] ss:$16 sps:$4 sm:$0xff]   ;;  %v7983_v31 = vld [vmem:[#allocation2 + $0x1764] ss:$16 sps:$4 sm:$0xff]  }
 0x19d   :  { %5287 = vmatpush1.bf16.msra.mxu1 %v7927_v44  ;;  %5247 = vmatprep.subr.bf16.mxu0 %v7932_v45  ;;  %v7978_v44 = vld [vmem:[#allocation2 + $0x1560] ss:$16 sps:$4 sm:$0xff]  }
 0x19e   :  { %5288 = vmatprep.subr.bf16.mxu1 %v7935_v46  ;;  %v7981_v45 = vld [vmem:[#allocation2 + $0x1760] ss:$16 sps:$4 sm:$0xff]   ;;  %v7986_v46 = vld [vmem:[#allocation2 + $0x1544] ss:$16 sps:$4 sm:$0xff]  }
 0x1a0   :  { %5248 = vmatpush1.bf16.msra.mxu0 %v7930_v48  ;;  %v7989_v48 = vld [vmem:[#allocation2 + $0x1744] ss:$16 sps:$4 sm:$0xff]  }
 0x1a1   :  { %5289 = vmatpush1.bf16.msra.mxu1 %v7933_v49  ;;  %5249 = vmatprep.subr.bf16.mxu0 %v7938_v50  ;;  %v7984_v49 = vld [vmem:[#allocation2 + $0x1540] ss:$16 sps:$4 sm:$0xff]  }
 0x1a2   :  { %5290 = vmatprep.subr.bf16.mxu1 %v7941_v52  ;;  %v7987_v50 = vld [vmem:[#allocation2 + $0x1740] ss:$16 sps:$4 sm:$0xff]   ;;  %v7992_v52 = vld [vmem:[#allocation2 + $0x1524] ss:$16 sps:$4 sm:$0xff]  }
 0x1a4   :  { %5250 = vmatpush1.bf16.msra.mxu0 %v7936_v53  ;;  %v7995_v53 = vld [vmem:[#allocation2 + $0x1724] ss:$16 sps:$4 sm:$0xff]  }
 0x1a5   :  { %5291 = vmatpush1.bf16.msra.mxu1 %v7939_v55  ;;  %5251 = vmatprep.subr.bf16.mxu0 %v7944_v56  ;;  %v7990_v55 = vld [vmem:[#allocation2 + $0x1520] ss:$16 sps:$4 sm:$0xff]  }
 0x1a6   :  { %5292 = vmatprep.subr.bf16.mxu1 %v7947_v57  ;;  %v7993_v56 = vld [vmem:[#allocation2 + $0x1720] ss:$16 sps:$4 sm:$0xff]   ;;  %v7998_v57 = vld [vmem:[#allocation2 + $0x1504] ss:$16 sps:$4 sm:$0xff]  }
 0x1a8   :  { %5252 = vmatpush1.bf16.msra.mxu0 %v7942_v58  ;;  %v8001_v58 = vld [vmem:[#allocation2 + $0x1704] ss:$16 sps:$4 sm:$0xff]  }
 0x1a9   :  { %5293 = vmatpush1.bf16.msra.mxu1 %v7945_v62  ;;  %5253 = vmatprep.subr.bf16.mxu0 %v7950_v35  ;;  %v7996_v62 = vld [vmem:[#allocation2 + $0x1500] ss:$16 sps:$4 sm:$0xff]  }
 0x1aa   :  { %5294 = vmatprep.subr.bf16.mxu1 %v7953_v40  ;;  %v7999_v35 = vld [vmem:[#allocation2 + $0x1700] ss:$16 sps:$4 sm:$0xff]   ;;  %v8008_v40 = vld [vmem:[#allocation2 + $0xec] ss:$16 sps:$4 sm:$0xff]  }
 0x1ac   :  { %5254 = vmatpush1.bf16.msra.mxu0 %v7948_v8  ;;  %v8011_v8 = vld [vmem:[#allocation2 + $0x2ec] ss:$16 sps:$4 sm:$0xff]  }
 0x1ad   :  { %5295 = vmatpush1.bf16.msra.mxu1 %v7951_v11  ;;  %5255 = vmatprep.subr.bf16.mxu0 %v7956_v12  ;;  %v8006_v11 = vld [vmem:[#allocation2 + $0xe8] ss:$16 sps:$4 sm:$0xff]  }
 0x1ae   :  { %5296 = vmatprep.subr.bf16.mxu1 %v7959_v14  ;;  %v8009_v12 = vld [vmem:[#allocation2 + $0x2e8] ss:$16 sps:$4 sm:$0xff]   ;;  %v9071_v14 = vcombine.low %v9036_v60, %v9036_v60 }
 0x1b0   :  { %5256 = vmatpush2.bf16.msra.mxu0 %v7954_v15  ;;  %v9075_v15 = vcombine.low %v9041_v61, %v9041_v61 }
 0x1b1   :  { %5297 = vmatpush2.bf16.msra.mxu1 %v7957_v3  ;;  %5257 = vmatprep.subr.bf16.mxu0 %v7962_v18  ;;  %v8014_v3 = vld [vmem:[#allocation2 + $0xcc] ss:$16 sps:$4 sm:$0xff]  }
 0x1b2   :  { %5298 = vmatprep.subr.bf16.mxu1 %v7965_v19  ;;  %v8017_v18 = vld [vmem:[#allocation2 + $0x2cc] ss:$16 sps:$4 sm:$0xff]   ;;  %v8012_v19 = vld [vmem:[#allocation2 + $0xc8] ss:$16 sps:$4 sm:$0xff]  }
 0x1b4   :  { %5258 = vmatpush2.bf16.msra.mxu0 %v7960_v20  ;;  %v8015_v20 = vld [vmem:[#allocation2 + $0x2c8] ss:$16 sps:$4 sm:$0xff]  }
 0x1b5   :  { %5299 = vmatpush2.bf16.msra.mxu1 %v7963_v21  ;;  %5259 = vmatprep.subr.bf16.mxu0 %v7968_v28 }
 0x1b6   :  { %5300 = vmatprep.subr.bf16.mxu1 %v7971_v29 }
 0x1b8   :  { %5260 = vmatpush2.bf16.msra.mxu0 %v7966_v30  ;;  %v8020_v30 = vld [vmem:[#allocation2 + $0xac] ss:$16 sps:$4 sm:$0xff]  }
 0x1b9   :  { %5301 = vmatpush2.bf16.msra.mxu1 %v7969_v32  ;;  %5261 = vmatprep.subr.bf16.mxu0 %v7974_v26  ;;  %v8023_v32 = vld [vmem:[#allocation2 + $0x2ac] ss:$16 sps:$4 sm:$0xff]  }
 0x1ba   :  { %5302 = vmatprep.subr.bf16.mxu1 %v7977_v34 }
 0x1bc   :  { %5262 = vmatpush2.bf16.msra.mxu0 %v7972_v41  ;;  %v8018_v41 = vld [vmem:[#allocation2 + $0xa8] ss:$16 sps:$4 sm:$0xff]  }
 0x1bd   :  { %5303 = vmatpush2.bf16.msra.mxu1 %v7975_v42  ;;  %5263 = vmatprep.subr.bf16.mxu0 %v7980_v43  ;;  %v8021_v42 = vld [vmem:[#allocation2 + $0x2a8] ss:$16 sps:$4 sm:$0xff]  }
 0x1be   :  { %5304 = vmatprep.subr.bf16.mxu1 %v7983_v31 }
 0x1c0   :  { %5264 = vmatpush2.bf16.msra.mxu0 %v7978_v44 }
 0x1c1   :  { %5305 = vmatpush2.bf16.msra.mxu1 %v7981_v45  ;;  %5265 = vmatprep.subr.bf16.mxu0 %v7986_v46  ;;  %v8026_v46 = vld [vmem:[#allocation2 + $0x8c] ss:$16 sps:$4 sm:$0xff]  }
 0x1c2   :  { %5306 = vmatprep.subr.bf16.mxu1 %v7989_v48  ;;  %v8029_v48 = vld [vmem:[#allocation2 + $0x28c] ss:$16 sps:$4 sm:$0xff]  }
 0x1c4   :  { %5266 = vmatpush2.bf16.msra.mxu0 %v7984_v49  ;;  %v8027_v49 = vld [vmem:[#allocation2 + $0x288] ss:$16 sps:$4 sm:$0xff]  }
 0x1c5   :  { %5307 = vmatpush2.bf16.msra.mxu1 %v7987_v50  ;;  %5267 = vmatprep.subr.bf16.mxu0 %v7992_v52  ;;  %v8030_v50 = vld [vmem:[#allocation2 + $0x68] ss:$16 sps:$4 sm:$0xff]  }
 0x1c6   :  { %5308 = vmatprep.subr.bf16.mxu1 %v7995_v53  ;;  %v8033_v52 = vld [vmem:[#allocation2 + $0x268] ss:$16 sps:$4 sm:$0xff]   ;;  %v8038_v53 = vld [vmem:[#allocation2 + $0x4c] ss:$16 sps:$4 sm:$0xff]  }
 0x1c8   :  { %5268 = vmatpush2.bf16.msra.mxu0 %v7990_v55  ;;  %v8041_v55 = vld [vmem:[#allocation2 + $0x24c] ss:$16 sps:$4 sm:$0xff]  }
 0x1c9   :  { %5309 = vmatpush2.bf16.msra.mxu1 %v7993_v56  ;;  %5269 = vmatprep.subr.bf16.mxu0 %v7998_v57  ;;  %v8036_v56 = vld [vmem:[#allocation2 + $0x48] ss:$16 sps:$4 sm:$0xff]  }
 0x1ca   :  { %5310 = vmatprep.subr.bf16.mxu1 %v8001_v58  ;;  %v8039_v57 = vld [vmem:[#allocation2 + $0x248] ss:$16 sps:$4 sm:$0xff]   ;;  %v8044_v58 = vld [vmem:[#allocation2 + $0x2c] ss:$16 sps:$4 sm:$0xff]  }
 0x1cc   :  { %5270 = vmatpush2.bf16.msra.mxu0 %v7996_v62  ;;  %v8047_v62 = vld [vmem:[#allocation2 + $0x22c] ss:$16 sps:$4 sm:$0xff]  }
 0x1cd   :  { %5311 = vmatpush2.bf16.msra.mxu1 %v7999_v35  ;;  %5321 = vmatprep.subr.bf16.mxu0 %v8008_v40  ;;  %v8042_v35 = vld [vmem:[#allocation2 + $0x28] ss:$16 sps:$4 sm:$0xff]  }
 0x1ce   :  { %5362 = vmatprep.subr.bf16.mxu1 %v8011_v8  ;;  %v8045_v40 = vld [vmem:[#allocation2 + $0x228] ss:$16 sps:$4 sm:$0xff]   ;;  %v8050_v8 = vld [vmem:[#allocation2 + $0xc] ss:$16 sps:$4 sm:$0xff]  }
 0x1cf   :  { %v5027_v21 = vpop.f32.mrf.mxu0  ;;  %5272 = vmatmul.mubr.bf16.vlgmr.msra.gmra.mxu0 %v9071_v14 }
 0x1d0   :  { %v5068_v28 = vpop.f32.mrf.mxu1  ;;  %5313 = vmatmul.mubr.bf16.vlgmr.msra.gmra.mxu1 %v9075_v15  ;;  %v5028_v60 = vadd.f32 %v5027_v21, %v9062_v27  ;;  %5322 = vmatpush1.bf16.msra.mxu0 %v8006_v11  ;;  %v8053_v11 = vld [vmem:[#allocation2 + $0x20c] ss:$16 sps:$4 sm:$0xff]   ;;  %v8057_v21 = vld [vmem:[#allocation2 + $0x3e8] ss:$16 sps:$4 sm:$0xff]  }
 0x1d1   :  { %5363 = vmatpush1.bf16.msra.mxu1 %v8009_v12  ;;  %v5029_v61 = vpop.f32.mrf.mxu0  ;;  %5323 = vmatprep.subr.bf16.mxu0 %v8014_v3  ;;  %v8048_v12 = vld [vmem:[#allocation2 + $0x8] ss:$16 sps:$4 sm:$0xff]  }
 0x1d2   :  { %v5070_v29 = vpop.f32.mrf.mxu1  ;;  %5364 = vmatprep.subr.bf16.mxu1 %v8017_v18  ;;  %v9080_v26 = vadd.f32 %v5068_v28, %v5028_v60  ;;  %v5030_v34 = vadd.f32 %v5029_v61, %v9067_v33  ;;  %5353 = vmatprep.mubr.bf16.mxu0 %v8896_v47  ;;  %v8024_v33 = vld [vmem:[#allocation2 + $0x88] ss:$16 sps:$4 sm:$0xff]   ;;  %v8032_v47 = vld [vmem:[#allocation2 + $0x6c] ss:$16 sps:$4 sm:$0xff]  }
 0x1d3   :  { %5394 = vmatprep.mubr.bf16.mxu1 %v8901_v51  ;;  %v5031_v43 = vpop.f32.mrf.mxu0  ;;  %v8035_v51 = vld [vmem:[#allocation2 + $0x26c] ss:$16 sps:$4 sm:$0xff]   ;;  %v8051_v3 = vld [vmem:[#allocation2 + $0x208] ss:$16 sps:$4 sm:$0xff]  }
 0x1d4   :  { %v5072_v27 = vpop.f32.mrf.mxu1  ;;  %v9085_v31 = vadd.f32 %v5070_v29, %v5030_v34  ;;  %5324 = vmatpush1.bf16.msra.mxu0 %v8012_v19  ;;  %v8056_v18 = vld [vmem:[#allocation2 + $0x1ec] ss:$16 sps:$4 sm:$0xff]   ;;  %v8060_v61 = vld [vmem:[#allocation2 + $0x1c8] ss:$16 sps:$4 sm:$0xff]  }
 0x1d5   :  { %5365 = vmatpush1.bf16.msra.mxu1 %v8015_v20  ;;  %v5032_v44 = vpop.f32.mrf.mxu0  ;;  %5325 = vmatprep.subr.bf16.mxu0 %v8020_v30  ;;  %v8059_v19 = vld [vmem:[#allocation2 + $0x3ec] ss:$16 sps:$4 sm:$0xff]   ;;  %v8054_v20 = vld [vmem:[#allocation2 + $0x1e8] ss:$16 sps:$4 sm:$0xff]  }
 0x1d6   :  { %v5073_v45 = vpop.f32.mrf.mxu1  ;;  %5366 = vmatprep.subr.bf16.mxu1 %v8023_v32  ;;  %v8062_v28 = vld [vmem:[#allocation2 + $0x1cc] ss:$16 sps:$4 sm:$0xff]   ;;  %v8063_v29 = vld [vmem:[#allocation2 + $0x3c8] ss:$16 sps:$4 sm:$0xff]  }
 0x1d7   :  { %v8065_v60 = vld [vmem:[#allocation2 + $0x3cc] ss:$16 sps:$4 sm:$0xff]   ;;  %v8066_v34 = vld [vmem:[#allocation2 + $0x1a8] ss:$16 sps:$4 sm:$0xff]  }
 0x1d8   :  { %5326 = vmatpush1.bf16.msra.mxu0 %v8018_v41  ;;  %v8068_v30 = vld [vmem:[#allocation2 + $0x1ac] ss:$16 sps:$4 sm:$0xff]   ;;  %v8069_v41 = vld [vmem:[#allocation2 + $0x3a8] ss:$16 sps:$4 sm:$0xff]  }
 0x1d9   :  { %5367 = vmatpush1.bf16.msra.mxu1 %v8021_v42  ;;  %5327 = vmatprep.subr.bf16.mxu0 %v8026_v46  ;;  %v8071_v32 = vld [vmem:[#allocation2 + $0x3ac] ss:$16 sps:$4 sm:$0xff]   ;;  %v8072_v27 = vld [vmem:[#allocation2 + $0x188] ss:$16 sps:$4 sm:$0xff]  }
 0x1da   :  { %5368 = vmatprep.subr.bf16.mxu1 %v8029_v48  ;;  %v8074_v42 = vld [vmem:[#allocation2 + $0x18c] ss:$16 sps:$4 sm:$0xff]   ;;  %v8075_v44 = vld [vmem:[#allocation2 + $0x388] ss:$16 sps:$4 sm:$0xff]  }
 0x1db   :  { %v8077_v43 = vld [vmem:[#allocation2 + $0x38c] ss:$16 sps:$4 sm:$0xff]   ;;  %v8078_v48 = vld [vmem:[#allocation2 + $0x168] ss:$16 sps:$4 sm:$0xff]  }
 0x1dc   :  { %5328 = vmatpush1.bf16.msra.mxu0 %v8024_v33  ;;  %v8080_v45 = vld [vmem:[#allocation2 + $0x16c] ss:$16 sps:$4 sm:$0xff]   ;;  %v8081_v33 = vld [vmem:[#allocation2 + $0x368] ss:$16 sps:$4 sm:$0xff]  }
 0x1dd   :  { %5369 = vmatpush1.bf16.msra.mxu1 %v8027_v49  ;;  %5329 = vmatprep.subr.bf16.mxu0 %v8032_v47  ;;  %v8083_v46 = vld [vmem:[#allocation2 + $0x36c] ss:$16 sps:$4 sm:$0xff]  }
 0x1de   :  { %5370 = vmatprep.subr.bf16.mxu1 %v8035_v51  ;;  %v8086_v49 = vld [vmem:[#allocation2 + $0x14c] ss:$16 sps:$4 sm:$0xff]   ;;  %v8084_v51 = vld [vmem:[#allocation2 + $0x148] ss:$16 sps:$4 sm:$0xff]  }
 0x1df   :  { %v8089_v47 = vld [vmem:[#allocation2 + $0x34c] ss:$16 sps:$4 sm:$0xff]  }
 0x1e0   :  { %5330 = vmatpush1.bf16.msra.mxu0 %v8030_v50  ;;  %v8087_v50 = vld [vmem:[#allocation2 + $0x348] ss:$16 sps:$4 sm:$0xff]  }
 0x1e1   :  { %5371 = vmatpush1.bf16.msra.mxu1 %v8033_v52  ;;  %5331 = vmatprep.subr.bf16.mxu0 %v8038_v53  ;;  %v8092_v52 = vld [vmem:[#allocation2 + $0x12c] ss:$16 sps:$4 sm:$0xff]  }
 0x1e2   :  { %5372 = vmatprep.subr.bf16.mxu1 %v8041_v55  ;;  %v8095_v53 = vld [vmem:[#allocation2 + $0x32c] ss:$16 sps:$4 sm:$0xff]   ;;  %v8090_v55 = vld [vmem:[#allocation2 + $0x128] ss:$16 sps:$4 sm:$0xff]  }
 0x1e4   :  { %5332 = vmatpush1.bf16.msra.mxu0 %v8036_v56  ;;  %v8093_v56 = vld [vmem:[#allocation2 + $0x328] ss:$16 sps:$4 sm:$0xff]  }
 0x1e5   :  { %5373 = vmatpush1.bf16.msra.mxu1 %v8039_v57  ;;  %5333 = vmatprep.subr.bf16.mxu0 %v8044_v58  ;;  %v8098_v57 = vld [vmem:[#allocation2 + $0x10c] ss:$16 sps:$4 sm:$0xff]  }
 0x1e6   :  { %5374 = vmatprep.subr.bf16.mxu1 %v8047_v62  ;;  %v8101_v58 = vld [vmem:[#allocation2 + $0x30c] ss:$16 sps:$4 sm:$0xff]   ;;  %v8096_v62 = vld [vmem:[#allocation2 + $0x108] ss:$16 sps:$4 sm:$0xff]  }
 0x1e8   :  { %5334 = vmatpush1.bf16.msra.mxu0 %v8042_v35  ;;  %v8099_v35 = vld [vmem:[#allocation2 + $0x308] ss:$16 sps:$4 sm:$0xff]  }
 0x1e9   :  { %5375 = vmatpush1.bf16.msra.mxu1 %v8045_v40  ;;  %5335 = vmatprep.subr.bf16.mxu0 %v8050_v8  ;;  %v8104_v40 = vld [vmem:[#allocation2 + $0x4ec] ss:$16 sps:$4 sm:$0xff]  }
 0x1ea   :  { %5376 = vmatprep.subr.bf16.mxu1 %v8053_v11  ;;  %v8107_v8 = vld [vmem:[#allocation2 + $0x6ec] ss:$16 sps:$4 sm:$0xff]   ;;  %v8102_v11 = vld [vmem:[#allocation2 + $0x4e8] ss:$16 sps:$4 sm:$0xff]  }
 0x1ec   :  { %5336 = vmatpush1.bf16.msra.mxu0 %v8048_v12  ;;  %v8105_v12 = vld [vmem:[#allocation2 + $0x6e8] ss:$16 sps:$4 sm:$0xff]  }
 0x1ed   :  { %5377 = vmatpush1.bf16.msra.mxu1 %v8051_v3  ;;  %5337 = vmatprep.subr.bf16.mxu0 %v8056_v18  ;;  %v8110_v3 = vld [vmem:[#allocation2 + $0x4cc] ss:$16 sps:$4 sm:$0xff]  }
 0x1ee   :  { %5378 = vmatprep.subr.bf16.mxu1 %v8059_v19  ;;  %v8113_v18 = vld [vmem:[#allocation2 + $0x6cc] ss:$16 sps:$4 sm:$0xff]   ;;  %v8108_v19 = vld [vmem:[#allocation2 + $0x4c8] ss:$16 sps:$4 sm:$0xff]  }
 0x1f0   :  { %5338 = vmatpush2.bf16.msra.mxu0 %v8054_v20  ;;  %v8111_v20 = vld [vmem:[#allocation2 + $0x6c8] ss:$16 sps:$4 sm:$0xff]  }
 0x1f1   :  { %5379 = vmatpush2.bf16.msra.mxu1 %v8057_v21  ;;  %5339 = vmatprep.subr.bf16.mxu0 %v8062_v28 }
 0x1f2   :  { %5380 = vmatprep.subr.bf16.mxu1 %v8065_v60 }
 0x1f4   :  { %5340 = vmatpush2.bf16.msra.mxu0 %v8060_v61 }
 0x1f5   :  { %5381 = vmatpush2.bf16.msra.mxu1 %v8063_v29  ;;  %5341 = vmatprep.subr.bf16.mxu0 %v8068_v30  ;;  %v8116_v30 = vld [vmem:[#allocation2 + $0x4ac] ss:$16 sps:$4 sm:$0xff]  }
 0x1f6   :  { %5382 = vmatprep.subr.bf16.mxu1 %v8071_v32  ;;  %v8119_v32 = vld [vmem:[#allocation2 + $0x6ac] ss:$16 sps:$4 sm:$0xff]  }
 0x1f8   :  { %5342 = vmatpush2.bf16.msra.mxu0 %v8066_v34 }
 0x1f9   :  { %5383 = vmatpush2.bf16.msra.mxu1 %v8069_v41  ;;  %5343 = vmatprep.subr.bf16.mxu0 %v8074_v42  ;;  %v8114_v42 = vld [vmem:[#allocation2 + $0x4a8] ss:$16 sps:$4 sm:$0xff]  }
 0x1fa   :  { %5384 = vmatprep.subr.bf16.mxu1 %v8077_v43  ;;  %v8117_v43 = vld [vmem:[#allocation2 + $0x6a8] ss:$16 sps:$4 sm:$0xff]  }
 0x1fc   :  { %5344 = vmatpush2.bf16.msra.mxu0 %v8072_v27 }
 0x1fd   :  { %5385 = vmatpush2.bf16.msra.mxu1 %v8075_v44  ;;  %5345 = vmatprep.subr.bf16.mxu0 %v8080_v45  ;;  %v8122_v45 = vld [vmem:[#allocation2 + $0x48c] ss:$16 sps:$4 sm:$0xff]  }
 0x1fe   :  { %5386 = vmatprep.subr.bf16.mxu1 %v8083_v46  ;;  %v8125_v46 = vld [vmem:[#allocation2 + $0x68c] ss:$16 sps:$4 sm:$0xff]  }
 0x200   :  { %5346 = vmatpush2.bf16.msra.mxu0 %v8078_v48  ;;  %v8123_v48 = vld [vmem:[#allocation2 + $0x688] ss:$16 sps:$4 sm:$0xff]  }
 0x201   :  { %5387 = vmatpush2.bf16.msra.mxu1 %v8081_v33  ;;  %5347 = vmatprep.subr.bf16.mxu0 %v8086_v49  ;;  %v8126_v33 = vld [vmem:[#allocation2 + $0x468] ss:$16 sps:$4 sm:$0xff]  }
 0x202   :  { %5388 = vmatprep.subr.bf16.mxu1 %v8089_v47  ;;  %v8129_v49 = vld [vmem:[#allocation2 + $0x668] ss:$16 sps:$4 sm:$0xff]   ;;  %v8134_v47 = vld [vmem:[#allocation2 + $0x44c] ss:$16 sps:$4 sm:$0xff]  }
 0x204   :  { %5348 = vmatpush2.bf16.msra.mxu0 %v8084_v51  ;;  %v8137_v51 = vld [vmem:[#allocation2 + $0x64c] ss:$16 sps:$4 sm:$0xff]  }
 0x205   :  { %5389 = vmatpush2.bf16.msra.mxu1 %v8087_v50  ;;  %5349 = vmatprep.subr.bf16.mxu0 %v8092_v52  ;;  %v8132_v50 = vld [vmem:[#allocation2 + $0x448] ss:$16 sps:$4 sm:$0xff]  }
 0x206   :  { %5390 = vmatprep.subr.bf16.mxu1 %v8095_v53  ;;  %v8135_v52 = vld [vmem:[#allocation2 + $0x648] ss:$16 sps:$4 sm:$0xff]   ;;  %v8140_v53 = vld [vmem:[#allocation2 + $0x42c] ss:$16 sps:$4 sm:$0xff]  }
 0x208   :  { %5350 = vmatpush2.bf16.msra.mxu0 %v8090_v55  ;;  %v8143_v55 = vld [vmem:[#allocation2 + $0x62c] ss:$16 sps:$4 sm:$0xff]  }
 0x209   :  { %5391 = vmatpush2.bf16.msra.mxu1 %v8093_v56  ;;  %5351 = vmatprep.subr.bf16.mxu0 %v8098_v57  ;;  %v8138_v56 = vld [vmem:[#allocation2 + $0x428] ss:$16 sps:$4 sm:$0xff]  }
 0x20a   :  { %5392 = vmatprep.subr.bf16.mxu1 %v8101_v58  ;;  %v8141_v57 = vld [vmem:[#allocation2 + $0x628] ss:$16 sps:$4 sm:$0xff]   ;;  %v8146_v58 = vld [vmem:[#allocation2 + $0x40c] ss:$16 sps:$4 sm:$0xff]  }
 0x20c   :  { %5352 = vmatpush2.bf16.msra.mxu0 %v8096_v62  ;;  %v8149_v62 = vld [vmem:[#allocation2 + $0x60c] ss:$16 sps:$4 sm:$0xff]  }
 0x20d   :  { %5393 = vmatpush2.bf16.msra.mxu1 %v8099_v35  ;;  %5403 = vmatprep.subr.bf16.mxu0 %v8104_v40  ;;  %v8144_v35 = vld [vmem:[#allocation2 + $0x408] ss:$16 sps:$4 sm:$0xff]  }
 0x20e   :  { %5444 = vmatprep.subr.bf16.mxu1 %v8107_v8  ;;  %v8147_v40 = vld [vmem:[#allocation2 + $0x608] ss:$16 sps:$4 sm:$0xff]   ;;  %v8152_v8 = vld [vmem:[#allocation2 + $0x5ec] ss:$16 sps:$4 sm:$0xff]  }
 0x20f   :  { %v5109_v21 = vpop.f32.mrf.mxu0  ;;  %5354 = vmatmul.mubr.bf16.vlgmr.msra.gmra.mxu0 %v8905_v6 }
 0x210   :  { %v5150_v28 = vpop.f32.mrf.mxu1  ;;  %5395 = vmatmul.mubr.bf16.vlgmr.msra.gmra.mxu1 %v8907_v7  ;;  %v5110_v60 = vadd.f32 %v5109_v21, %v9080_v26  ;;  %5404 = vmatpush1.bf16.msra.mxu0 %v8102_v11  ;;  %v8155_v11 = vld [vmem:[#allocation2 + $0x7ec] ss:$16 sps:$4 sm:$0xff]   ;;  %v8159_v21 = vld [vmem:[#allocation2 + $0x7c8] ss:$16 sps:$4 sm:$0xff]  }
 0x211   :  { %5445 = vmatpush1.bf16.msra.mxu1 %v8105_v12  ;;  %v5111_v61 = vpop.f32.mrf.mxu0  ;;  %5405 = vmatprep.subr.bf16.mxu0 %v8110_v3  ;;  %v8150_v12 = vld [vmem:[#allocation2 + $0x5e8] ss:$16 sps:$4 sm:$0xff]  }
 0x212   :  { %v5152_v29 = vpop.f32.mrf.mxu1  ;;  %5446 = vmatprep.subr.bf16.mxu1 %v8113_v18  ;;  %v9090_v34 = vadd.f32 %v5150_v28, %v5110_v60  ;;  %v5112_v41 = vadd.f32 %v5111_v61, %v9085_v31  ;;  %5435 = vmatprep.mubr.bf16.mxu0 %v8923_v36  ;;  %v8120_v31 = vld [vmem:[#allocation2 + $0x488] ss:$16 sps:$4 sm:$0xff]   ;;  %v8128_v36 = vld [vmem:[#allocation2 + $0x46c] ss:$16 sps:$4 sm:$0xff]  }
 0x213   :  { %5476 = vmatprep.mubr.bf16.mxu1 %v8927_v37  ;;  %v5113_v6 = vpop.f32.mrf.mxu0  ;;  %v8131_v37 = vld [vmem:[#allocation2 + $0x66c] ss:$16 sps:$4 sm:$0xff]   ;;  %v8153_v3 = vld [vmem:[#allocation2 + $0x7e8] ss:$16 sps:$4 sm:$0xff]  }
 0x214   :  { %v5154_v7 = vpop.f32.mrf.mxu1  ;;  %v9095_v26 = vadd.f32 %v5152_v29, %v5112_v41  ;;  %5406 = vmatpush1.bf16.msra.mxu0 %v8108_v19  ;;  %v8158_v18 = vld [vmem:[#allocation2 + $0x5cc] ss:$16 sps:$4 sm:$0xff]   ;;  %v8162_v61 = vld [vmem:[#allocation2 + $0x5a8] ss:$16 sps:$4 sm:$0xff]  }
 0x215   :  { %5447 = vmatpush1.bf16.msra.mxu1 %v8111_v20  ;;  %v5114_v27 = vpop.f32.mrf.mxu0  ;;  %5407 = vmatprep.subr.bf16.mxu0 %v8116_v30  ;;  %v8161_v19 = vld [vmem:[#allocation2 + $0x7cc] ss:$16 sps:$4 sm:$0xff]   ;;  %v8156_v20 = vld [vmem:[#allocation2 + $0x5c8] ss:$16 sps:$4 sm:$0xff]  }
 0x216   :  { %v5155_v44 = vpop.f32.mrf.mxu1  ;;  %5448 = vmatprep.subr.bf16.mxu1 %v8119_v32  ;;  %v8164_v28 = vld [vmem:[#allocation2 + $0x5ac] ss:$16 sps:$4 sm:$0xff]   ;;  %v8165_v29 = vld [vmem:[#allocation2 + $0x7a8] ss:$16 sps:$4 sm:$0xff]  }
 0x217   :  { %v8167_v60 = vld [vmem:[#allocation2 + $0x7ac] ss:$16 sps:$4 sm:$0xff]   ;;  %v8168_v41 = vld [vmem:[#allocation2 + $0x588] ss:$16 sps:$4 sm:$0xff]  }
 0x218   :  { %5408 = vmatpush1.bf16.msra.mxu0 %v8114_v42  ;;  %v8170_v30 = vld [vmem:[#allocation2 + $0x58c] ss:$16 sps:$4 sm:$0xff]   ;;  %v8171_v42 = vld [vmem:[#allocation2 + $0x788] ss:$16 sps:$4 sm:$0xff]  }
 0x219   :  { %5449 = vmatpush1.bf16.msra.mxu1 %v8117_v43  ;;  %5409 = vmatprep.subr.bf16.mxu0 %v8122_v45  ;;  %v8173_v32 = vld [vmem:[#allocation2 + $0x78c] ss:$16 sps:$4 sm:$0xff]   ;;  %v8174_v7 = vld [vmem:[#allocation2 + $0x568] ss:$16 sps:$4 sm:$0xff]  }
 0x21a   :  { %5450 = vmatprep.subr.bf16.mxu1 %v8125_v46  ;;  %v8176_v43 = vld [vmem:[#allocation2 + $0x56c] ss:$16 sps:$4 sm:$0xff]   ;;  %v8177_v27 = vld [vmem:[#allocation2 + $0x768] ss:$16 sps:$4 sm:$0xff]  }
 0x21b   :  { %v8179_v6 = vld [vmem:[#allocation2 + $0x76c] ss:$16 sps:$4 sm:$0xff]   ;;  %v8180_v46 = vld [vmem:[#allocation2 + $0x548] ss:$16 sps:$4 sm:$0xff]  }
 0x21c   :  { %5410 = vmatpush1.bf16.msra.mxu0 %v8120_v31  ;;  %v8182_v44 = vld [vmem:[#allocation2 + $0x54c] ss:$16 sps:$4 sm:$0xff]   ;;  %v8183_v31 = vld [vmem:[#allocation2 + $0x748] ss:$16 sps:$4 sm:$0xff]  }
 0x21d   :  { %5451 = vmatpush1.bf16.msra.mxu1 %v8123_v48  ;;  %5411 = vmatprep.subr.bf16.mxu0 %v8128_v36  ;;  %v8185_v45 = vld [vmem:[#allocation2 + $0x74c] ss:$16 sps:$4 sm:$0xff]  }
 0x21e   :  { %5452 = vmatprep.subr.bf16.mxu1 %v8131_v37  ;;  %v8188_v48 = vld [vmem:[#allocation2 + $0x52c] ss:$16 sps:$4 sm:$0xff]   ;;  %v8186_v37 = vld [vmem:[#allocation2 + $0x528] ss:$16 sps:$4 sm:$0xff]  }
 0x21f   :  { %v8191_v36 = vld [vmem:[#allocation2 + $0x72c] ss:$16 sps:$4 sm:$0xff]  }
 0x220   :  { %5412 = vmatpush1.bf16.msra.mxu0 %v8126_v33  ;;  %v8189_v33 = vld [vmem:[#allocation2 + $0x728] ss:$16 sps:$4 sm:$0xff]  }
 0x221   :  { %5453 = vmatpush1.bf16.msra.mxu1 %v8129_v49  ;;  %5413 = vmatprep.subr.bf16.mxu0 %v8134_v47  ;;  %v8194_v49 = vld [vmem:[#allocation2 + $0x50c] ss:$16 sps:$4 sm:$0xff]  }
 0x222   :  { %5454 = vmatprep.subr.bf16.mxu1 %v8137_v51  ;;  %v8197_v47 = vld [vmem:[#allocation2 + $0x70c] ss:$16 sps:$4 sm:$0xff]   ;;  %v8192_v51 = vld [vmem:[#allocation2 + $0x508] ss:$16 sps:$4 sm:$0xff]  }
 0x224   :  { %5414 = vmatpush1.bf16.msra.mxu0 %v8132_v50  ;;  %v8195_v50 = vld [vmem:[#allocation2 + $0x708] ss:$16 sps:$4 sm:$0xff]  }
 0x225   :  { %5455 = vmatpush1.bf16.msra.mxu1 %v8135_v52  ;;  %5415 = vmatprep.subr.bf16.mxu0 %v8140_v53  ;;  %v8200_v52 = vld [vmem:[#allocation2 + $0x8ec] ss:$16 sps:$4 sm:$0xff]  }
 0x226   :  { %5456 = vmatprep.subr.bf16.mxu1 %v8143_v55  ;;  %v8203_v53 = vld [vmem:[#allocation2 + $0xaec] ss:$16 sps:$4 sm:$0xff]   ;;  %v8198_v55 = vld [vmem:[#allocation2 + $0x8e8] ss:$16 sps:$4 sm:$0xff]  }
 0x228   :  { %5416 = vmatpush1.bf16.msra.mxu0 %v8138_v56  ;;  %v8201_v56 = vld [vmem:[#allocation2 + $0xae8] ss:$16 sps:$4 sm:$0xff]  }
 0x229   :  { %5457 = vmatpush1.bf16.msra.mxu1 %v8141_v57  ;;  %5417 = vmatprep.subr.bf16.mxu0 %v8146_v58  ;;  %v8206_v57 = vld [vmem:[#allocation2 + $0x8cc] ss:$16 sps:$4 sm:$0xff]  }
 0x22a   :  { %5458 = vmatprep.subr.bf16.mxu1 %v8149_v62  ;;  %v8209_v58 = vld [vmem:[#allocation2 + $0xacc] ss:$16 sps:$4 sm:$0xff]  }
 0x22c   :  { %5418 = vmatpush1.bf16.msra.mxu0 %v8144_v35 }
 0x22d   :  { %5459 = vmatpush1.bf16.msra.mxu1 %v8147_v40  ;;  %5419 = vmatprep.subr.bf16.mxu0 %v8152_v8  ;;  %v8204_v8 = vld [vmem:[#allocation2 + $0x8c8] ss:$16 sps:$4 sm:$0xff]  }
 0x22e   :  { %5460 = vmatprep.subr.bf16.mxu1 %v8155_v11  ;;  %v8207_v11 = vld [vmem:[#allocation2 + $0xac8] ss:$16 sps:$4 sm:$0xff]  }
 0x230   :  { %5420 = vmatpush2.bf16.msra.mxu0 %v8150_v12 }
 0x231   :  { %5461 = vmatpush2.bf16.msra.mxu1 %v8153_v3  ;;  %5421 = vmatprep.subr.bf16.mxu0 %v8158_v18  ;;  %v8212_v18 = vld [vmem:[#allocation2 + $0x8ac] ss:$16 sps:$4 sm:$0xff]  }
 0x232   :  { %5462 = vmatprep.subr.bf16.mxu1 %v8161_v19  ;;  %v8215_v19 = vld [vmem:[#allocation2 + $0xaac] ss:$16 sps:$4 sm:$0xff]  }
 0x234   :  { %5422 = vmatpush2.bf16.msra.mxu0 %v8156_v20 }
 0x235   :  { %5463 = vmatpush2.bf16.msra.mxu1 %v8159_v21  ;;  %5423 = vmatprep.subr.bf16.mxu0 %v8164_v28  ;;  %v8210_v28 = vld [vmem:[#allocation2 + $0x8a8] ss:$16 sps:$4 sm:$0xff]  }
 0x236   :  { %5464 = vmatprep.subr.bf16.mxu1 %v8167_v60  ;;  %v8213_v60 = vld [vmem:[#allocation2 + $0xaa8] ss:$16 sps:$4 sm:$0xff]  }
 0x238   :  { %5424 = vmatpush2.bf16.msra.mxu0 %v8162_v61 }
 0x239   :  { %5465 = vmatpush2.bf16.msra.mxu1 %v8165_v29  ;;  %5425 = vmatprep.subr.bf16.mxu0 %v8170_v30  ;;  %v8218_v30 = vld [vmem:[#allocation2 + $0x88c] ss:$16 sps:$4 sm:$0xff]  }
 0x23a   :  { %5466 = vmatprep.subr.bf16.mxu1 %v8173_v32  ;;  %v8221_v32 = vld [vmem:[#allocation2 + $0xa8c] ss:$16 sps:$4 sm:$0xff]  }
 0x23c   :  { %5426 = vmatpush2.bf16.msra.mxu0 %v8168_v41  ;;  %v8227_v41 = vld [vmem:[#allocation2 + $0xa6c] ss:$16 sps:$4 sm:$0xff]  }
 0x23d   :  { %5467 = vmatpush2.bf16.msra.mxu1 %v8171_v42  ;;  %5427 = vmatprep.subr.bf16.mxu0 %v8176_v43  ;;  %v8222_v42 = vld [vmem:[#allocation2 + $0x868] ss:$16 sps:$4 sm:$0xff]  }
 0x23e   :  { %5468 = vmatprep.subr.bf16.mxu1 %v8179_v6  ;;  %v8225_v43 = vld [vmem:[#allocation2 + $0xa68] ss:$16 sps:$4 sm:$0xff]   ;;  %v8230_v6 = vld [vmem:[#allocation2 + $0x84c] ss:$16 sps:$4 sm:$0xff]  }
 0x240   :  { %5428 = vmatpush2.bf16.msra.mxu0 %v8174_v7  ;;  %v8233_v7 = vld [vmem:[#allocation2 + $0xa4c] ss:$16 sps:$4 sm:$0xff]  }
 0x241   :  { %5469 = vmatpush2.bf16.msra.mxu1 %v8177_v27  ;;  %5429 = vmatprep.subr.bf16.mxu0 %v8182_v44  ;;  %v8228_v27 = vld [vmem:[#allocation2 + $0x848] ss:$16 sps:$4 sm:$0xff]  }
 0x242   :  { %5470 = vmatprep.subr.bf16.mxu1 %v8185_v45  ;;  %v8231_v44 = vld [vmem:[#allocation2 + $0xa48] ss:$16 sps:$4 sm:$0xff]   ;;  %v8236_v45 = vld [vmem:[#allocation2 + $0x82c] ss:$16 sps:$4 sm:$0xff]  }
 0x244   :  { %5430 = vmatpush2.bf16.msra.mxu0 %v8180_v46  ;;  %v8239_v46 = vld [vmem:[#allocation2 + $0xa2c] ss:$16 sps:$4 sm:$0xff]  }
 0x245   :  { %5471 = vmatpush2.bf16.msra.mxu1 %v8183_v31  ;;  %5431 = vmatprep.subr.bf16.mxu0 %v8188_v48  ;;  %v8234_v31 = vld [vmem:[#allocation2 + $0x828] ss:$16 sps:$4 sm:$0xff]  }
 0x246   :  { %5472 = vmatprep.subr.bf16.mxu1 %v8191_v36  ;;  %v8237_v48 = vld [vmem:[#allocation2 + $0xa28] ss:$16 sps:$4 sm:$0xff]   ;;  %v8242_v36 = vld [vmem:[#allocation2 + $0x80c] ss:$16 sps:$4 sm:$0xff]  }
 0x248   :  { %5432 = vmatpush2.bf16.msra.mxu0 %v8186_v37  ;;  %v8245_v37 = vld [vmem:[#allocation2 + $0xa0c] ss:$16 sps:$4 sm:$0xff]  }
 0x249   :  { %5473 = vmatpush2.bf16.msra.mxu1 %v8189_v33  ;;  %5433 = vmatprep.subr.bf16.mxu0 %v8194_v49  ;;  %v8240_v33 = vld [vmem:[#allocation2 + $0x808] ss:$16 sps:$4 sm:$0xff]  }
 0x24a   :  { %5474 = vmatprep.subr.bf16.mxu1 %v8197_v47  ;;  %v8243_v49 = vld [vmem:[#allocation2 + $0xa08] ss:$16 sps:$4 sm:$0xff]   ;;  %v8248_v47 = vld [vmem:[#allocation2 + $0x9ec] ss:$16 sps:$4 sm:$0xff]  }
 0x24c   :  { %5434 = vmatpush2.bf16.msra.mxu0 %v8192_v51  ;;  %v8251_v51 = vld [vmem:[#allocation2 + $0xbec] ss:$16 sps:$4 sm:$0xff]  }
 0x24d   :  { %5475 = vmatpush2.bf16.msra.mxu1 %v8195_v50  ;;  %5485 = vmatprep.subr.bf16.mxu0 %v8200_v52  ;;  %v8246_v50 = vld [vmem:[#allocation2 + $0x9e8] ss:$16 sps:$4 sm:$0xff]  }
 0x24e   :  { %5526 = vmatprep.subr.bf16.mxu1 %v8203_v53  ;;  %v8249_v52 = vld [vmem:[#allocation2 + $0xbe8] ss:$16 sps:$4 sm:$0xff]   ;;  %v8254_v53 = vld [vmem:[#allocation2 + $0x9cc] ss:$16 sps:$4 sm:$0xff]  }
 0x24f   :  { %v5191_v62 = vpop.f32.mrf.mxu0  ;;  %5436 = vmatmul.mubr.bf16.vlgmr.msra.gmra.mxu0 %v8933_v16 }
 0x250   :  { %v5232_v35 = vpop.f32.mrf.mxu1  ;;  %5477 = vmatmul.mubr.bf16.vlgmr.msra.gmra.mxu1 %v8937_v17  ;;  %v5192_v40 = vadd.f32 %v5191_v62, %v9090_v34  ;;  %5486 = vmatpush1.bf16.msra.mxu0 %v8198_v55  ;;  %v8257_v55 = vld [vmem:[#allocation2 + $0xbcc] ss:$16 sps:$4 sm:$0xff]  }
 0x251   :  { %5527 = vmatpush1.bf16.msra.mxu1 %v8201_v56  ;;  %v5193_v12 = vpop.f32.mrf.mxu0  ;;  %5487 = vmatprep.subr.bf16.mxu0 %v8206_v57  ;;  %v8252_v56 = vld [vmem:[#allocation2 + $0x9c8] ss:$16 sps:$4 sm:$0xff]   ;;  %v8263_v62 = vld [vmem:[#allocation2 + $0xbac] ss:$16 sps:$4 sm:$0xff]  }
 0x252   :  { %v5234_v3 = vpop.f32.mrf.mxu1  ;;  %5528 = vmatprep.subr.bf16.mxu1 %v8209_v58  ;;  %v9100_v20 = vadd.f32 %v5232_v35, %v5192_v40  ;;  %v5194_v21 = vadd.f32 %v5193_v12, %v9095_v26  ;;  %5517 = vmatprep.mubr.bf16.mxu0 %v8951_v24  ;;  %v8216_v26 = vld [vmem:[#allocation2 + $0x888] ss:$16 sps:$4 sm:$0xff]   ;;  %v8260_v58 = vld [vmem:[#allocation2 + $0x9ac] ss:$16 sps:$4 sm:$0xff]  }
 0x253   :  { %5558 = vmatprep.mubr.bf16.mxu1 %v8955_v25  ;;  %v5195_v16 = vpop.f32.mrf.mxu0  ;;  %v8219_v24 = vld [vmem:[#allocation2 + $0xa88] ss:$16 sps:$4 sm:$0xff]   ;;  %v8224_v25 = vld [vmem:[#allocation2 + $0x86c] ss:$16 sps:$4 sm:$0xff]  }
 0x254   :  { %v5236_v17 = vpop.f32.mrf.mxu1  ;;  %v9105_v34 = vadd.f32 %v5234_v3, %v5194_v21  ;;  %5488 = vmatpush1.bf16.msra.mxu0 %v8204_v8  ;;  %v8255_v57 = vld [vmem:[#allocation2 + $0xbc8] ss:$16 sps:$4 sm:$0xff]   ;;  %v8266_v8 = vld [vmem:[#allocation2 + $0x98c] ss:$16 sps:$4 sm:$0xff]  }
 0x255   :  { %5529 = vmatpush1.bf16.msra.mxu1 %v8207_v11  ;;  %v5196_v61 = vpop.f32.mrf.mxu0  ;;  %5489 = vmatprep.subr.bf16.mxu0 %v8212_v18  ;;  %v8258_v35 = vld [vmem:[#allocation2 + $0x9a8] ss:$16 sps:$4 sm:$0xff]   ;;  %v8269_v11 = vld [vmem:[#allocation2 + $0xb8c] ss:$16 sps:$4 sm:$0xff]  }
 0x256   :  { %v5237_v29 = vpop.f32.mrf.mxu1  ;;  %5530 = vmatprep.subr.bf16.mxu1 %v8215_v19  ;;  %v8261_v40 = vld [vmem:[#allocation2 + $0xba8] ss:$16 sps:$4 sm:$0xff]   ;;  %v8272_v18 = vld [vmem:[#allocation2 + $0x96c] ss:$16 sps:$4 sm:$0xff]  }
 0x257   :  { %v8264_v12 = vld [vmem:[#allocation2 + $0x988] ss:$16 sps:$4 sm:$0xff]   ;;  %v8275_v19 = vld [vmem:[#allocation2 + $0xb6c] ss:$16 sps:$4 sm:$0xff]  }
 0x258   :  { %5490 = vmatpush1.bf16.msra.mxu0 %v8210_v28  ;;  %v8267_v3 = vld [vmem:[#allocation2 + $0xb88] ss:$16 sps:$4 sm:$0xff]   ;;  %v8278_v17 = vld [vmem:[#allocation2 + $0x94c] ss:$16 sps:$4 sm:$0xff]  }
 0x259   :  { %5531 = vmatpush1.bf16.msra.mxu1 %v8213_v60  ;;  %5491 = vmatprep.subr.bf16.mxu0 %v8218_v30  ;;  %v8270_v21 = vld [vmem:[#allocation2 + $0x968] ss:$16 sps:$4 sm:$0xff]   ;;  %v8281_v28 = vld [vmem:[#allocation2 + $0xb4c] ss:$16 sps:$4 sm:$0xff]  }
 0x25a   :  { %5532 = vmatprep.subr.bf16.mxu1 %v8221_v32  ;;  %v8273_v16 = vld [vmem:[#allocation2 + $0xb68] ss:$16 sps:$4 sm:$0xff]   ;;  %v8284_v29 = vld [vmem:[#allocation2 + $0x92c] ss:$16 sps:$4 sm:$0xff]  }
 0x25b   :  { %v8276_v60 = vld [vmem:[#allocation2 + $0x948] ss:$16 sps:$4 sm:$0xff]   ;;  %v8287_v30 = vld [vmem:[#allocation2 + $0xb2c] ss:$16 sps:$4 sm:$0xff]  }
 0x25c   :  { %5492 = vmatpush1.bf16.msra.mxu0 %v8216_v26  ;;  %v8279_v61 = vld [vmem:[#allocation2 + $0xb48] ss:$16 sps:$4 sm:$0xff]  }
 0x25d   :  { %5533 = vmatpush1.bf16.msra.mxu1 %v8219_v24  ;;  %5493 = vmatprep.subr.bf16.mxu0 %v8224_v25  ;;  %v8282_v32 = vld [vmem:[#allocation2 + $0x928] ss:$16 sps:$4 sm:$0xff]   ;;  %v8290_v24 = vld [vmem:[#allocation2 + $0x90c] ss:$16 sps:$4 sm:$0xff]  }
 0x25e   :  { %5534 = vmatprep.subr.bf16.mxu1 %v8227_v41  ;;  %v8285_v26 = vld [vmem:[#allocation2 + $0xb28] ss:$16 sps:$4 sm:$0xff]   ;;  %v8293_v25 = vld [vmem:[#allocation2 + $0xb0c] ss:$16 sps:$4 sm:$0xff]  }
 0x25f   :  { %v8288_v41 = vld [vmem:[#allocation2 + $0x908] ss:$16 sps:$4 sm:$0xff]  }
 0x260   :  { %5494 = vmatpush1.bf16.msra.mxu0 %v8222_v42  ;;  %v8291_v42 = vld [vmem:[#allocation2 + $0xb08] ss:$16 sps:$4 sm:$0xff]  }
 0x261   :  { %5535 = vmatpush1.bf16.msra.mxu1 %v8225_v43  ;;  %5495 = vmatprep.subr.bf16.mxu0 %v8230_v6  ;;  %v8296_v43 = vld [vmem:[#allocation2 + $0xcec] ss:$16 sps:$4 sm:$0xff]  }
 0x262   :  { %5536 = vmatprep.subr.bf16.mxu1 %v8233_v7  ;;  %v8299_v6 = vld [vmem:[#allocation2 + $0xeec] ss:$16 sps:$4 sm:$0xff]   ;;  %v8294_v7 = vld [vmem:[#allocation2 + $0xce8] ss:$16 sps:$4 sm:$0xff]  }
 0x264   :  { %5496 = vmatpush1.bf16.msra.mxu0 %v8228_v27  ;;  %v8297_v27 = vld [vmem:[#allocation2 + $0xee8] ss:$16 sps:$4 sm:$0xff]  }
 0x265   :  { %5537 = vmatpush1.bf16.msra.mxu1 %v8231_v44  ;;  %5497 = vmatprep.subr.bf16.mxu0 %v8236_v45  ;;  %v8302_v44 = vld [vmem:[#allocation2 + $0xccc] ss:$16 sps:$4 sm:$0xff]  }
 0x266   :  { %5538 = vmatprep.subr.bf16.mxu1 %v8239_v46  ;;  %v8305_v45 = vld [vmem:[#allocation2 + $0xecc] ss:$16 sps:$4 sm:$0xff]  }
 0x268   :  { %5498 = vmatpush1.bf16.msra.mxu0 %v8234_v31 }
 0x269   :  { %5539 = vmatpush1.bf16.msra.mxu1 %v8237_v48  ;;  %5499 = vmatprep.subr.bf16.mxu0 %v8242_v36  ;;  %v8300_v36 = vld [vmem:[#allocation2 + $0xcc8] ss:$16 sps:$4 sm:$0xff]  }
 0x26a   :  { %5540 = vmatprep.subr.bf16.mxu1 %v8245_v37  ;;  %v8303_v37 = vld [vmem:[#allocation2 + $0xec8] ss:$16 sps:$4 sm:$0xff]  }
 0x26c   :  { %5500 = vmatpush1.bf16.msra.mxu0 %v8240_v33 }
 0x26d   :  { %5541 = vmatpush1.bf16.msra.mxu1 %v8243_v49  ;;  %5501 = vmatprep.subr.bf16.mxu0 %v8248_v47  ;;  %v8308_v47 = vld [vmem:[#allocation2 + $0xcac] ss:$16 sps:$4 sm:$0xff]  }
 0x26e   :  { %5542 = vmatprep.subr.bf16.mxu1 %v8251_v51  ;;  %v8311_v51 = vld [vmem:[#allocation2 + $0xeac] ss:$16 sps:$4 sm:$0xff]  }
 0x270   :  { %5502 = vmatpush2.bf16.msra.mxu0 %v8246_v50 }
 0x271   :  { %5543 = vmatpush2.bf16.msra.mxu1 %v8249_v52  ;;  %5503 = vmatprep.subr.bf16.mxu0 %v8254_v53  ;;  %v8306_v53 = vld [vmem:[#allocation2 + $0xca8] ss:$16 sps:$4 sm:$0xff]  }
 0x272   :  { %5544 = vmatprep.subr.bf16.mxu1 %v8257_v55  ;;  %v8309_v55 = vld [vmem:[#allocation2 + $0xea8] ss:$16 sps:$4 sm:$0xff]  }
 0x274   :  { %5504 = vmatpush2.bf16.msra.mxu0 %v8252_v56 }
 0x275   :  { %5545 = vmatpush2.bf16.msra.mxu1 %v8255_v57  ;;  %5505 = vmatprep.subr.bf16.mxu0 %v8260_v58  ;;  %v8314_v58 = vld [vmem:[#allocation2 + $0xc8c] ss:$16 sps:$4 sm:$0xff]  }
 0x276   :  { %5546 = vmatprep.subr.bf16.mxu1 %v8263_v62  ;;  %v8317_v62 = vld [vmem:[#allocation2 + $0xe8c] ss:$16 sps:$4 sm:$0xff]  }
 0x278   :  { %5506 = vmatpush2.bf16.msra.mxu0 %v8258_v35  ;;  %v8323_v35 = vld [vmem:[#allocation2 + $0xe6c] ss:$16 sps:$4 sm:$0xff]  }
 0x279   :  { %5547 = vmatpush2.bf16.msra.mxu1 %v8261_v40  ;;  %5507 = vmatprep.subr.bf16.mxu0 %v8266_v8  ;;  %v8318_v40 = vld [vmem:[#allocation2 + $0xc68] ss:$16 sps:$4 sm:$0xff]  }
 0x27a   :  { %5548 = vmatprep.subr.bf16.mxu1 %v8269_v11  ;;  %v8321_v8 = vld [vmem:[#allocation2 + $0xe68] ss:$16 sps:$4 sm:$0xff]   ;;  %v8326_v11 = vld [vmem:[#allocation2 + $0xc4c] ss:$16 sps:$4 sm:$0xff]  }
 0x27c   :  { %5508 = vmatpush2.bf16.msra.mxu0 %v8264_v12  ;;  %v8329_v12 = vld [vmem:[#allocation2 + $0xe4c] ss:$16 sps:$4 sm:$0xff]  }
 0x27d   :  { %5549 = vmatpush2.bf16.msra.mxu1 %v8267_v3  ;;  %5509 = vmatprep.subr.bf16.mxu0 %v8272_v18  ;;  %v8324_v3 = vld [vmem:[#allocation2 + $0xc48] ss:$16 sps:$4 sm:$0xff]  }
 0x27e   :  { %5550 = vmatprep.subr.bf16.mxu1 %v8275_v19  ;;  %v8327_v18 = vld [vmem:[#allocation2 + $0xe48] ss:$16 sps:$4 sm:$0xff]   ;;  %v8332_v19 = vld [vmem:[#allocation2 + $0xc2c] ss:$16 sps:$4 sm:$0xff]  }
 0x280   :  { %5510 = vmatpush2.bf16.msra.mxu0 %v8270_v21  ;;  %v8335_v21 = vld [vmem:[#allocation2 + $0xe2c] ss:$16 sps:$4 sm:$0xff]  }
 0x281   :  { %5551 = vmatpush2.bf16.msra.mxu1 %v8273_v16  ;;  %5511 = vmatprep.subr.bf16.mxu0 %v8278_v17  ;;  %v8330_v16 = vld [vmem:[#allocation2 + $0xc28] ss:$16 sps:$4 sm:$0xff]  }
 0x282   :  { %5552 = vmatprep.subr.bf16.mxu1 %v8281_v28  ;;  %v8333_v17 = vld [vmem:[#allocation2 + $0xe28] ss:$16 sps:$4 sm:$0xff]   ;;  %v8338_v28 = vld [vmem:[#allocation2 + $0xc0c] ss:$16 sps:$4 sm:$0xff]  }
 0x284   :  { %5512 = vmatpush2.bf16.msra.mxu0 %v8276_v60  ;;  %v8341_v60 = vld [vmem:[#allocation2 + $0xe0c] ss:$16 sps:$4 sm:$0xff]  }
 0x285   :  { %5553 = vmatpush2.bf16.msra.mxu1 %v8279_v61  ;;  %5513 = vmatprep.subr.bf16.mxu0 %v8284_v29  ;;  %v8336_v61 = vld [vmem:[#allocation2 + $0xc08] ss:$16 sps:$4 sm:$0xff]  }
 0x286   :  { %5554 = vmatprep.subr.bf16.mxu1 %v8287_v30  ;;  %v8339_v29 = vld [vmem:[#allocation2 + $0xe08] ss:$16 sps:$4 sm:$0xff]   ;;  %v8344_v30 = vld [vmem:[#allocation2 + $0xdec] ss:$16 sps:$4 sm:$0xff]  }
 0x288   :  { %5514 = vmatpush2.bf16.msra.mxu0 %v8282_v32  ;;  %v8347_v32 = vld [vmem:[#allocation2 + $0xfec] ss:$16 sps:$4 sm:$0xff]  }
 0x289   :  { %5555 = vmatpush2.bf16.msra.mxu1 %v8285_v26  ;;  %5515 = vmatprep.subr.bf16.mxu0 %v8290_v24  ;;  %v8342_v26 = vld [vmem:[#allocation2 + $0xde8] ss:$16 sps:$4 sm:$0xff]  }
 0x28a   :  { %5556 = vmatprep.subr.bf16.mxu1 %v8293_v25  ;;  %v8345_v24 = vld [vmem:[#allocation2 + $0xfe8] ss:$16 sps:$4 sm:$0xff]   ;;  %v8350_v25 = vld [vmem:[#allocation2 + $0xdcc] ss:$16 sps:$4 sm:$0xff]  }
 0x28c   :  { %5516 = vmatpush2.bf16.msra.mxu0 %v8288_v41  ;;  %v8353_v41 = vld [vmem:[#allocation2 + $0xfcc] ss:$16 sps:$4 sm:$0xff]  }
 0x28d   :  { %5557 = vmatpush2.bf16.msra.mxu1 %v8291_v42  ;;  %5567 = vmatprep.subr.bf16.mxu0 %v8296_v43  ;;  %v8348_v42 = vld [vmem:[#allocation2 + $0xdc8] ss:$16 sps:$4 sm:$0xff]  }
 0x28e   :  { %5608 = vmatprep.subr.bf16.mxu1 %v8299_v6  ;;  %v8351_v43 = vld [vmem:[#allocation2 + $0xfc8] ss:$16 sps:$4 sm:$0xff]   ;;  %v8356_v6 = vld [vmem:[#allocation2 + $0xdac] ss:$16 sps:$4 sm:$0xff]  }
 0x28f   :  { %v5273_v46 = vpop.f32.mrf.mxu0  ;;  %5518 = vmatmul.mubr.bf16.vlgmr.msra.gmra.mxu0 %v8968_v38 }
 0x290   :  { %v5314_v31 = vpop.f32.mrf.mxu1  ;;  %5559 = vmatmul.mubr.bf16.vlgmr.msra.gmra.mxu1 %v8972_v39  ;;  %v5274_v48 = vadd.f32 %v5273_v46, %v9100_v20  ;;  %5568 = vmatpush1.bf16.msra.mxu0 %v8294_v7  ;;  %v8359_v7 = vld [vmem:[#allocation2 + $0xfac] ss:$16 sps:$4 sm:$0xff]  }
 0x291   :  { %5609 = vmatpush1.bf16.msra.mxu1 %v8297_v27  ;;  %v5275_v33 = vpop.f32.mrf.mxu0  ;;  %5569 = vmatprep.subr.bf16.mxu0 %v8302_v44  ;;  %v8354_v27 = vld [vmem:[#allocation2 + $0xda8] ss:$16 sps:$4 sm:$0xff]   ;;  %v8365_v46 = vld [vmem:[#allocation2 + $0xf8c] ss:$16 sps:$4 sm:$0xff]  }
 0x292   :  { %v5316_v49 = vpop.f32.mrf.mxu1  ;;  %5610 = vmatprep.subr.bf16.mxu1 %v8305_v45  ;;  %v9110_v50 = vadd.f32 %v5314_v31, %v5274_v48  ;;  %v5276_v52 = vadd.f32 %v5275_v33, %v9105_v34  ;;  %5599 = vmatprep.mubr.bf16.mxu0 %v8981_v22  ;;  %v8312_v34 = vld [vmem:[#allocation2 + $0xc88] ss:$16 sps:$4 sm:$0xff]   ;;  %v8362_v45 = vld [vmem:[#allocation2 + $0xd8c] ss:$16 sps:$4 sm:$0xff]  }
 0x293   :  { %5640 = vmatprep.mubr.bf16.mxu1 %v8985_v23  ;;  %v5277_v38 = vpop.f32.mrf.mxu0  ;;  %v8315_v22 = vld [vmem:[#allocation2 + $0xe88] ss:$16 sps:$4 sm:$0xff]   ;;  %v8320_v23 = vld [vmem:[#allocation2 + $0xc6c] ss:$16 sps:$4 sm:$0xff]  }
 0x294   :  { %v5318_v39 = vpop.f32.mrf.mxu1  ;;  %v9115_v20 = vadd.f32 %v5316_v49, %v5276_v52  ;;  %5570 = vmatpush1.bf16.msra.mxu0 %v8300_v36  ;;  %v8357_v44 = vld [vmem:[#allocation2 + $0xfa8] ss:$16 sps:$4 sm:$0xff]   ;;  %v8368_v36 = vld [vmem:[#allocation2 + $0xd6c] ss:$16 sps:$4 sm:$0xff]   ;;  %vm5813_vm1 = vcmp.gt.f32.partialorder %v9110_v50, 0.0 }
 0x295   :  { %5611 = vmatpush1.bf16.msra.mxu1 %v8303_v37  ;;  %v5278_v56 = vpop.f32.mrf.mxu0  ;;  %5571 = vmatprep.subr.bf16.mxu0 %v8308_v47  ;;  %v8360_v31 = vld [vmem:[#allocation2 + $0xd88] ss:$16 sps:$4 sm:$0xff]   ;;  %v8371_v37 = vld [vmem:[#allocation2 + $0xf6c] ss:$16 sps:$4 sm:$0xff]  }
 0x296   :  { %v5319_v57 = vpop.f32.mrf.mxu1  ;;  %5612 = vmatprep.subr.bf16.mxu1 %v8311_v51  ;;  %v8363_v48 = vld [vmem:[#allocation2 + $0xf88] ss:$16 sps:$4 sm:$0xff]   ;;  %v8374_v47 = vld [vmem:[#allocation2 + $0xd4c] ss:$16 sps:$4 sm:$0xff]   ;;  %vm5814_vm0 = vcmp.gt.f32.partialorder %v9115_v20, 0.0 }
 0x297   :  { %v8366_v33 = vld [vmem:[#allocation2 + $0xd68] ss:$16 sps:$4 sm:$0xff]   ;;  %v8377_v51 = vld [vmem:[#allocation2 + $0xf4c] ss:$16 sps:$4 sm:$0xff]  }
 0x298   :  { %5572 = vmatpush1.bf16.msra.mxu0 %v8306_v53  ;;  %v8369_v49 = vld [vmem:[#allocation2 + $0xf68] ss:$16 sps:$4 sm:$0xff]   ;;  %v8380_v39 = vld [vmem:[#allocation2 + $0xd2c] ss:$16 sps:$4 sm:$0xff]  }
 0x299   :  { %5613 = vmatpush1.bf16.msra.mxu1 %v8309_v55  ;;  %5573 = vmatprep.subr.bf16.mxu0 %v8314_v58  ;;  %v8372_v52 = vld [vmem:[#allocation2 + $0xd48] ss:$16 sps:$4 sm:$0xff]   ;;  %v8383_v53 = vld [vmem:[#allocation2 + $0xf2c] ss:$16 sps:$4 sm:$0xff]  }
 0x29a   :  { %5614 = vmatprep.subr.bf16.mxu1 %v8317_v62  ;;  %v8375_v38 = vld [vmem:[#allocation2 + $0xf48] ss:$16 sps:$4 sm:$0xff]   ;;  %v8386_v57 = vld [vmem:[#allocation2 + $0xd0c] ss:$16 sps:$4 sm:$0xff]  }
 0x29b   :  { %v8378_v55 = vld [vmem:[#allocation2 + $0xd28] ss:$16 sps:$4 sm:$0xff]   ;;  %v8389_v58 = vld [vmem:[#allocation2 + $0xf0c] ss:$16 sps:$4 sm:$0xff]  }
 0x29c   :  { %5574 = vmatpush1.bf16.msra.mxu0 %v8312_v34  ;;  %v8381_v56 = vld [vmem:[#allocation2 + $0xf28] ss:$16 sps:$4 sm:$0xff]  }
 0x29d   :  { %5615 = vmatpush1.bf16.msra.mxu1 %v8315_v22  ;;  %5575 = vmatprep.subr.bf16.mxu0 %v8320_v23  ;;  %v8384_v62 = vld [vmem:[#allocation2 + $0xd08] ss:$16 sps:$4 sm:$0xff]   ;;  %v895_v22 = vsub.s32 2, %v8991_v54  ;;  %v8392_v23 = vld [vmem:[#allocation2 + $0x10ec] ss:$16 sps:$4 sm:$0xff]  }
 0x29e   :  { %5616 = vmatprep.subr.bf16.mxu1 %v8323_v35  ;;  %v8387_v34 = vld [vmem:[#allocation2 + $0xf08] ss:$16 sps:$4 sm:$0xff]   ;;  %v8395_v35 = vld [vmem:[#allocation2 + $0x12ec] ss:$16 sps:$4 sm:$0xff]  }
 0x2a0   :  { %5576 = vmatpush1.bf16.msra.mxu0 %v8318_v40  ;;  %v899_v40 = vsub.s32 3, %v8991_v54 }
 0x2a1   :  { %5617 = vmatpush1.bf16.msra.mxu1 %v8321_v8  ;;  %5577 = vmatprep.subr.bf16.mxu0 %v8326_v11  ;;  %v8694_v8 = vld [vmem:[#allocation4] sm:$0xf] }
 0x2a2   :  { %5618 = vmatprep.subr.bf16.mxu1 %v8329_v12  ;;  %v896_v11 = vrot.slane %v8694_v8, %v895_v22  ;;  %v8390_v12 = vld [vmem:[#allocation2 + $0x10e8] ss:$16 sps:$4 sm:$0xff]   ;;  %v8446_v22 = vld [vmem:[#allocation2 + $0x11cc] ss:$16 sps:$4 sm:$0xff]  }
 0x2a4   :  { %5578 = vmatpush1.bf16.msra.mxu0 %v8324_v3  ;;  %v8393_v3 = vld [vmem:[#allocation2 + $0x12e8] ss:$16 sps:$4 sm:$0xff]  }
 0x2a5   :  { %5619 = vmatpush1.bf16.msra.mxu1 %v8327_v18  ;;  %5579 = vmatprep.subr.bf16.mxu0 %v8332_v19  ;;  %v8398_v18 = vld [vmem:[#allocation2 + $0x10cc] ss:$16 sps:$4 sm:$0xff]  }
 0x2a6   :  { %5620 = vmatprep.subr.bf16.mxu1 %v8335_v21  ;;  %v8401_v19 = vld [vmem:[#allocation2 + $0x12cc] ss:$16 sps:$4 sm:$0xff]   ;;  %v900_v21 = vrot.slane %v8694_v8, %v899_v40  ;;  %v8447_v40 = vld [vmem:[#allocation2 + $0x13c8] ss:$16 sps:$4 sm:$0xff]  }
 0x2a7   :  { %v8452_v8 = vld [vmem:[#allocation2 + $0x11ac] ss:$16 sps:$4 sm:$0xff]  }
 0x2a8   :  { %5580 = vmatpush1.bf16.msra.mxu0 %v8330_v16 }
 0x2a9   :  { %5621 = vmatpush1.bf16.msra.mxu1 %v8333_v17  ;;  %5581 = vmatprep.subr.bf16.mxu0 %v8338_v28 }
 0x2aa   :  { %5622 = vmatprep.subr.bf16.mxu1 %v8341_v60  ;;  %v8396_v60 = vld [vmem:[#allocation2 + $0x10c8] ss:$16 sps:$4 sm:$0xff]  }
 0x2ac   :  { %5582 = vmatpush1.bf16.msra.mxu0 %v8336_v61  ;;  %v8399_v61 = vld [vmem:[#allocation2 + $0x12c8] ss:$16 sps:$4 sm:$0xff]  }
 0x2ad   :  { %5623 = vmatpush1.bf16.msra.mxu1 %v8339_v29  ;;  %5583 = vmatprep.subr.bf16.mxu0 %v8344_v30 }
 0x2ae   :  { %5624 = vmatprep.subr.bf16.mxu1 %v8347_v32  ;;  %v8404_v32 = vld [vmem:[#allocation2 + $0x10ac] ss:$16 sps:$4 sm:$0xff]  }
 0x2b0   :  { %5584 = vmatpush2.bf16.msra.mxu0 %v8342_v26  ;;  %v8407_v26 = vld [vmem:[#allocation2 + $0x12ac] ss:$16 sps:$4 sm:$0xff]  }
 0x2b1   :  { %5625 = vmatpush2.bf16.msra.mxu1 %v8345_v24  ;;  %5585 = vmatprep.subr.bf16.mxu0 %v8350_v25 }
 0x2b2   :  { %5626 = vmatprep.subr.bf16.mxu1 %v8353_v41 }
 0x2b4   :  { %5586 = vmatpush2.bf16.msra.mxu0 %v8348_v42  ;;  %v8402_v42 = vld [vmem:[#allocation2 + $0x10a8] ss:$16 sps:$4 sm:$0xff]  }
 0x2b5   :  { %5627 = vmatpush2.bf16.msra.mxu1 %v8351_v43  ;;  %5587 = vmatprep.subr.bf16.mxu0 %v8356_v6  ;;  %v8405_v43 = vld [vmem:[#allocation2 + $0x12a8] ss:$16 sps:$4 sm:$0xff]  }
 0x2b6   :  { %5628 = vmatprep.subr.bf16.mxu1 %v8359_v7 }
 0x2b8   :  { %5588 = vmatpush2.bf16.msra.mxu0 %v8354_v27  ;;  %v8410_v27 = vld [vmem:[#allocation2 + $0x108c] ss:$16 sps:$4 sm:$0xff]  }
 0x2b9   :  { %5629 = vmatpush2.bf16.msra.mxu1 %v8357_v44  ;;  %5589 = vmatprep.subr.bf16.mxu0 %v8362_v45  ;;  %v8413_v44 = vld [vmem:[#allocation2 + $0x128c] ss:$16 sps:$4 sm:$0xff]   ;;  %v8408_v45 = vld [vmem:[#allocation2 + $0x1088] ss:$16 sps:$4 sm:$0xff]  }
 0x2ba   :  { %5630 = vmatprep.subr.bf16.mxu1 %v8365_v46  ;;  %v8419_v46 = vld [vmem:[#allocation2 + $0x126c] ss:$16 sps:$4 sm:$0xff]  }
 0x2bc   :  { %5590 = vmatpush2.bf16.msra.mxu0 %v8360_v31  ;;  %v8414_v31 = vld [vmem:[#allocation2 + $0x1068] ss:$16 sps:$4 sm:$0xff]  }
 0x2bd   :  { %5631 = vmatpush2.bf16.msra.mxu1 %v8363_v48  ;;  %5591 = vmatprep.subr.bf16.mxu0 %v8368_v36  ;;  %v8417_v48 = vld [vmem:[#allocation2 + $0x1268] ss:$16 sps:$4 sm:$0xff]   ;;  %v8422_v36 = vld [vmem:[#allocation2 + $0x104c] ss:$16 sps:$4 sm:$0xff]  }
 0x2be   :  { %5632 = vmatprep.subr.bf16.mxu1 %v8371_v37  ;;  %v8425_v37 = vld [vmem:[#allocation2 + $0x124c] ss:$16 sps:$4 sm:$0xff]  }
 0x2c0   :  { %5592 = vmatpush2.bf16.msra.mxu0 %v8366_v33  ;;  %v8420_v33 = vld [vmem:[#allocation2 + $0x1048] ss:$16 sps:$4 sm:$0xff]  }
 0x2c1   :  { %5633 = vmatpush2.bf16.msra.mxu1 %v8369_v49  ;;  %5593 = vmatprep.subr.bf16.mxu0 %v8374_v47  ;;  %v8423_v49 = vld [vmem:[#allocation2 + $0x1248] ss:$16 sps:$4 sm:$0xff]   ;;  %v8428_v47 = vld [vmem:[#allocation2 + $0x102c] ss:$16 sps:$4 sm:$0xff]  }
 0x2c2   :  { %5634 = vmatprep.subr.bf16.mxu1 %v8377_v51  ;;  %v8431_v51 = vld [vmem:[#allocation2 + $0x122c] ss:$16 sps:$4 sm:$0xff]  }
 0x2c4   :  { %5594 = vmatpush2.bf16.msra.mxu0 %v8372_v52  ;;  %v8426_v52 = vld [vmem:[#allocation2 + $0x1028] ss:$16 sps:$4 sm:$0xff]  }
 0x2c5   :  { %5635 = vmatpush2.bf16.msra.mxu1 %v8375_v38  ;;  %5595 = vmatprep.subr.bf16.mxu0 %v8380_v39  ;;  %v8429_v38 = vld [vmem:[#allocation2 + $0x1228] ss:$16 sps:$4 sm:$0xff]   ;;  %v8434_v39 = vld [vmem:[#allocation2 + $0x100c] ss:$16 sps:$4 sm:$0xff]  }
 0x2c6   :  { %5636 = vmatprep.subr.bf16.mxu1 %v8383_v53  ;;  %v8437_v53 = vld [vmem:[#allocation2 + $0x120c] ss:$16 sps:$4 sm:$0xff]  }
 0x2c8   :  { %5596 = vmatpush2.bf16.msra.mxu0 %v8378_v55  ;;  %v8432_v55 = vld [vmem:[#allocation2 + $0x1008] ss:$16 sps:$4 sm:$0xff]  }
 0x2c9   :  { %5637 = vmatpush2.bf16.msra.mxu1 %v8381_v56  ;;  %5597 = vmatprep.subr.bf16.mxu0 %v8386_v57  ;;  %v8435_v56 = vld [vmem:[#allocation2 + $0x1208] ss:$16 sps:$4 sm:$0xff]   ;;  %v8440_v57 = vld [vmem:[#allocation2 + $0x11ec] ss:$16 sps:$4 sm:$0xff]  }
 0x2ca   :  { %5638 = vmatprep.subr.bf16.mxu1 %v8389_v58  ;;  %v8443_v58 = vld [vmem:[#allocation2 + $0x13ec] ss:$16 sps:$4 sm:$0xff]  }
 0x2cc   :  { %5598 = vmatpush2.bf16.msra.mxu0 %v8384_v62  ;;  %v8438_v62 = vld [vmem:[#allocation2 + $0x11e8] ss:$16 sps:$4 sm:$0xff]  }
 0x2cd   :  { %5639 = vmatpush2.bf16.msra.mxu1 %v8387_v34  ;;  %5649 = vmatprep.subr.bf16.mxu0 %v8392_v23  ;;  %v8441_v34 = vld [vmem:[#allocation2 + $0x13e8] ss:$16 sps:$4 sm:$0xff]   ;;  %v8449_v23 = vld [vmem:[#allocation2 + $0x13cc] ss:$16 sps:$4 sm:$0xff]  }
 0x2ce   :  { %5690 = vmatprep.subr.bf16.mxu1 %v8395_v35  ;;  %v8444_v35 = vld [vmem:[#allocation2 + $0x11c8] ss:$16 sps:$4 sm:$0xff]  }
 0x2cf   :  { %v5355_v16 = vpop.f32.mrf.mxu0  ;;  %5600 = vmatmul.mubr.bf16.vlgmr.msra.gmra.mxu0 %v8997_v0 }
 0x2d0   :  { %v5396_v17 = vpop.f32.mrf.mxu1  ;;  %5641 = vmatmul.mubr.bf16.vlgmr.msra.gmra.mxu1 %v9001_v1  ;;  %v5356_v28 = vadd.f32 %v5355_v16, %v896_v11  ;;  %5650 = vmatpush1.bf16.msra.mxu0 %v8390_v12  ;;  %v8455_v11 = vld [vmem:[#allocation2 + $0x13ac] ss:$16 sps:$4 sm:$0xff]   ;;  %v8450_v12 = vld [vmem:[#allocation2 + $0x11a8] ss:$16 sps:$4 sm:$0xff]  }
 0x2d1   :  { %5691 = vmatpush1.bf16.msra.mxu1 %v8393_v3  ;;  %v5357_v29 = vpop.f32.mrf.mxu0  ;;  %5651 = vmatprep.subr.bf16.mxu0 %v8398_v18  ;;  %v8453_v3 = vld [vmem:[#allocation2 + $0x13a8] ss:$16 sps:$4 sm:$0xff]   ;;  %v8458_v18 = vld [vmem:[#allocation2 + $0x118c] ss:$16 sps:$4 sm:$0xff]  }
 0x2d2   :  { %v5398_v30 = vpop.f32.mrf.mxu1  ;;  %5692 = vmatprep.subr.bf16.mxu1 %v8401_v19  ;;  %v9121_v24 = vadd.f32 %v5396_v17, %v5356_v28  ;;  %v5358_v25 = vadd.f32 %v5357_v29, %v900_v21  ;;  %5681 = vmatprep.mubr.bf16.mxu0 %v9019_v9  ;;  %v8411_v9 = vld [vmem:[#allocation2 + $0x1288] ss:$16 sps:$4 sm:$0xff]   ;;  %v8461_v19 = vld [vmem:[#allocation2 + $0x138c] ss:$16 sps:$4 sm:$0xff]  }
 0x2d3   :  { %5722 = vmatprep.mubr.bf16.mxu1 %v9023_v10  ;;  %v5359_v0 = vpop.f32.mrf.mxu0  ;;  %v8416_v10 = vld [vmem:[#allocation2 + $0x106c] ss:$16 sps:$4 sm:$0xff]   ;;  %v8456_v21 = vld [vmem:[#allocation2 + $0x1188] ss:$16 sps:$4 sm:$0xff]  }
 0x2d4   :  { %v5400_v1 = vpop.f32.mrf.mxu1  ;;  %v9125_v41 = vadd.f32 %v5398_v30, %v5358_v25  ;;  %5652 = vmatpush1.bf16.msra.mxu0 %v8396_v60  ;;  %v8459_v16 = vld [vmem:[#allocation2 + $0x1388] ss:$16 sps:$4 sm:$0xff]   ;;  %v8464_v17 = vld [vmem:[#allocation2 + $0x116c] ss:$16 sps:$4 sm:$0xff]  }
 0x2d5   :  { %5693 = vmatpush1.bf16.msra.mxu1 %v8399_v61  ;;  %v5360_v6 = vpop.f32.mrf.mxu0  ;;  %5653 = vmatprep.subr.bf16.mxu0 %v8404_v32  ;;  %v8467_v28 = vld [vmem:[#allocation2 + $0x136c] ss:$16 sps:$4 sm:$0xff]   ;;  %v8462_v60 = vld [vmem:[#allocation2 + $0x1168] ss:$16 sps:$4 sm:$0xff]  }
 0x2d6   :  { %v5401_v7 = vpop.f32.mrf.mxu1  ;;  %5694 = vmatprep.subr.bf16.mxu1 %v8407_v26  ;;  %v8465_v61 = vld [vmem:[#allocation2 + $0x1368] ss:$16 sps:$4 sm:$0xff]   ;;  %v8470_v29 = vld [vmem:[#allocation2 + $0x114c] ss:$16 sps:$4 sm:$0xff]  }
 0x2d7   :  { %v8473_v30 = vld [vmem:[#allocation2 + $0x134c] ss:$16 sps:$4 sm:$0xff]   ;;  %v8468_v32 = vld [vmem:[#allocation2 + $0x1148] ss:$16 sps:$4 sm:$0xff]  }
 0x2d8   :  { %5654 = vmatpush1.bf16.msra.mxu0 %v8402_v42  ;;  %v8471_v26 = vld [vmem:[#allocation2 + $0x1348] ss:$16 sps:$4 sm:$0xff]   ;;  %v8476_v25 = vld [vmem:[#allocation2 + $0x112c] ss:$16 sps:$4 sm:$0xff]  }
 0x2d9   :  { %5695 = vmatpush1.bf16.msra.mxu1 %v8405_v43  ;;  %5655 = vmatprep.subr.bf16.mxu0 %v8410_v27  ;;  %v8479_v0 = vld [vmem:[#allocation2 + $0x132c] ss:$16 sps:$4 sm:$0xff]   ;;  %v8474_v1 = vld [vmem:[#allocation2 + $0x1128] ss:$16 sps:$4 sm:$0xff]  }
 0x2da   :  { %5696 = vmatprep.subr.bf16.mxu1 %v8413_v44  ;;  %v8477_v42 = vld [vmem:[#allocation2 + $0x1328] ss:$16 sps:$4 sm:$0xff]   ;;  %v8482_v43 = vld [vmem:[#allocation2 + $0x110c] ss:$16 sps:$4 sm:$0xff]  }
 0x2db   :  { %v8485_v6 = vld [vmem:[#allocation2 + $0x130c] ss:$16 sps:$4 sm:$0xff]   ;;  %v8480_v7 = vld [vmem:[#allocation2 + $0x1108] ss:$16 sps:$4 sm:$0xff]  }
 0x2dc   :  { %5656 = vmatpush1.bf16.msra.mxu0 %v8408_v45  ;;  %v8483_v27 = vld [vmem:[#allocation2 + $0x1308] ss:$16 sps:$4 sm:$0xff]   ;;  %v8488_v44 = vld [vmem:[#allocation2 + $0x14ec] ss:$16 sps:$4 sm:$0xff]  }
 0x2dd   :  { %5697 = vmatpush1.bf16.msra.mxu1 %v8411_v9  ;;  %5657 = vmatprep.subr.bf16.mxu0 %v8416_v10  ;;  %v8491_v45 = vld [vmem:[#allocation2 + $0x16ec] ss:$16 sps:$4 sm:$0xff]   ;;  %v8486_v9 = vld [vmem:[#allocation2 + $0x14e8] ss:$16 sps:$4 sm:$0xff]  }
 0x2de   :  { %5698 = vmatprep.subr.bf16.mxu1 %v8419_v46  ;;  %v8489_v10 = vld [vmem:[#allocation2 + $0x16e8] ss:$16 sps:$4 sm:$0xff]   ;;  %v8494_v46 = vld [vmem:[#allocation2 + $0x14cc] ss:$16 sps:$4 sm:$0xff]  }
 0x2e0   :  { %5658 = vmatpush1.bf16.msra.mxu0 %v8414_v31  ;;  %v8497_v31 = vld [vmem:[#allocation2 + $0x16cc] ss:$16 sps:$4 sm:$0xff]  }
 0x2e1   :  { %5699 = vmatpush1.bf16.msra.mxu1 %v8417_v48  ;;  %5659 = vmatprep.subr.bf16.mxu0 %v8422_v36 }
 0x2e2   :  { %5700 = vmatprep.subr.bf16.mxu1 %v8425_v37 }
 0x2e4   :  { %5660 = vmatpush1.bf16.msra.mxu0 %v8420_v33  ;;  %v8492_v33 = vld [vmem:[#allocation2 + $0x14c8] ss:$16 sps:$4 sm:$0xff]  }
 0x2e5   :  { %5701 = vmatpush1.bf16.msra.mxu1 %v8423_v49  ;;  %5661 = vmatprep.subr.bf16.mxu0 %v8428_v47  ;;  %v8495_v49 = vld [vmem:[#allocation2 + $0x16c8] ss:$16 sps:$4 sm:$0xff]  }
 0x2e6   :  { %5702 = vmatprep.subr.bf16.mxu1 %v8431_v51 }
 0x2e8   :  { %5662 = vmatpush1.bf16.msra.mxu0 %v8426_v52  ;;  %v8500_v52 = vld [vmem:[#allocation2 + $0x14ac] ss:$16 sps:$4 sm:$0xff]  }
 0x2e9   :  { %5703 = vmatpush1.bf16.msra.mxu1 %v8429_v38  ;;  %5663 = vmatprep.subr.bf16.mxu0 %v8434_v39  ;;  %v8503_v38 = vld [vmem:[#allocation2 + $0x16ac] ss:$16 sps:$4 sm:$0xff]  }
 0x2ea   :  { %5704 = vmatprep.subr.bf16.mxu1 %v8437_v53 }
 0x2ec   :  { %5664 = vmatpush1.bf16.msra.mxu0 %v8432_v55  ;;  %v8498_v55 = vld [vmem:[#allocation2 + $0x14a8] ss:$16 sps:$4 sm:$0xff]  }
 0x2ed   :  { %5705 = vmatpush1.bf16.msra.mxu1 %v8435_v56  ;;  %5665 = vmatprep.subr.bf16.mxu0 %v8440_v57  ;;  %v8501_v56 = vld [vmem:[#allocation2 + $0x16a8] ss:$16 sps:$4 sm:$0xff]  }
 0x2ee   :  { %5706 = vmatprep.subr.bf16.mxu1 %v8443_v58 }
 0x2f0   :  { %5666 = vmatpush2.bf16.msra.mxu0 %v8438_v62  ;;  %v8506_v62 = vld [vmem:[#allocation2 + $0x148c] ss:$16 sps:$4 sm:$0xff]  }
 0x2f1   :  { %5707 = vmatpush2.bf16.msra.mxu1 %v8441_v34  ;;  %5667 = vmatprep.subr.bf16.mxu0 %v8446_v22  ;;  %v8509_v34 = vld [vmem:[#allocation2 + $0x168c] ss:$16 sps:$4 sm:$0xff]  }
 0x2f2   :  { %5708 = vmatprep.subr.bf16.mxu1 %v8449_v23  ;;  %v8515_v22 = vld [vmem:[#allocation2 + $0x166c] ss:$16 sps:$4 sm:$0xff]   ;;  %v8510_v23 = vld [vmem:[#allocation2 + $0x1468] ss:$16 sps:$4 sm:$0xff]  }
 0x2f4   :  { %5668 = vmatpush2.bf16.msra.mxu0 %v8444_v35  ;;  %v8513_v35 = vld [vmem:[#allocation2 + $0x1668] ss:$16 sps:$4 sm:$0xff]  }
 0x2f5   :  { %5709 = vmatpush2.bf16.msra.mxu1 %v8447_v40  ;;  %5669 = vmatprep.subr.bf16.mxu0 %v8452_v8  ;;  %v8518_v40 = vld [vmem:[#allocation2 + $0x144c] ss:$16 sps:$4 sm:$0xff]  }
 0x2f6   :  { %5710 = vmatprep.subr.bf16.mxu1 %v8455_v11  ;;  %v8521_v8 = vld [vmem:[#allocation2 + $0x164c] ss:$16 sps:$4 sm:$0xff]   ;;  %v8516_v11 = vld [vmem:[#allocation2 + $0x1448] ss:$16 sps:$4 sm:$0xff]  }
 0x2f8   :  { %5670 = vmatpush2.bf16.msra.mxu0 %v8450_v12  ;;  %v8519_v12 = vld [vmem:[#allocation2 + $0x1648] ss:$16 sps:$4 sm:$0xff]  }
 0x2f9   :  { %5711 = vmatpush2.bf16.msra.mxu1 %v8453_v3  ;;  %5671 = vmatprep.subr.bf16.mxu0 %v8458_v18  ;;  %v8524_v3 = vld [vmem:[#allocation2 + $0x142c] ss:$16 sps:$4 sm:$0xff]  }
 0x2fa   :  { %5712 = vmatprep.subr.bf16.mxu1 %v8461_v19  ;;  %v8527_v18 = vld [vmem:[#allocation2 + $0x162c] ss:$16 sps:$4 sm:$0xff]   ;;  %v8522_v19 = vld [vmem:[#allocation2 + $0x1428] ss:$16 sps:$4 sm:$0xff]  }
 0x2fc   :  { %5672 = vmatpush2.bf16.msra.mxu0 %v8456_v21  ;;  %v8525_v21 = vld [vmem:[#allocation2 + $0x1628] ss:$16 sps:$4 sm:$0xff]  }
 0x2fd   :  { %5713 = vmatpush2.bf16.msra.mxu1 %v8459_v16  ;;  %5673 = vmatprep.subr.bf16.mxu0 %v8464_v17  ;;  %v8530_v16 = vld [vmem:[#allocation2 + $0x140c] ss:$16 sps:$4 sm:$0xff]  }
 0x2fe   :  { %5714 = vmatprep.subr.bf16.mxu1 %v8467_v28  ;;  %v8533_v17 = vld [vmem:[#allocation2 + $0x160c] ss:$16 sps:$4 sm:$0xff]   ;;  %v8528_v28 = vld [vmem:[#allocation2 + $0x1408] ss:$16 sps:$4 sm:$0xff]  }
 0x300   :  { %5674 = vmatpush2.bf16.msra.mxu0 %v8462_v60  ;;  %v8531_v60 = vld [vmem:[#allocation2 + $0x1608] ss:$16 sps:$4 sm:$0xff]  }
 0x301   :  { %5715 = vmatpush2.bf16.msra.mxu1 %v8465_v61  ;;  %5675 = vmatprep.subr.bf16.mxu0 %v8470_v29  ;;  %v8536_v61 = vld [vmem:[#allocation2 + $0x15ec] ss:$16 sps:$4 sm:$0xff]  }
 0x302   :  { %5716 = vmatprep.subr.bf16.mxu1 %v8473_v30  ;;  %v8539_v29 = vld [vmem:[#allocation2 + $0x17ec] ss:$16 sps:$4 sm:$0xff]   ;;  %v8534_v30 = vld [vmem:[#allocation2 + $0x15e8] ss:$16 sps:$4 sm:$0xff]  }
 0x304   :  { %5676 = vmatpush2.bf16.msra.mxu0 %v8468_v32  ;;  %v8537_v32 = vld [vmem:[#allocation2 + $0x17e8] ss:$16 sps:$4 sm:$0xff]  }
 0x305   :  { %5717 = vmatpush2.bf16.msra.mxu1 %v8471_v26  ;;  %5677 = vmatprep.subr.bf16.mxu0 %v8476_v25  ;;  %v8542_v26 = vld [vmem:[#allocation2 + $0x15cc] ss:$16 sps:$4 sm:$0xff]  }
 0x306   :  { %5718 = vmatprep.subr.bf16.mxu1 %v8479_v0  ;;  %v8545_v25 = vld [vmem:[#allocation2 + $0x17cc] ss:$16 sps:$4 sm:$0xff]   ;;  %v8540_v0 = vld [vmem:[#allocation2 + $0x15c8] ss:$16 sps:$4 sm:$0xff]  }
 0x308   :  { %5678 = vmatpush2.bf16.msra.mxu0 %v8474_v1  ;;  %v8543_v1 = vld [vmem:[#allocation2 + $0x17c8] ss:$16 sps:$4 sm:$0xff]  }
 0x309   :  { %5719 = vmatpush2.bf16.msra.mxu1 %v8477_v42  ;;  %5679 = vmatprep.subr.bf16.mxu0 %v8482_v43  ;;  %v8548_v42 = vld [vmem:[#allocation2 + $0x15ac] ss:$16 sps:$4 sm:$0xff]  }
 0x30a   :  { %5720 = vmatprep.subr.bf16.mxu1 %v8485_v6  ;;  %v8551_v43 = vld [vmem:[#allocation2 + $0x17ac] ss:$16 sps:$4 sm:$0xff]   ;;  %v8546_v6 = vld [vmem:[#allocation2 + $0x15a8] ss:$16 sps:$4 sm:$0xff]  }
 0x30c   :  { %5680 = vmatpush2.bf16.msra.mxu0 %v8480_v7  ;;  %v8549_v7 = vld [vmem:[#allocation2 + $0x17a8] ss:$16 sps:$4 sm:$0xff]  }
 0x30d   :  { %5721 = vmatpush2.bf16.msra.mxu1 %v8483_v27  ;;  %5731 = vmatprep.subr.bf16.mxu0 %v8488_v44  ;;  %v8554_v27 = vld [vmem:[#allocation2 + $0x158c] ss:$16 sps:$4 sm:$0xff]  }
 0x30e   :  { %5772 = vmatprep.subr.bf16.mxu1 %v8491_v45  ;;  %v8557_v44 = vld [vmem:[#allocation2 + $0x178c] ss:$16 sps:$4 sm:$0xff]   ;;  %v8552_v45 = vld [vmem:[#allocation2 + $0x1588] ss:$16 sps:$4 sm:$0xff]  }
 0x30f   :  { %v5437_v48 = vpop.f32.mrf.mxu0  ;;  %5682 = vmatmul.mubr.bf16.vlgmr.msra.gmra.mxu0 %v9045_v4 }
 0x310   :  { %v5478_v36 = vpop.f32.mrf.mxu1  ;;  %5723 = vmatmul.mubr.bf16.vlgmr.msra.gmra.mxu1 %v9049_v5  ;;  %v5438_v37 = vadd.f32 %v5437_v48, %v9121_v24  ;;  %5732 = vmatpush1.bf16.msra.mxu0 %v8486_v9  ;;  %v8555_v9 = vld [vmem:[#allocation2 + $0x1788] ss:$16 sps:$4 sm:$0xff]  }
 0x311   :  { %5773 = vmatpush1.bf16.msra.mxu1 %v8489_v10  ;;  %v5439_v47 = vpop.f32.mrf.mxu0  ;;  %5733 = vmatprep.subr.bf16.mxu0 %v8494_v46  ;;  %v8560_v10 = vld [vmem:[#allocation2 + $0x156c] ss:$16 sps:$4 sm:$0xff]   ;;  %v8561_v48 = vld [vmem:[#allocation2 + $0x1768] ss:$16 sps:$4 sm:$0xff]  }
 0x312   :  { %v5480_v51 = vpop.f32.mrf.mxu1  ;;  %5774 = vmatprep.subr.bf16.mxu1 %v8497_v31  ;;  %v9130_v39 = vadd.f32 %v5478_v36, %v5438_v37  ;;  %v5440_v53 = vadd.f32 %v5439_v47, %v9125_v41  ;;  %5763 = vmatprep.mubr.bf16.mxu0 %v9053_v13  ;;  %v8504_v41 = vld [vmem:[#allocation2 + $0x1488] ss:$16 sps:$4 sm:$0xff]   ;;  %v8563_v46 = vld [vmem:[#allocation2 + $0x176c] ss:$16 sps:$4 sm:$0xff]  }
 0x313   :  { %5804 = vmatprep.mubr.bf16.mxu1 %v9057_v2  ;;  %v5441_v4 = vpop.f32.mrf.mxu0  ;;  %v8507_v13 = vld [vmem:[#allocation2 + $0x1688] ss:$16 sps:$4 sm:$0xff]   ;;  %v8512_v2 = vld [vmem:[#allocation2 + $0x146c] ss:$16 sps:$4 sm:$0xff]  }
 0x314   :  { %v5482_v5 = vpop.f32.mrf.mxu1  ;;  %v9135_v24 = vadd.f32 %v5480_v51, %v5440_v53  ;;  %5734 = vmatpush1.bf16.msra.mxu0 %v8492_v33  ;;  %v8558_v31 = vld [vmem:[#allocation2 + $0x1568] ss:$16 sps:$4 sm:$0xff]   ;;  %v8566_v36 = vld [vmem:[#allocation2 + $0x154c] ss:$16 sps:$4 sm:$0xff]  }
 0x315   :  { %5775 = vmatpush1.bf16.msra.mxu1 %v8495_v49  ;;  %v5442_v57 = vpop.f32.mrf.mxu0  ;;  %5735 = vmatprep.subr.bf16.mxu0 %v8500_v52  ;;  %v8569_v37 = vld [vmem:[#allocation2 + $0x174c] ss:$16 sps:$4 sm:$0xff]   ;;  %v8564_v33 = vld [vmem:[#allocation2 + $0x1548] ss:$16 sps:$4 sm:$0xff]   ;;  %v5818_v5 = vmul.f32 0.2, %v9115_v20 }
 0x316   :  { %v5483_v58 = vpop.f32.mrf.mxu1  ;;  %5776 = vmatprep.subr.bf16.mxu1 %v8503_v38  ;;  %v8567_v49 = vld [vmem:[#allocation2 + $0x1748] ss:$16 sps:$4 sm:$0xff]   ;;  %v8572_v47 = vld [vmem:[#allocation2 + $0x152c] ss:$16 sps:$4 sm:$0xff]  }
 0x317   :  { %v8575_v51 = vld [vmem:[#allocation2 + $0x172c] ss:$16 sps:$4 sm:$0xff]   ;;  %v8570_v52 = vld [vmem:[#allocation2 + $0x1528] ss:$16 sps:$4 sm:$0xff]   ;;  %v5822_v58 = vsel %vm5814_vm0, %v9115_v20, %v5818_v5 }
 0x318   :  { %5736 = vmatpush1.bf16.msra.mxu0 %v8498_v55  ;;  %v8573_v38 = vld [vmem:[#allocation2 + $0x1728] ss:$16 sps:$4 sm:$0xff]   ;;  %v8578_v53 = vld [vmem:[#allocation2 + $0x150c] ss:$16 sps:$4 sm:$0xff]  }
 0x319   :  { %5777 = vmatpush1.bf16.msra.mxu1 %v8501_v56  ;;  %5737 = vmatprep.subr.bf16.mxu0 %v8506_v62  ;;  %v8581_v4 = vld [vmem:[#allocation2 + $0x170c] ss:$16 sps:$4 sm:$0xff]   ;;  %v8576_v55 = vld [vmem:[#allocation2 + $0x1508] ss:$16 sps:$4 sm:$0xff]  }
 0x31a   :  { %5778 = vmatprep.subr.bf16.mxu1 %v8509_v34  ;;  %v8579_v56 = vld [vmem:[#allocation2 + $0x1708] ss:$16 sps:$4 sm:$0xff]   ;;  %v8582_v62 = vld [vmem:[#allocation6 + $0x70] ss:$8 sps:$4 sm:$0xff]   ;;  %v8657_v5 = vld [vmem:[#allocation6 + $0x1e0] ss:$8 sps:$4 sm:$0xff]  }
 0x31b   :  { %v8584_v57 = vld [vmem:[#allocation6 + $0x74] ss:$8 sps:$4 sm:$0xff]   ;;  %v8587_v34 = vld [vmem:[#allocation6 + $0x64] ss:$8 sps:$4 sm:$0xff]  }
 0x31c   :  { %5738 = vmatpush1.bf16.msra.mxu0 %v8504_v41  ;;  %v5826_v41 = vpack.c.bf16 %v5822_v58, %v5822_v58  ;;  %v8590_v20 = vld [vmem:[#allocation6 + $0x54] ss:$8 sps:$4 sm:$0xff]   ;;  %v8660_v58 = vld [vmem:[#allocation6 + $0x1d0] ss:$8 sps:$4 sm:$0xff]  }
 0x31d   :  { %5779 = vmatpush1.bf16.msra.mxu1 %v8507_v13  ;;  %5739 = vmatprep.subr.bf16.mxu0 %v8512_v2 }
 0x31e   :  { %5780 = vmatprep.subr.bf16.mxu1 %v8515_v22 }
 0x320   :  { %5740 = vmatpush1.bf16.msra.mxu0 %v8510_v23  ;;  %v8585_v23 = vld [vmem:[#allocation6 + $0x60] ss:$8 sps:$4 sm:$0xff]  }
 0x321   :  { %5781 = vmatpush1.bf16.msra.mxu1 %v8513_v35  ;;  %5741 = vmatprep.subr.bf16.mxu0 %v8518_v40 }
 0x322   :  { %5782 = vmatprep.subr.bf16.mxu1 %v8521_v8 }
 0x324   :  { %5742 = vmatpush1.bf16.msra.mxu0 %v8516_v11 }
 0x325   :  { %5783 = vmatpush1.bf16.msra.mxu1 %v8519_v12  ;;  %5743 = vmatprep.subr.bf16.mxu0 %v8524_v3 }
 0x326   :  { %5784 = vmatprep.subr.bf16.mxu1 %v8527_v18 }
 0x328   :  { %5744 = vmatpush1.bf16.msra.mxu0 %v8522_v19 }
 0x329   :  { %5785 = vmatpush1.bf16.msra.mxu1 %v8525_v21  ;;  %5745 = vmatprep.subr.bf16.mxu0 %v8530_v16  ;;  %v8630_v21 = vld [vmem:[#allocation6 + $0x170] ss:$8 sps:$4 sm:$0xff]   ;;  %v8632_v16 = vld [vmem:[#allocation6 + $0x174] ss:$8 sps:$4 sm:$0xff]  }
 0x32a   :  { %5786 = vmatprep.subr.bf16.mxu1 %v8533_v17  ;;  %v8635_v17 = vld [vmem:[#allocation6 + $0x164] ss:$8 sps:$4 sm:$0xff]  }
 0x32c   :  { %5746 = vmatpush1.bf16.msra.mxu0 %v8528_v28  ;;  %v8591_v28 = vld [vmem:[#allocation6 + $0x40] ss:$8 sps:$4 sm:$0xff]  }
 0x32d   :  { %5787 = vmatpush1.bf16.msra.mxu1 %v8531_v60  ;;  %5747 = vmatprep.subr.bf16.mxu0 %v8536_v61  ;;  %v8633_v60 = vld [vmem:[#allocation6 + $0x160] ss:$8 sps:$4 sm:$0xff]   ;;  %v8638_v61 = vld [vmem:[#allocation6 + $0x154] ss:$8 sps:$4 sm:$0xff]  }
 0x32e   :  { %5788 = vmatprep.subr.bf16.mxu1 %v8539_v29  ;;  %v8594_v29 = vld [vmem:[#allocation6 + $0x30] ss:$8 sps:$4 sm:$0xff]  }
 0x330   :  { %5748 = vmatpush2.bf16.msra.mxu0 %v8534_v30  ;;  %v8636_v30 = vld [vmem:[#allocation6 + $0x150] ss:$8 sps:$4 sm:$0xff]  }
 0x331   :  { %5789 = vmatpush2.bf16.msra.mxu1 %v8537_v32  ;;  %5749 = vmatprep.subr.bf16.mxu0 %v8542_v26  ;;  %v8599_v32 = vld [vmem:[#allocation6 + $0x24] ss:$8 sps:$4 sm:$0xff]  }
 0x332   :  { %5790 = vmatprep.subr.bf16.mxu1 %v8545_v25  ;;  %v8641_v26 = vld [vmem:[#allocation6 + $0x144] ss:$8 sps:$4 sm:$0xff]   ;;  %v8597_v25 = vld [vmem:[#allocation6 + $0x20] ss:$8 sps:$4 sm:$0xff]  }
 0x334   :  { %5750 = vmatpush2.bf16.msra.mxu0 %v8540_v0  ;;  %v8639_v0 = vld [vmem:[#allocation6 + $0x140] ss:$8 sps:$4 sm:$0xff]  }
 0x335   :  { %5791 = vmatpush2.bf16.msra.mxu1 %v8543_v1  ;;  %5751 = vmatprep.subr.bf16.mxu0 %v8548_v42  ;;  %v8602_v1 = vld [vmem:[#allocation6 + $0x14] ss:$8 sps:$4 sm:$0xff]  }
 0x336   :  { %5792 = vmatprep.subr.bf16.mxu1 %v8551_v43  ;;  %v8644_v42 = vld [vmem:[#allocation6 + $0x134] ss:$8 sps:$4 sm:$0xff]   ;;  %v8600_v43 = vld [vmem:[#allocation6 + $0x10] ss:$8 sps:$4 sm:$0xff]  }
 0x338   :  { %5752 = vmatpush2.bf16.msra.mxu0 %v8546_v6  ;;  %v8642_v6 = vld [vmem:[#allocation6 + $0x130] ss:$8 sps:$4 sm:$0xff]  }
 0x339   :  { %5793 = vmatpush2.bf16.msra.mxu1 %v8549_v7  ;;  %5753 = vmatprep.subr.bf16.mxu0 %v8554_v27  ;;  %v8605_v7 = vld [vmem:[#allocation6 + $0x4] ss:$8 sps:$4 sm:$0xff]  }
 0x33a   :  { %5794 = vmatprep.subr.bf16.mxu1 %v8557_v44  ;;  %v8647_v27 = vld [vmem:[#allocation6 + $0x124] ss:$8 sps:$4 sm:$0xff]   ;;  %v8603_v44 = vld [vmem:[#allocation6] ss:$8 sps:$4 sm:$0xff]  }
 0x33c   :  { %5754 = vmatpush2.bf16.msra.mxu0 %v8552_v45  ;;  %v8645_v45 = vld [vmem:[#allocation6 + $0x120] ss:$8 sps:$4 sm:$0xff]  }
 0x33d   :  { %5795 = vmatpush2.bf16.msra.mxu1 %v8555_v9  ;;  %5755 = vmatprep.subr.bf16.mxu0 %v8560_v10  ;;  %v8608_v9 = vld [vmem:[#allocation6 + $0xf4] ss:$8 sps:$4 sm:$0xff]  }
 0x33e   :  { %5796 = vmatprep.subr.bf16.mxu1 %v8563_v46  ;;  %v8650_v10 = vld [vmem:[#allocation6 + $0x114] ss:$8 sps:$4 sm:$0xff]   ;;  %v8606_v46 = vld [vmem:[#allocation6 + $0xf0] ss:$8 sps:$4 sm:$0xff]  }
 0x340   :  { %5756 = vmatpush2.bf16.msra.mxu0 %v8558_v31  ;;  %v8648_v31 = vld [vmem:[#allocation6 + $0x110] ss:$8 sps:$4 sm:$0xff]  }
 0x341   :  { %5797 = vmatpush2.bf16.msra.mxu1 %v8561_v48  ;;  %5757 = vmatprep.subr.bf16.mxu0 %v8566_v36  ;;  %v8611_v48 = vld [vmem:[#allocation6 + $0xe4] ss:$8 sps:$4 sm:$0xff]  }
 0x342   :  { %5798 = vmatprep.subr.bf16.mxu1 %v8569_v37  ;;  %v8653_v36 = vld [vmem:[#allocation6 + $0x104] ss:$8 sps:$4 sm:$0xff]   ;;  %v8609_v37 = vld [vmem:[#allocation6 + $0xe0] ss:$8 sps:$4 sm:$0xff]  }
 0x344   :  { %5758 = vmatpush2.bf16.msra.mxu0 %v8564_v33  ;;  %v8651_v33 = vld [vmem:[#allocation6 + $0x100] ss:$8 sps:$4 sm:$0xff]  }
 0x345   :  { %5799 = vmatpush2.bf16.msra.mxu1 %v8567_v49  ;;  %5759 = vmatprep.subr.bf16.mxu0 %v8572_v47  ;;  %v8614_v49 = vld [vmem:[#allocation6 + $0xd4] ss:$8 sps:$4 sm:$0xff]  }
 0x346   :  { %5800 = vmatprep.subr.bf16.mxu1 %v8575_v51  ;;  %v8656_v47 = vld [vmem:[#allocation6 + $0x1f4] ss:$8 sps:$4 sm:$0xff]   ;;  %v8612_v51 = vld [vmem:[#allocation6 + $0xd0] ss:$8 sps:$4 sm:$0xff]  }
 0x348   :  { %5760 = vmatpush2.bf16.msra.mxu0 %v8570_v52  ;;  %v8654_v52 = vld [vmem:[#allocation6 + $0x1f0] ss:$8 sps:$4 sm:$0xff]  }
 0x349   :  { %5801 = vmatpush2.bf16.msra.mxu1 %v8573_v38  ;;  %5761 = vmatprep.subr.bf16.mxu0 %v8578_v53  ;;  %v8617_v38 = vld [vmem:[#allocation6 + $0xc4] ss:$8 sps:$4 sm:$0xff]  }
 0x34a   :  { %5802 = vmatprep.subr.bf16.mxu1 %v8581_v4  ;;  %v8659_v53 = vld [vmem:[#allocation6 + $0x1e4] ss:$8 sps:$4 sm:$0xff]   ;;  %v8615_v4 = vld [vmem:[#allocation6 + $0xc0] ss:$8 sps:$4 sm:$0xff]  }
 0x34c   :  { %5762 = vmatpush2.bf16.msra.mxu0 %v8576_v55  ;;  %v8620_v55 = vld [vmem:[#allocation6 + $0xb4] ss:$8 sps:$4 sm:$0xff]  }
 0x34d   :  { %5803 = vmatpush2.bf16.msra.mxu1 %v8579_v56  ;;  %6225 = vmatprep.subr.bf16.mxu0 %v8584_v57  ;;  %v8662_v56 = vld [vmem:[#allocation6 + $0x1d4] ss:$8 sps:$4 sm:$0xff]   ;;  %v8618_v57 = vld [vmem:[#allocation6 + $0xb0] ss:$8 sps:$4 sm:$0xff]  }
 0x34e   :  { %6266 = vmatprep.subr.bf16.mxu1 %v8632_v16 }
 0x34f   :  { %v5519_v13 = vpop.f32.mrf.mxu0  ;;  %5764 = vmatmul.mubr.bf16.vlgmr.msra.gmra.mxu0 %v9071_v14  ;;  %v8588_v14 = vld [vmem:[#allocation6 + $0x50] ss:$8 sps:$4 sm:$0xff]  }
 0x350   :  { %v5560_v2 = vpop.f32.mrf.mxu1  ;;  %5805 = vmatmul.mubr.bf16.vlgmr.msra.gmra.mxu1 %v9075_v15  ;;  %v5520_v22 = vadd.f32 %v5519_v13, %v9130_v39  ;;  %6226 = vmatpush1.bf16.msra.mxu0 %v8582_v62  ;;  %v8593_v39 = vld [vmem:[#allocation6 + $0x44] ss:$8 sps:$4 sm:$0xff]   ;;  %v8663_v13 = vld [vmem:[#allocation6 + $0x1c0] ss:$8 sps:$4 sm:$0xff]  }
 0x351   :  { %6257 = vmatprep.mubr.bf16.mxu0 %v5826_v41  ;;  %v5521_v35 = vpop.f32.mrf.mxu0  ;;  %6227 = vmatprep.subr.bf16.mxu0 %v8587_v34  ;;  %v8623_v62 = vld [vmem:[#allocation6 + $0xa4] ss:$8 sps:$4 sm:$0xff]   ;;  %v8621_v41 = vld [vmem:[#allocation6 + $0xa0] ss:$8 sps:$4 sm:$0xff]  }
 0x352   :  { %v5562_v40 = vpop.f32.mrf.mxu1  ;;  %v9143_v8 = vadd.f32 %v5560_v2, %v5520_v22  ;;  %v5522_v11 = vadd.f32 %v5521_v35, %v9135_v24  ;;  %6267 = vmatpush1.bf16.msra.mxu1 %v8630_v21  ;;  %v8596_v24 = vld [vmem:[#allocation6 + $0x34] ss:$8 sps:$4 sm:$0xff]   ;;  %v8665_v34 = vld [vmem:[#allocation6 + $0x1c4] ss:$8 sps:$4 sm:$0xff]   ;;  %v8666_v35 = vld [vmem:[#allocation6 + $0x1b0] ss:$8 sps:$4 sm:$0xff]  }
 0x353   :  { %v5523_v12 = vpop.f32.mrf.mxu0  ;;  %6268 = vmatprep.subr.bf16.mxu1 %v8635_v17  ;;  %v8626_v2 = vld [vmem:[#allocation6 + $0x94] ss:$8 sps:$4 sm:$0xff]  }
 0x354   :  { %v5564_v3 = vpop.f32.mrf.mxu1  ;;  %v9146_v18 = vadd.f32 %v5562_v40, %v5522_v11  ;;  %6228 = vmatpush1.bf16.msra.mxu0 %v8585_v23  ;;  %v8668_v22 = vld [vmem:[#allocation6 + $0x1b4] ss:$8 sps:$4 sm:$0xff]   ;;  %v8624_v23 = vld [vmem:[#allocation6 + $0x90] ss:$8 sps:$4 sm:$0xff]   ;;  %v8629_v40 = vld [vmem:[#allocation6 + $0x84] ss:$8 sps:$4 sm:$0xff]  }
 0x355   :  { %v5524_v15 = vpop.f32.mrf.mxu0  ;;  %6229 = vmatprep.subr.bf16.mxu0 %v8590_v20  ;;  %v5817_v20 = vmul.f32 0.2, %v9110_v50  ;;  %v8627_v11 = vld [vmem:[#allocation6 + $0x80] ss:$8 sps:$4 sm:$0xff]  }
 0x356   :  { %v5565_v19 = vpop.f32.mrf.mxu1  ;;  %6269 = vmatpush1.bf16.msra.mxu1 %v8633_v60 }
 0x357   :  { %6270 = vmatprep.subr.bf16.mxu1 %v8638_v61  ;;  %v5821_v12 = vsel %vm5813_vm1, %v9110_v50, %v5817_v20  ;;  %v8672_v50 = vld [vmem:[#allocation6 + $0x190] ss:$8 sps:$4 sm:$0xff]  }
 0x358   :  { %6230 = vmatpush1.bf16.msra.mxu0 %v8588_v14  ;;  %v5825_v3 = vpack.c.bf16 %v5821_v12, %v5821_v12  ;;  %v8671_v14 = vld [vmem:[#allocation6 + $0x1a4] ss:$8 sps:$4 sm:$0xff]  }
 0x359   :  { %6231 = vmatprep.subr.bf16.mxu0 %v8593_v39  ;;  %v8669_v39 = vld [vmem:[#allocation6 + $0x1a0] ss:$8 sps:$4 sm:$0xff]  }
 0x35a   :  { %6271 = vmatpush1.bf16.msra.mxu1 %v8636_v30 }
 0x35b   :  { %6272 = vmatprep.subr.bf16.mxu1 %v8641_v26 }
 0x35c   :  { %6232 = vmatpush1.bf16.msra.mxu0 %v8591_v28 }
 0x35d   :  { %6233 = vmatprep.subr.bf16.mxu0 %v8596_v24  ;;  %v8674_v24 = vld [vmem:[#allocation6 + $0x194] ss:$8 sps:$4 sm:$0xff]  }
 0x35e   :  { %6273 = vmatpush1.bf16.msra.mxu1 %v8639_v0  ;;  %v8675_v0 = vld [vmem:[#allocation6 + $0x180] ss:$8 sps:$4 sm:$0xff]  }
 0x35f   :  { %6274 = vmatprep.subr.bf16.mxu1 %v8644_v42 }
 0x360   :  { %6234 = vmatpush1.bf16.msra.mxu0 %v8594_v29 }
 0x361   :  { %6235 = vmatprep.subr.bf16.mxu0 %v8599_v32 }
 0x362   :  { %6275 = vmatpush1.bf16.msra.mxu1 %v8642_v6 }
 0x363   :  { %6276 = vmatprep.subr.bf16.mxu1 %v8647_v27 }
 0x364   :  { %6236 = vmatpush1.bf16.msra.mxu0 %v8597_v25  ;;  %v8677_v25 = vld [vmem:[#allocation6 + $0x184] ss:$8 sps:$4 sm:$0xff]  }
 0x365   :  { %6237 = vmatprep.subr.bf16.mxu0 %v8602_v1 }
 0x366   :  { %6277 = vmatpush1.bf16.msra.mxu1 %v8645_v45 }
 0x367   :  { %6278 = vmatprep.subr.bf16.mxu1 %v8650_v10  ;;  %v8679_v10 = vld [vmem:[#allocation9 + $0x38] sm:$0xff]  }
 0x368   :  { %6238 = vmatpush1.bf16.msra.mxu0 %v8600_v43 }
 0x369   :  { %6239 = vmatprep.subr.bf16.mxu0 %v8605_v7 }
 0x36a   :  { %6279 = vmatpush1.bf16.msra.mxu1 %v8648_v31  ;;  %v8681_v31 = vld [vmem:[#allocation9 + $0x30] sm:$0xff]  }
 0x36b   :  { %6280 = vmatprep.subr.bf16.mxu1 %v8653_v36  ;;  %v8683_v36 = vld [vmem:[#allocation9 + $0x28] sm:$0xff]  }
 0x36c   :  { %6240 = vmatpush1.bf16.msra.mxu0 %v8603_v44 }
 0x36d   :  { %6241 = vmatprep.subr.bf16.mxu0 %v8608_v9  ;;  %v8678_v9 = vld [vmem:[#allocation9 + $0x78] sm:$0xff]  }
 0x36e   :  { %6281 = vmatpush1.bf16.msra.mxu1 %v8651_v33  ;;  %v8685_v33 = vld [vmem:[#allocation9 + $0x20] sm:$0xff]  }
 0x36f   :  { %6282 = vmatprep.subr.bf16.mxu1 %v8656_v47  ;;  %v8687_v47 = vld [vmem:[#allocation9 + $0x18] sm:$0xff]  }
 0x370   :  { %6242 = vmatpush2.bf16.msra.mxu0 %v8606_v46  ;;  %v8680_v46 = vld [vmem:[#allocation9 + $0x70] sm:$0xff]  }
 0x371   :  { %6243 = vmatprep.subr.bf16.mxu0 %v8611_v48  ;;  %v8682_v48 = vld [vmem:[#allocation9 + $0x68] sm:$0xff]  }
 0x372   :  { %6283 = vmatpush2.bf16.msra.mxu1 %v8654_v52 }
 0x373   :  { %6284 = vmatprep.subr.bf16.mxu1 %v8659_v53 }
 0x374   :  { %6244 = vmatpush2.bf16.msra.mxu0 %v8609_v37  ;;  %v8684_v37 = vld [vmem:[#allocation9 + $0x60] sm:$0xff]  }
 0x375   :  { %6245 = vmatprep.subr.bf16.mxu0 %v8614_v49  ;;  %v8686_v49 = vld [vmem:[#allocation9 + $0x58] sm:$0xff]  }
 0x376   :  { %6285 = vmatpush2.bf16.msra.mxu1 %v8657_v5 }
 0x377   :  { %6286 = vmatprep.subr.bf16.mxu1 %v8662_v56 }
 0x378   :  { %6246 = vmatpush2.bf16.msra.mxu0 %v8612_v51  ;;  %v8688_v51 = vld [vmem:[#allocation9 + $0x50] sm:$0xff]  }
 0x379   :  { %6247 = vmatprep.subr.bf16.mxu0 %v8617_v38 }
 0x37a   :  { %6287 = vmatpush2.bf16.msra.mxu1 %v8660_v58 }
 0x37b   :  { %6288 = vmatprep.subr.bf16.mxu1 %v8665_v34 }
 0x37c   :  { %6248 = vmatpush2.bf16.msra.mxu0 %v8615_v4 }
 0x37d   :  { %6249 = vmatprep.subr.bf16.mxu0 %v8620_v55 }
 0x37e   :  { %6289 = vmatpush2.bf16.msra.mxu1 %v8663_v13 }
 0x37f   :  { %6290 = vmatprep.subr.bf16.mxu1 %v8668_v22 }
 0x380   :  { %6250 = vmatpush2.bf16.msra.mxu0 %v8618_v57 }
 0x381   :  { %6251 = vmatprep.subr.bf16.mxu0 %v8623_v62 }
 0x382   :  { %6291 = vmatpush2.bf16.msra.mxu1 %v8666_v35 }
 0x383   :  { %6292 = vmatprep.subr.bf16.mxu1 %v8671_v14 }
 0x384   :  { %6252 = vmatpush2.bf16.msra.mxu0 %v8621_v41 }
 0x385   :  { %6253 = vmatprep.subr.bf16.mxu0 %v8626_v2 }
 0x386   :  { %6293 = vmatpush2.bf16.msra.mxu1 %v8669_v39  ;;  %v8690_v39 = vld [vmem:[#allocation9 + $0x48] sm:$0xff]  }
 0x387   :  { %6294 = vmatprep.subr.bf16.mxu1 %v8674_v24 }
 0x388   :  { %6254 = vmatpush2.bf16.msra.mxu0 %v8624_v23 }
 0x389   :  { %6255 = vmatprep.subr.bf16.mxu0 %v8629_v40 }
 0x38a   :  { %6295 = vmatpush2.bf16.msra.mxu1 %v8672_v50 }
 0x38b   :  { %6296 = vmatprep.subr.bf16.mxu1 %v8677_v25 }
 0x38c   :  { %6256 = vmatpush2.bf16.msra.mxu0 %v8627_v11 }
 0x38d   :  { %7372 = vmatprep.subr.bf16.mxu0 %v8678_v9 }
 0x38e   :  { %6297 = vmatpush2.bf16.msra.mxu1 %v8675_v0 }
 0x38f   :  { %v5601_v15 = vpop.f32.mrf.mxu0  ;;  %6258 = vmatmul.mubr.bf16.vlgmr.msra.gmra.mxu0 %v5825_v3 }
 0x390   :  { %v5642_v19 = vpop.f32.mrf.mxu1  ;;  %v5602_v21 = vadd.f32 %v5601_v15, %v9143_v8  ;;  %7373 = vmatpush3.bf16.msra.mxu0 %v8679_v10 }
 0x391   :  { %v5603_v16 = vpop.f32.mrf.mxu0  ;;  %7374 = vmatprep.subr.bf16.mxu0 %v8680_v46 }
 0x392   :  { %v5644_v17 = vpop.f32.mrf.mxu1  ;;  %v5643_v28 = vadd.f32 %v5642_v19, %v5602_v21  ;;  %v5604_v60 = vadd.f32 %v5603_v16, %v9146_v18  ;;  %v8689_v19 = vld [vmem:[#allocation9 + $0x10] sm:$0xff]   ;;  %v8691_v21 = vld [vmem:[#allocation9 + $0x8] sm:$0xff]   ;;  %v8692_v16 = vld [vmem:[#allocation9 + $0x40] sm:$0xff]  }
 0x393   :  { %v5605_v61 = vpop.f32.mrf.mxu0 }
 0x394   :  { %v5646_v29 = vpop.f32.mrf.mxu1  ;;  %v5645_v30 = vadd.f32 %v5644_v17, %v5604_v60  ;;  %7375 = vmatpush3.bf16.msra.mxu0 %v8681_v31  ;;  %v8693_v17 = vld [vmem:[#allocation9] sm:$0xff]  }
 0x395   :  { %v5606_v32 = vpop.f32.mrf.mxu0  ;;  %7376 = vmatprep.subr.bf16.mxu0 %v8682_v48 }
 0x396   :  { %v5647_v26 = vpop.f32.mrf.mxu1 }
 0x398   :  { %7377 = vmatpush3.bf16.msra.mxu0 %v8683_v36 }
 0x399   :  { %7378 = vmatprep.subr.bf16.mxu0 %v8684_v37 }
 0x39c   :  { %7379 = vmatpush3.bf16.msra.mxu0 %v8685_v33 }
 0x39d   :  { %7380 = vmatprep.subr.bf16.mxu0 %v8686_v49 }
 0x3a0   :  { %7381 = vmatpush3.bf16.msra.mxu0 %v8687_v47 }
 0x3a1   :  { %7382 = vmatprep.subr.bf16.mxu0 %v8688_v51 }
 0x3a4   :  { %7383 = vmatpush3.bf16.msra.mxu0 %v8689_v19 }
 0x3a5   :  { %7384 = vmatprep.subr.bf16.mxu0 %v8690_v39 }
 0x3a8   :  { %7385 = vmatpush3.bf16.msra.mxu0 %v8691_v21 }
 0x3a9   :  { %7386 = vmatprep.subr.bf16.mxu0 %v8692_v16 }
 0x3ac   :  { %7387 = vmatpush3.bf16.msra.mxu0 %v8693_v17 }
 0x3cf   :  { %v5683_v8 = vpop.f32.mrf.mxu0 }
 0x3d0   :  { %v5724_v1 = vpop.f32.mrf.mxu1  ;;  %v5684_v42 = vadd.f32 %v5683_v8, %v5643_v28  ;;  %v5893_v28 = vld [vmem:[#allocation7] sm:$0x3] }
 0x3d1   :  { %v5685_v43 = vpop.f32.mrf.mxu0  ;;  %v5898_v60 = vrot.slane %v5893_v28, %v887_v59  ;;  %v5902_v24 = vrot.slane %v5893_v28, %v891_v63  ;;  %v7355_v59 = vld [vmem:[#allocation10] ss:$0 sm:$0xff] }
 0x3d2   :  { %v5726_v6 = vpop.f32.mrf.mxu1  ;;  %v5725_v7 = vadd.f32 %v5724_v1, %v5684_v42  ;;  %v5686_v52 = vadd.f32 %v5685_v43, %v5645_v30 }
 0x3d3   :  { %v5687_v18 = vpop.f32.mrf.mxu0 }
 0x3d4   :  { %v5728_v27 = vpop.f32.mrf.mxu1  ;;  %v5727_v4 = vadd.f32 %v5726_v6, %v5686_v52 }
 0x3d5   :  { %v5688_v44 = vpop.f32.mrf.mxu0 }
 0x3d6   :  { %v5729_v45 = vpop.f32.mrf.mxu1 }
 0x40f   :  { %v5765_v38 = vpop.f32.mrf.mxu0 }
 0x410   :  { %v5806_v53 = vpop.f32.mrf.mxu1  ;;  %v5766_v5 = vadd.f32 %v5765_v38, %v5725_v7 }
 0x411   :  { %v5767_v55 = vpop.f32.mrf.mxu0 }
 0x412   :  { %v5808_v56 = vpop.f32.mrf.mxu1  ;;  %v5807_v57 = vadd.f32 %v5806_v53, %v5766_v5  ;;  %v5768_v58 = vadd.f32 %v5767_v55, %v5727_v4 }
 0x413   :  { %v5769_v62 = vpop.f32.mrf.mxu0 }
 0x414   :  { %v5810_v34 = vpop.f32.mrf.mxu1  ;;  %vm5815_vm2 = vcmp.gt.f32.partialorder %v5807_v57, 0.0  ;;  %v5819_v41 = vmul.f32 0.2, %v5807_v57  ;;  %v5809_v13 = vadd.f32 %v5808_v56, %v5768_v58 }
 0x415   :  { %v5770_v2 = vpop.f32.mrf.mxu0 }
 0x416   :  { %v5811_v22 = vpop.f32.mrf.mxu1  ;;  %vm5816_vm3 = vcmp.gt.f32.partialorder %v5809_v13, 0.0  ;;  %v5820_v23 = vmul.f32 0.2, %v5809_v13  ;;  %v5823_v35 = vsel %vm5815_vm2, %v5807_v57, %v5819_v41 }
 0x417   :  { %v5827_v11 = vpack.c.bf16 %v5823_v35, %v5823_v35 }
 0x418   :  { %v5824_v40 = vsel %vm5816_vm3, %v5809_v13, %v5820_v23 }
 0x419   :  { %v5828_v20 = vpack.c.bf16 %v5824_v40, %v5824_v40 }
 0x41b   :  { %6298 = vmatprep.mubr.bf16.mxu1 %v5828_v20 }
 0x41c   :  { %6299 = vmatmul.mubr.bf16.vlgmr.msra.gmra.mxu1 %v5827_v11 }
 0x44f   :  { %v6259_v12 = vpop.f32.mrf.mxu0 }
 0x450   :  { %v6260_v61 = vadd.f32 %v6259_v12, %v5898_v60 }
 0x451   :  { %v6261_v3 = vpop.f32.mrf.mxu0 }
 0x452   :  { %v6262_v50 = vadd.f32 %v6261_v3, %v5902_v24 }
 0x453   :  { %v6263_v14 = vpop.f32.mrf.mxu0 }
 0x455   :  { %v6264_v15 = vpop.f32.mrf.mxu0 }
 0x4dc   :  { %v6300_v29 = vpop.f32.mrf.mxu1 }
 0x4dd   :  { %v6301_v30 = vadd.f32 %v6300_v29, %v6260_v61 }
 0x4de   :  { %v6302_v32 = vpop.f32.mrf.mxu1 }
 0x4df   :  { %vm6307_vm4 = vcmp.gt.f32.partialorder %v6301_v30, 0.0  ;;  %v6309_v26 = vmul.f32 0.2, %v6301_v30  ;;  %v6303_v25 = vadd.f32 %v6302_v32, %v6262_v50 }
 0x4e0   :  { %v6304_v0 = vpop.f32.mrf.mxu1 }
 0x4e1   :  { %vm6308_vm5 = vcmp.gt.f32.partialorder %v6303_v25, 0.0  ;;  %v6310_v8 = vmul.f32 0.2, %v6303_v25  ;;  %v6311_v1 = vsel %vm6307_vm4, %v6301_v30, %v6309_v26 }
 0x4e2   :  { %v6305_v42 = vpop.f32.mrf.mxu1  ;;  %v6313_v7 = vpack.c.bf16 %v6311_v1, %v6311_v1 }
 0x4e3   :  { %v6312_v43 = vsel %vm6308_vm5, %v6303_v25, %v6310_v8 }
 0x4e4   :  { %v6314_v6 = vpack.c.bf16 %v6312_v43, %v6312_v43 }
 0x4e6   :  { %6482 = vmatprep.mubr.bf16.mxu0 %v6314_v6 }
 0x4e7   :  { %6483 = vmatmul.mubr.bf16.vlgmr.msra.gmra.mxu0 %v6313_v7 }
 0x5a7   :  { %v7388_v54 = vpop.f32.mrf.mxu0 }
 0x5a9   :  { %v7389_v63 = vpop.f32.mrf.mxu0 }
 0x5aa   :  { %v7390_v18 = vadd.f32 %v7389_v63, %v7388_v54 }
 0x5ab   :  { %v7391_v27 = vpop.f32.mrf.mxu0 }
 0x5ac   :  { %v6485_v44 = vadd.f32 %v7390_v18, %v7355_v59 }
 0x5ad   :  { %v7392_v45 = vpop.f32.mrf.mxu0 }
 0x5ae   :  { %6490 = vst [vmem:[%s9167_s7] sm:$0xff] %v6485_v44 }
 0x5af   :  { %6495 = vsyncpa [#allocation3], 1 }
 0x5b0   :  { %6496 = vsyncpa [#allocation5], 1 }
 0x5b1   :  { %6497 = vsyncpa [#allocation8], 1 }
 0x5b2   :  { %6498 = vsyncpa [#allocation11], 1 }

</bundles_post_ra>
